<compile_context>
chip_gen: v7x
topology: tpu7x:2x2x1
jax: 0.10.0
libtpu: 0.0.40
codegen_flags: <defaults>
</compile_context>

<pallas_src>
import functools

import jax
import jax.numpy as jnp
from jax import lax
from jax.experimental import pallas as pl
from jax.experimental.pallas import tpu as pltpu


# ---------------------------------------------------------------------------
# Tiling helpers
# ---------------------------------------------------------------------------
def _largest_divisor_leq(n, cap):
    cap = max(1, min(cap, n))
    for d in range(cap, 0, -1):
        if n % d == 0:
            return d
    return 1


def _row_tile(h, cap=64, floor=8):
    """Largest divisor of h that is <= max(floor, min(cap, h // 2))."""
    target = max(floor, min(cap, max(1, h // 2)))
    return _largest_divisor_leq(h, target)


# ---------------------------------------------------------------------------
# Kernels
# ---------------------------------------------------------------------------
def _deconv2x2_kernel(x_ref, w0_ref, w1_ref, b_ref, o_ref):
    """ConvTranspose2d(k=2, s=2) on one (batch, row-stripe) tile.

    x : (1, th, W, Cin)
    w0: (Cin, 2*Cout)  columns ordered (kx, co), taps ky=0
    w1: (Cin, 2*Cout)  taps ky=1
    b : (1, 2*Cout)
    o : (1, th, 2, W, 2*Cout)  -- bit-identical to (B, 2H, 2W, Cout) NHWC
    """
    th, w, cin = x_ref.shape[1], x_ref.shape[2], x_ref.shape[3]
    x = x_ref[0].reshape(th * w, cin)
    y0 = jnp.dot(x, w0_ref[...], preferred_element_type=jnp.float32) + b_ref[...]
    y1 = jnp.dot(x, w1_ref[...], preferred_element_type=jnp.float32) + b_ref[...]
    n = y0.shape[-1]
    o_ref[0, :, 0, :, :] = y0.reshape(th, w, n).astype(o_ref.dtype)
    o_ref[0, :, 1, :, :] = y1.reshape(th, w, n).astype(o_ref.dtype)


def _conv3x3_bn_relu_kernel(n_src, *refs):
    """Fused 3x3 conv (pad=1, no bias) + BatchNorm affine + ReLU on one row-stripe.

    For each source s (channel-concatenated logically):
      center (1, th, W+2, Cs)   padded rows [i*th, i*th+th)
      halo1  (1, 1,  W+2, Cs)   padded row   i*th+th
      halo2  (1, 1,  W+2, Cs)   padded row   i*th+th+1
    Then: w (9*sum(Cs), Cout) rows ordered (ky, kx, cin-concat),
          scale (1, Cout), shift (1, Cout), out (1, th, W, Cout).
    """
    w_ref, scale_ref, shift_ref, o_ref = refs[3 * n_src:]
    th, wid, cout = o_ref.shape[1], o_ref.shape[2], o_ref.shape[3]
    m = th * wid

    # Assemble the (th+2, W+2, C) halo'd stripe per source, then fuse the concat.
    xs = []
    for s in range(n_src):
        c_ref, h1_ref, h2_ref = refs[3 * s: 3 * s + 3]
        xs.append(jnp.concatenate([c_ref[0], h1_ref[0], h2_ref[0]], axis=0))
    xcat = xs[0] if n_src == 1 else jnp.concatenate(xs, axis=-1)
    ctot = xcat.shape[-1]

    # im2col: fold the 9 taps into the contraction dim -> one MXU dot (K = 9*Ctot).
    pieces = [xcat[dy:dy + th, dx:dx + wid, :].reshape(m, ctot)
              for dy in range(3) for dx in range(3)]
    patches = jnp.concatenate(pieces, axis=-1)                    # (m, 9*ctot)

    acc = jnp.dot(patches, w_ref[...], preferred_element_type=jnp.float32)
    y = jnp.maximum(acc * scale_ref[...] + shift_ref[...], 0.0)
    o_ref[0] = y.reshape(th, wid, cout).astype(o_ref.dtype)


# ---------------------------------------------------------------------------
# Wrappers
# ---------------------------------------------------------------------------
_VMEM_LIMIT = 32 * 1024 * 1024  # fits v5e/v6e/v7x scoped budgets


def deconv2x2(x_nhwc, wt, bias):
    """ConvTranspose2d(Cin, Cout, kernel_size=2, stride=2). wt: (Cin, Cout, 2, 2)."""
    B, H, W, Cin = x_nhwc.shape
    Cout = int(wt.shape[1])
    th = _row_tile(H, cap=64, floor=4)
    nt = H // th

    wk = jnp.transpose(wt, (2, 0, 3, 1))           # (ky, Cin, kx, Cout)
    w0 = wk[0].reshape(Cin, 2 * Cout)
    w1 = wk[1].reshape(Cin, 2 * Cout)
    b2 = jnp.tile(bias, (2,)).reshape(1, 2 * Cout)

    flops = 2 * B * H * W * Cin * 4 * Cout
    bytes_acc = 4 * (B * H * W * Cin + 2 * Cin * 2 * Cout + B * H * W * 4 * Cout)

    out = pl.pallas_call(
        _deconv2x2_kernel,
        out_shape=jax.ShapeDtypeStruct((B, H, 2, W, 2 * Cout), x_nhwc.dtype),
        grid_spec=pltpu.PrefetchScalarGridSpec(
            num_scalar_prefetch=0,
            grid=(B, nt),
            in_specs=[
                pl.BlockSpec((1, th, W, Cin), lambda b, i: (b, i, 0, 0)),
                pl.BlockSpec((Cin, 2 * Cout), lambda b, i: (0, 0)),
                pl.BlockSpec((Cin, 2 * Cout), lambda b, i: (0, 0)),
                pl.BlockSpec((1, 2 * Cout), lambda b, i: (0, 0)),
            ],
            out_specs=pl.BlockSpec((1, th, 2, W, 2 * Cout),
                                   lambda b, i: (b, i, 0, 0, 0)),
        ),
        compiler_params=pltpu.CompilerParams(
            dimension_semantics=("parallel", "parallel"),
            vmem_limit_bytes=_VMEM_LIMIT),
        cost_estimate=pl.CostEstimate(flops=flops, transcendentals=0,
                                      bytes_accessed=bytes_acc),
    )(x_nhwc, w0, w1, b2)
    # (B, H, 2, W, 2*Cout) row-major is bit-identical to (B, 2H, 2W, Cout): free reshape.
    return out.reshape(B, 2 * H, 2 * W, Cout)


def conv3x3_bn_relu(sources, w_oihw, gamma, beta, mean, var, eps=1e-5):
    """Conv2d(3x3, pad=1, bias=False) over the channel-concat of `sources`,
    fused with eval-mode BatchNorm2d + ReLU. The concat is fused into the kernel."""
    B, H, W = sources[0].shape[:3]
    Cs = [int(s.shape[-1]) for s in sources]
    Ctot = sum(Cs)
    Cout = int(w_oihw.shape[0])
    assert int(w_oihw.shape[1]) == Ctot

    th = _row_tile(H, cap=64, floor=8)
    nt = H // th
    Wp = W + 2

    # OIHW -> (ky, kx, cin, cout) -> (9*Ctot, Cout); rows ordered (ky, kx, cin).
    w = jnp.transpose(w_oihw, (2, 3, 1, 0)).reshape(9 * Ctot, Cout)
    inv = gamma / jnp.sqrt(var + eps)
    scale = inv.reshape(1, Cout)
    shift = (beta - mean * inv).reshape(1, Cout)

    # Single zero-pad (H and W by 1) per source; row halos are read back through
    # extra 1-row BlockSpecs so every block stays rectangular and in-bounds.
    padded = [jnp.pad(s, ((0, 0), (1, 1), (1, 1), (0, 0))) for s in sources]

    in_specs, operands = [], []
    for p, C in zip(padded, Cs):
        in_specs += [
            pl.BlockSpec((1, th, Wp, C), lambda b, i: (b, i, 0, 0)),
            pl.BlockSpec((1, 1, Wp, C), lambda b, i: (b, i * th + th, 0, 0)),
            pl.BlockSpec((1, 1, Wp, C), lambda b, i: (b, i * th + th + 1, 0, 0)),
        ]
        operands += [p, p, p]
    in_specs += [
        pl.BlockSpec((9 * Ctot, Cout), lambda b, i: (0, 0)),
        pl.BlockSpec((1, Cout), lambda b, i: (0, 0)),
        pl.BlockSpec((1, Cout), lambda b, i: (0, 0)),
    ]
    operands += [w, scale, shift]

    flops = 2 * B * H * W * 9 * Ctot * Cout
    bytes_acc = 4 * (B * (H + 2) * Wp * Ctot + 9 * Ctot * Cout + B * H * W * Cout)

    return pl.pallas_call(
        functools.partial(_conv3x3_bn_relu_kernel, len(sources)),
        out_shape=jax.ShapeDtypeStruct((B, H, W, Cout), sources[0].dtype),
        grid_spec=pltpu.PrefetchScalarGridSpec(
            num_scalar_prefetch=0,
            grid=(B, nt),
            in_specs=in_specs,
            out_specs=pl.BlockSpec((1, th, W, Cout), lambda b, i: (b, i, 0, 0)),
        ),
        compiler_params=pltpu.CompilerParams(
            dimension_semantics=("parallel", "parallel"),
            vmem_limit_bytes=_VMEM_LIMIT),
        cost_estimate=pl.CostEstimate(flops=flops, transcendentals=0,
                                      bytes_accessed=bytes_acc),
    )(*operands)


@jax.jit
def up_forward(params, x1_nchw, x2_nchw):
    """Up.forward(x1, x2) -- inputs/outputs in NCHW like PyTorch."""
    x1 = jnp.transpose(x1_nchw, (0, 2, 3, 1))
    x2 = jnp.transpose(x2_nchw, (0, 2, 3, 1))

    # self.up = ConvTranspose2d(in_channels, skip_channels, 2, stride=2)
    x1u = deconv2x2(x1, params["up_w"], params["up_b"])

    # F.pad to match skip spatial size (static; no-op & elided when diffs are 0)
    diffY = x2.shape[1] - x1u.shape[1]
    diffX = x2.shape[2] - x1u.shape[2]
    if diffY or diffX:
        x1u = jnp.pad(x1u, ((0, 0),
                            (diffY // 2, diffY - diffY // 2),
                            (diffX // 2, diffX - diffX // 2),
                            (0, 0)))

    # torch.cat([x2, x1], dim=1) is fused into the first conv kernel.
    h = conv3x3_bn_relu([x2, x1u], params["w1"], params["g1"], params["b1"],
                        params["m1"], params["v1"])
    y = conv3x3_bn_relu([h], params["w2"], params["g2"], params["b2"],
                        params["m2"], params["v2"])
    return jnp.transpose(y, (0, 3, 1, 2))


# ---------------------------------------------------------------------------
# Pure-JAX reference (for validation)
# ---------------------------------------------------------------------------
def _ref_up(params, x1_nchw, x2_nchw, eps=1e-5):
    x1 = jnp.transpose(x1_nchw, (0, 2, 3, 1))
    x2 = jnp.transpose(x2_nchw, (0, 2, 3, 1))
    t = jnp.einsum("bhwc,cdxy->bhxwyd", x1, params["up_w"])
    B, H, _, W, _, Cout = t.shape
    x1u = t.reshape(B, 2 * H, 2 * W, Cout) + params["up_b"]
    diffY = x2.shape[1] - x1u.shape[1]
    diffX = x2.shape[2] - x1u.shape[2]
    x1u = jnp.pad(x1u, ((0, 0),
                        (diffY // 2, diffY - diffY // 2),
                        (diffX // 2, diffX - diffX // 2),
                        (0, 0)))

    def convbn(x, w, g, b, m, v):
        wh = jnp.transpose(w, (2, 3, 1, 0))  # OIHW -> HWIO
        y = lax.conv_general_dilated(
            x, wh, (1, 1), "SAME",
            dimension_numbers=("NHWC", "HWIO", "NHWC"))
        y = (y - m) / jnp.sqrt(v + eps) * g + b
        return jnp.maximum(y, 0.0)

    x = jnp.concatenate([x2, x1u], axis=-1)
    h = convbn(x, params["w1"], params["g1"], params["b1"],
               params["m1"], params["v1"])
    y = convbn(h, params["w2"], params["g2"], params["b2"],
               params["m2"], params["v2"])
    return jnp.transpose(y, (0, 3, 1, 2))


# ---------------------------------------------------------------------------
# Main
# ---------------------------------------------------------------------------
if __name__ == "__main__":
    in_channels, skip_channels, out_channels = 4, 8, 8
    mid_channels = out_channels
    cat_channels = skip_channels + skip_channels  # up_channels + skip_channels
    B, H1, W1 = 2, 8, 8
    H2, W2 = 2 * H1, 2 * W1

    key = jax.random.PRNGKey(0)
    ks = jax.random.split(key, 14)

    params = {
        # ConvTranspose2d(in_channels, skip_channels, k=2, s=2)
        "up_w": 0.1 * jax.random.normal(ks[0], (in_channels, skip_channels, 2, 2), jnp.float32),
        "up_b": 0.1 * jax.random.normal(ks[1], (skip_channels,), jnp.float32),
        # DoubleConv conv1: Conv2d(cat_channels, mid_channels, 3, pad=1, bias=False)
        "w1": 0.1 * jax.random.normal(ks[2], (mid_channels, cat_channels, 3, 3), jnp.float32),
        "g1": 1.0 + 0.1 * jax.random.normal(ks[3], (mid_channels,), jnp.float32),
        "b1": 0.1 * jax.random.normal(ks[4], (mid_channels,), jnp.float32),
        "m1": 0.1 * jax.random.normal(ks[5], (mid_channels,), jnp.float32),
        "v1": jax.random.uniform(ks[6], (mid_channels,), jnp.float32, 0.5, 1.5),
        # DoubleConv conv2: Conv2d(mid_channels, out_channels, 3, pad=1, bias=False)
        "w2": 0.1 * jax.random.normal(ks[7], (out_channels, mid_channels, 3, 3), jnp.float32),
        "g2": 1.0 + 0.1 * jax.random.normal(ks[8], (out_channels,), jnp.float32),
        "b2": 0.1 * jax.random.normal(ks[9], (out_channels,), jnp.float32),
        "m2": 0.1 * jax.random.normal(ks[10], (out_channels,), jnp.float32),
        "v2": jax.random.uniform(ks[11], (out_channels,), jnp.float32, 0.5, 1.5),
    }

    x1 = jax.random.normal(ks[12], (B, in_channels, H1, W1), jnp.float32)    # NCHW
    x2 = jax.random.normal(ks[13], (B, skip_channels, H2, W2), jnp.float32)  # NCHW

    out = up_forward(params, x1, x2)
    jax.block_until_ready(out)

    ref = _ref_up(params, x1, x2)
    assert out.shape == (B, out_channels, H2, W2), out.shape
    assert jnp.allclose(out, ref, rtol=1e-4, atol=1e-4), float(jnp.max(jnp.abs(out - ref)))

    print("KERNEL_OK")
</pallas_src>

<mosaic_0001>
module attributes {stable_mosaic.version = 11 : i64} {
  func.func @_deconv2x2_kernel(%arg0: i32, %arg1: i32, %arg2: memref<1x4x8x4xf32, #tpu.memory_space<vmem>>, %arg3: memref<4x16xf32, #tpu.memory_space<vmem>>, %arg4: memref<4x16xf32, #tpu.memory_space<vmem>>, %arg5: memref<1x16xf32, #tpu.memory_space<vmem>>, %arg6: memref<1x4x2x8x16xf32, #tpu.memory_space<vmem>>) attributes {dimension_semantics = [#tpu.dimension_semantics<parallel>, #tpu.dimension_semantics<parallel>], iteration_bounds = array<i64: 2, 2>, scalar_prefetch = 0 : i64, scratch_operands = 0 : i64, tpu.core_type = #tpu.core_type<tc>, window_params = [{transform_indices = @transform_0, window_bounds = array<i64: 1, 4, 8, 4>}, {pipeline_mode = #tpu.pipeline_mode<synchronous>, transform_indices = @transform_1, window_bounds = array<i64: 4, 16>}, {pipeline_mode = #tpu.pipeline_mode<synchronous>, transform_indices = @transform_2, window_bounds = array<i64: 4, 16>}, {pipeline_mode = #tpu.pipeline_mode<synchronous>, transform_indices = @transform_3, window_bounds = array<i64: 1, 16>}, {transform_indices = @transform_4, window_bounds = array<i64: 1, 4, 2, 8, 16>}]} {
    %c0 = arith.constant 0 : index
    %c0_0 = arith.constant 0 : index
    %c0_1 = arith.constant 0 : index
    %c0_2 = arith.constant 0 : index
    %0 = vector.load %arg2[%c0, %c0_0, %c0_1, %c0_2] : memref<1x4x8x4xf32, #tpu.memory_space<vmem>>, vector<1x4x8x4xf32>
    %1 = vector.shape_cast %0 : vector<1x4x8x4xf32> to vector<4x8x4xf32>
    %2 = vector.shape_cast %1 : vector<4x8x4xf32> to vector<32x4xf32>
    %c0_3 = arith.constant 0 : index
    %c0_4 = arith.constant 0 : index
    %3 = vector.load %arg3[%c0_3, %c0_4] : memref<4x16xf32, #tpu.memory_space<vmem>>, vector<4x16xf32>
    %cst = arith.constant dense<0.000000e+00> : vector<32x16xf32>
    %4 = tpu.matmul %2, %3, %cst {dimension_numbers = #tpu.dot_dimension_numbers<[1], [0], [0], [1], [0, 0, 1, 1], [], []>} : vector<32x4xf32>, vector<4x16xf32>, vector<32x16xf32> -> vector<32x16xf32>
    %c0_5 = arith.constant 0 : index
    %c0_6 = arith.constant 0 : index
    %5 = vector.load %arg5[%c0_5, %c0_6] : memref<1x16xf32, #tpu.memory_space<vmem>>, vector<1x16xf32>
    %6 = vector.broadcast %5 : vector<1x16xf32> to vector<32x16xf32>
    %7 = arith.addf %4, %6 : vector<32x16xf32>
    %c0_7 = arith.constant 0 : index
    %c0_8 = arith.constant 0 : index
    %8 = vector.load %arg4[%c0_7, %c0_8] : memref<4x16xf32, #tpu.memory_space<vmem>>, vector<4x16xf32>
    %cst_9 = arith.constant dense<0.000000e+00> : vector<32x16xf32>
    %9 = tpu.matmul %2, %8, %cst_9 {dimension_numbers = #tpu.dot_dimension_numbers<[1], [0], [0], [1], [0, 0, 1, 1], [], []>} : vector<32x4xf32>, vector<4x16xf32>, vector<32x16xf32> -> vector<32x16xf32>
    %c0_10 = arith.constant 0 : index
    %c0_11 = arith.constant 0 : index
    %10 = vector.load %arg5[%c0_10, %c0_11] : memref<1x16xf32, #tpu.memory_space<vmem>>, vector<1x16xf32>
    %11 = vector.broadcast %10 : vector<1x16xf32> to vector<32x16xf32>
    %12 = arith.addf %9, %11 : vector<32x16xf32>
    %13 = vector.shape_cast %7 : vector<32x16xf32> to vector<4x8x16xf32>
    %c0_12 = arith.constant 0 : index
    %c0_13 = arith.constant 0 : index
    %c0_14 = arith.constant 0 : index
    %c0_15 = arith.constant 0 : index
    %c0_16 = arith.constant 0 : index
    %14 = vector.load %arg6[%c0_12, %c0_13, %c0_14, %c0_15, %c0_16] : memref<1x4x2x8x16xf32, #tpu.memory_space<vmem>>, vector<1x4x1x8x16xf32>
    %15 = vector.shape_cast %14 : vector<1x4x1x8x16xf32> to vector<4x8x16xf32>
    %16 = vector.shape_cast %13 : vector<4x8x16xf32> to vector<1x4x1x8x16xf32>
    tpu.vector_store %arg6[%c0_12, %c0_13, %c0_14, %c0_15, %c0_16], %16 {strides = array<i32>} : memref<1x4x2x8x16xf32, #tpu.memory_space<vmem>>, vector<1x4x1x8x16xf32>,
    %17 = vector.shape_cast %12 : vector<32x16xf32> to vector<4x8x16xf32>
    %c0_17 = arith.constant 0 : index
    %c0_18 = arith.constant 0 : index
    %c1 = arith.constant 1 : index
    %c0_19 = arith.constant 0 : index
    %c0_20 = arith.constant 0 : index
    %18 = vector.load %arg6[%c0_17, %c0_18, %c1, %c0_19, %c0_20] : memref<1x4x2x8x16xf32, #tpu.memory_space<vmem>>, vector<1x4x1x8x16xf32>
    %19 = vector.shape_cast %18 : vector<1x4x1x8x16xf32> to vector<4x8x16xf32>
    %20 = vector.shape_cast %17 : vector<4x8x16xf32> to vector<1x4x1x8x16xf32>
    tpu.vector_store %arg6[%c0_17, %c0_18, %c1, %c0_19, %c0_20], %20 {strides = array<i32>} : memref<1x4x2x8x16xf32, #tpu.memory_space<vmem>>, vector<1x4x1x8x16xf32>,
    return
  }
  func.func @transform_0(%arg0: i32, %arg1: i32) -> (i32, i32, i32, i32) {
    %c0_i32 = arith.constant 0 : i32
    %c0_i32_0 = arith.constant 0 : i32
    %c0_i32_1 = arith.constant 0 : i32
    return %arg0, %arg1, %c0_i32, %c0_i32_0 : i32, i32, i32, i32
  }
  func.func @transform_1(%arg0: i32, %arg1: i32) -> (i32, i32) {
    %c0_i32 = arith.constant 0 : i32
    %c0_i32_0 = arith.constant 0 : i32
    %c0_i32_1 = arith.constant 0 : i32
    return %c0_i32, %c0_i32_0 : i32, i32
  }
  func.func @transform_2(%arg0: i32, %arg1: i32) -> (i32, i32) {
    %c0_i32 = arith.constant 0 : i32
    %c0_i32_0 = arith.constant 0 : i32
    %c0_i32_1 = arith.constant 0 : i32
    return %c0_i32, %c0_i32_0 : i32, i32
  }
  func.func @transform_3(%arg0: i32, %arg1: i32) -> (i32, i32) {
    %c0_i32 = arith.constant 0 : i32
    %c0_i32_0 = arith.constant 0 : i32
    %c0_i32_1 = arith.constant 0 : i32
    return %c0_i32, %c0_i32_0 : i32, i32
  }
  func.func @transform_4(%arg0: i32, %arg1: i32) -> (i32, i32, i32, i32, i32) {
    %c0_i32 = arith.constant 0 : i32
    %c0_i32_0 = arith.constant 0 : i32
    %c0_i32_1 = arith.constant 0 : i32
    %c0_i32_2 = arith.constant 0 : i32
    return %arg0, %arg1, %c0_i32, %c0_i32_0, %c0_i32_1 : i32, i32, i32, i32, i32
  }
}

module attributes {stable_mosaic.version = 11 : i64} {
  func.func @_conv3x3_bn_relu_kernel(%arg0: i32, %arg1: i32, %arg2: memref<1x8x18x8xf32, #tpu.memory_space<vmem>>, %arg3: memref<1x1x18x8xf32, #tpu.memory_space<vmem>>, %arg4: memref<1x1x18x8xf32, #tpu.memory_space<vmem>>, %arg5: memref<1x8x18x8xf32, #tpu.memory_space<vmem>>, %arg6: memref<1x1x18x8xf32, #tpu.memory_space<vmem>>, %arg7: memref<1x1x18x8xf32, #tpu.memory_space<vmem>>, %arg8: memref<144x8xf32, #tpu.memory_space<vmem>>, %arg9: memref<1x8xf32, #tpu.memory_space<vmem>>, %arg10: memref<1x8xf32, #tpu.memory_space<vmem>>, %arg11: memref<1x8x16x8xf32, #tpu.memory_space<vmem>>) attributes {dimension_semantics = [#tpu.dimension_semantics<parallel>, #tpu.dimension_semantics<parallel>], iteration_bounds = array<i64: 2, 2>, scalar_prefetch = 0 : i64, scratch_operands = 0 : i64, tpu.core_type = #tpu.core_type<tc>, window_params = [{transform_indices = @transform_0, window_bounds = array<i64: 1, 8, 18, 8>}, {transform_indices = @transform_1, window_bounds = array<i64: 1, 1, 18, 8>}, {transform_indices = @transform_2, window_bounds = array<i64: 1, 1, 18, 8>}, {transform_indices = @transform_3, window_bounds = array<i64: 1, 8, 18, 8>}, {transform_indices = @transform_4, window_bounds = array<i64: 1, 1, 18, 8>}, {transform_indices = @transform_5, window_bounds = array<i64: 1, 1, 18, 8>}, {pipeline_mode = #tpu.pipeline_mode<synchronous>, transform_indices = @transform_6, window_bounds = array<i64: 144, 8>}, {pipeline_mode = #tpu.pipeline_mode<synchronous>, transform_indices = @transform_7, window_bounds = array<i64: 1, 8>}, {pipeline_mode = #tpu.pipeline_mode<synchronous>, transform_indices = @transform_8, window_bounds = array<i64: 1, 8>}, {transform_indices = @transform_9, window_bounds = array<i64: 1, 8, 16, 8>}]} {
    %c0 = arith.constant 0 : index
    %c0_0 = arith.constant 0 : index
    %c0_1 = arith.constant 0 : index
    %c0_2 = arith.constant 0 : index
    %0 = vector.load %arg2[%c0, %c0_0, %c0_1, %c0_2] : memref<1x8x18x8xf32, #tpu.memory_space<vmem>>, vector<1x8x18x8xf32>
    %1 = vector.shape_cast %0 : vector<1x8x18x8xf32> to vector<8x18x8xf32>
    %c0_3 = arith.constant 0 : index
    %c0_4 = arith.constant 0 : index
    %c0_5 = arith.constant 0 : index
    %c0_6 = arith.constant 0 : index
    %2 = vector.load %arg3[%c0_3, %c0_4, %c0_5, %c0_6] : memref<1x1x18x8xf32, #tpu.memory_space<vmem>>, vector<1x1x18x8xf32>
    %3 = vector.shape_cast %2 : vector<1x1x18x8xf32> to vector<1x18x8xf32>
    %c0_7 = arith.constant 0 : index
    %c0_8 = arith.constant 0 : index
    %c0_9 = arith.constant 0 : index
    %c0_10 = arith.constant 0 : index
    %4 = vector.load %arg4[%c0_7, %c0_8, %c0_9, %c0_10] : memref<1x1x18x8xf32, #tpu.memory_space<vmem>>, vector<1x1x18x8xf32>
    %5 = vector.shape_cast %4 : vector<1x1x18x8xf32> to vector<1x18x8xf32>
    %6 = tpu.concatenate %1, %3, %5 in 0 : vector<8x18x8xf32>, vector<1x18x8xf32>, vector<1x18x8xf32> -> vector<10x18x8xf32>
    %c0_11 = arith.constant 0 : index
    %c0_12 = arith.constant 0 : index
    %c0_13 = arith.constant 0 : index
    %c0_14 = arith.constant 0 : index
    %7 = vector.load %arg5[%c0_11, %c0_12, %c0_13, %c0_14] : memref<1x8x18x8xf32, #tpu.memory_space<vmem>>, vector<1x8x18x8xf32>
    %8 = vector.shape_cast %7 : vector<1x8x18x8xf32> to vector<8x18x8xf32>
    %c0_15 = arith.constant 0 : index
    %c0_16 = arith.constant 0 : index
    %c0_17 = arith.constant 0 : index
    %c0_18 = arith.constant 0 : index
    %9 = vector.load %arg6[%c0_15, %c0_16, %c0_17, %c0_18] : memref<1x1x18x8xf32, #tpu.memory_space<vmem>>, vector<1x1x18x8xf32>
    %10 = vector.shape_cast %9 : vector<1x1x18x8xf32> to vector<1x18x8xf32>
    %c0_19 = arith.constant 0 : index
    %c0_20 = arith.constant 0 : index
    %c0_21 = arith.constant 0 : index
    %c0_22 = arith.constant 0 : index
    %11 = vector.load %arg7[%c0_19, %c0_20, %c0_21, %c0_22] : memref<1x1x18x8xf32, #tpu.memory_space<vmem>>, vector<1x1x18x8xf32>
    %12 = vector.shape_cast %11 : vector<1x1x18x8xf32> to vector<1x18x8xf32>
    %13 = tpu.concatenate %8, %10, %12 in 0 : vector<8x18x8xf32>, vector<1x18x8xf32>, vector<1x18x8xf32> -> vector<10x18x8xf32>
    %14 = tpu.concatenate %6, %13 in 2 : vector<10x18x8xf32>, vector<10x18x8xf32> -> vector<10x18x16xf32>
    %15 = vector.extract_strided_slice %14 {offsets = [0, 0, 0], sizes = [8, 16, 16], strides = [1, 1, 1]} : vector<10x18x16xf32> to vector<8x16x16xf32>
    %16 = vector.shape_cast %15 : vector<8x16x16xf32> to vector<128x16xf32>
    %17 = vector.extract_strided_slice %14 {offsets = [0, 1, 0], sizes = [8, 16, 16], strides = [1, 1, 1]} : vector<10x18x16xf32> to vector<8x16x16xf32>
    %18 = vector.shape_cast %17 : vector<8x16x16xf32> to vector<128x16xf32>
    %19 = vector.extract_strided_slice %14 {offsets = [0, 2, 0], sizes = [8, 16, 16], strides = [1, 1, 1]} : vector<10x18x16xf32> to vector<8x16x16xf32>
    %20 = vector.shape_cast %19 : vector<8x16x16xf32> to vector<128x16xf32>
    %21 = vector.extract_strided_slice %14 {offsets = [1, 0, 0], sizes = [8, 16, 16], strides = [1, 1, 1]} : vector<10x18x16xf32> to vector<8x16x16xf32>
    %22 = vector.shape_cast %21 : vector<8x16x16xf32> to vector<128x16xf32>
    %23 = vector.extract_strided_slice %14 {offsets = [1, 1, 0], sizes = [8, 16, 16], strides = [1, 1, 1]} : vector<10x18x16xf32> to vector<8x16x16xf32>
    %24 = vector.shape_cast %23 : vector<8x16x16xf32> to vector<128x16xf32>
    %25 = vector.extract_strided_slice %14 {offsets = [1, 2, 0], sizes = [8, 16, 16], strides = [1, 1, 1]} : vector<10x18x16xf32> to vector<8x16x16xf32>
    %26 = vector.shape_cast %25 : vector<8x16x16xf32> to vector<128x16xf32>
    %27 = vector.extract_strided_slice %14 {offsets = [2, 0, 0], sizes = [8, 16, 16], strides = [1, 1, 1]} : vector<10x18x16xf32> to vector<8x16x16xf32>
    %28 = vector.shape_cast %27 : vector<8x16x16xf32> to vector<128x16xf32>
    %29 = vector.extract_strided_slice %14 {offsets = [2, 1, 0], sizes = [8, 16, 16], strides = [1, 1, 1]} : vector<10x18x16xf32> to vector<8x16x16xf32>
    %30 = vector.shape_cast %29 : vector<8x16x16xf32> to vector<128x16xf32>
    %31 = vector.extract_strided_slice %14 {offsets = [2, 2, 0], sizes = [8, 16, 16], strides = [1, 1, 1]} : vector<10x18x16xf32> to vector<8x16x16xf32>
    %32 = vector.shape_cast %31 : vector<8x16x16xf32> to vector<128x16xf32>
    %33 = tpu.concatenate %16, %18, %20, %22, %24, %26, %28, %30, %32 in 1 : vector<128x16xf32>, vector<128x16xf32>, vector<128x16xf32>, vector<128x16xf32>, vector<128x16xf32>, vector<128x16xf32>, vector<128x16xf32>, vector<128x16xf32>, vector<128x16xf32> -> vector<128x144xf32>
    %c0_23 = arith.constant 0 : index
    %c0_24 = arith.constant 0 : index
    %34 = vector.load %arg8[%c0_23, %c0_24] : memref<144x8xf32, #tpu.memory_space<vmem>>, vector<144x8xf32>
    %cst = arith.constant dense<0.000000e+00> : vector<128x8xf32>
    %35 = tpu.matmul %33, %34, %cst {dimension_numbers = #tpu.dot_dimension_numbers<[1], [0], [0], [1], [0, 0, 1, 1], [], []>} : vector<128x144xf32>, vector<144x8xf32>, vector<128x8xf32> -> vector<128x8xf32>
    %c0_25 = arith.constant 0 : index
    %c0_26 = arith.constant 0 : index
    %36 = vector.load %arg9[%c0_25, %c0_26] : memref<1x8xf32, #tpu.memory_space<vmem>>, vector<1x8xf32>
    %37 = vector.broadcast %36 : vector<1x8xf32> to vector<128x8xf32>
    %38 = arith.mulf %35, %37 : vector<128x8xf32>
    %c0_27 = arith.constant 0 : index
    %c0_28 = arith.constant 0 : index
    %39 = vector.load %arg10[%c0_27, %c0_28] : memref<1x8xf32, #tpu.memory_space<vmem>>, vector<1x8xf32>
    %40 = vector.broadcast %39 : vector<1x8xf32> to vector<128x8xf32>
    %41 = arith.addf %38, %40 : vector<128x8xf32>
    %cst_29 = arith.constant 0.000000e+00 : f32
    %42 = vector.broadcast %cst_29 : f32 to vector<128x8xf32>
    %43 = arith.maximumf %41, %42 : vector<128x8xf32>
    %44 = vector.shape_cast %43 : vector<128x8xf32> to vector<8x16x8xf32>
    %c0_30 = arith.constant 0 : index
    %c0_31 = arith.constant 0 : index
    %c0_32 = arith.constant 0 : index
    %c0_33 = arith.constant 0 : index
    %45 = vector.load %arg11[%c0_30, %c0_31, %c0_32, %c0_33] : memref<1x8x16x8xf32, #tpu.memory_space<vmem>>, vector<1x8x16x8xf32>
    %46 = vector.shape_cast %45 : vector<1x8x16x8xf32> to vector<8x16x8xf32>
    %47 = vector.shape_cast %44 : vector<8x16x8xf32> to vector<1x8x16x8xf32>
    tpu.vector_store %arg11[%c0_30, %c0_31, %c0_32, %c0_33], %47 {strides = array<i32>} : memref<1x8x16x8xf32, #tpu.memory_space<vmem>>, vector<1x8x16x8xf32>,
    return
  }
  func.func @transform_0(%arg0: i32, %arg1: i32) -> (i32, i32, i32, i32) {
    %c0_i32 = arith.constant 0 : i32
    %c0_i32_0 = arith.constant 0 : i32
    %c0_i32_1 = arith.constant 0 : i32
    return %arg0, %arg1, %c0_i32, %c0_i32_0 : i32, i32, i32, i32
  }
  func.func @transform_1(%arg0: i32, %arg1: i32) -> (i32, i32, i32, i32) {
    %c8_i32 = arith.constant 8 : i32
    %0 = arith.muli %arg1, %c8_i32 : i32
    %c8_i32_0 = arith.constant 8 : i32
    %1 = arith.addi %0, %c8_i32_0 : i32
    %c0_i32 = arith.constant 0 : i32
    %c0_i32_1 = arith.constant 0 : i32
    %c0_i32_2 = arith.constant 0 : i32
    return %arg0, %1, %c0_i32, %c0_i32_1 : i32, i32, i32, i32
  }
  func.func @transform_2(%arg0: i32, %arg1: i32) -> (i32, i32, i32, i32) {
    %c8_i32 = arith.constant 8 : i32
    %0 = arith.muli %arg1, %c8_i32 : i32
    %c8_i32_0 = arith.constant 8 : i32
    %1 = arith.addi %0, %c8_i32_0 : i32
    %c1_i32 = arith.constant 1 : i32
    %2 = arith.addi %1, %c1_i32 : i32
    %c0_i32 = arith.constant 0 : i32
    %c0_i32_1 = arith.constant 0 : i32
    %c0_i32_2 = arith.constant 0 : i32
    return %arg0, %2, %c0_i32, %c0_i32_1 : i32, i32, i32, i32
  }
  func.func @transform_3(%arg0: i32, %arg1: i32) -> (i32, i32, i32, i32) {
    %c0_i32 = arith.constant 0 : i32
    %c0_i32_0 = arith.constant 0 : i32
    %c0_i32_1 = arith.constant 0 : i32
    return %arg0, %arg1, %c0_i32, %c0_i32_0 : i32, i32, i32, i32
  }
  func.func @transform_4(%arg0: i32, %arg1: i32) -> (i32, i32, i32, i32) {
    %c8_i32 = arith.constant 8 : i32
    %0 = arith.muli %arg1, %c8_i32 : i32
    %c8_i32_0 = arith.constant 8 : i32
    %1 = arith.addi %0, %c8_i32_0 : i32
    %c0_i32 = arith.constant 0 : i32
    %c0_i32_1 = arith.constant 0 : i32
    %c0_i32_2 = arith.constant 0 : i32
    return %arg0, %1, %c0_i32, %c0_i32_1 : i32, i32, i32, i32
  }
  func.func @transform_5(%arg0: i32, %arg1: i32) -> (i32, i32, i32, i32) {
    %c8_i32 = arith.constant 8 : i32
    %0 = arith.muli %arg1, %c8_i32 : i32
    %c8_i32_0 = arith.constant 8 : i32
    %1 = arith.addi %0, %c8_i32_0 : i32
    %c1_i32 = arith.constant 1 : i32
    %2 = arith.addi %1, %c1_i32 : i32
    %c0_i32 = arith.constant 0 : i32
    %c0_i32_1 = arith.constant 0 : i32
    %c0_i32_2 = arith.constant 0 : i32
    return %arg0, %2, %c0_i32, %c0_i32_1 : i32, i32, i32, i32
  }
  func.func @transform_6(%arg0: i32, %arg1: i32) -> (i32, i32) {
    %c0_i32 = arith.constant 0 : i32
    %c0_i32_0 = arith.constant 0 : i32
    %c0_i32_1 = arith.constant 0 : i32
    return %c0_i32, %c0_i32_0 : i32, i32
  }
  func.func @transform_7(%arg0: i32, %arg1: i32) -> (i32, i32) {
    %c0_i32 = arith.constant 0 : i32
    %c0_i32_0 = arith.constant 0 : i32
    %c0_i32_1 = arith.constant 0 : i32
    return %c0_i32, %c0_i32_0 : i32, i32
  }
  func.func @transform_8(%arg0: i32, %arg1: i32) -> (i32, i32) {
    %c0_i32 = arith.constant 0 : i32
    %c0_i32_0 = arith.constant 0 : i32
    %c0_i32_1 = arith.constant 0 : i32
    return %c0_i32, %c0_i32_0 : i32, i32
  }
  func.func @transform_9(%arg0: i32, %arg1: i32) -> (i32, i32, i32, i32) {
    %c0_i32 = arith.constant 0 : i32
    %c0_i32_0 = arith.constant 0 : i32
    %c0_i32_1 = arith.constant 0 : i32
    return %arg0, %arg1, %c0_i32, %c0_i32_0 : i32, i32, i32, i32
  }
}

module attributes {stable_mosaic.version = 11 : i64} {
  func.func @_conv3x3_bn_relu_kernel(%arg0: i32, %arg1: i32, %arg2: memref<1x8x18x8xf32, #tpu.memory_space<vmem>>, %arg3: memref<1x1x18x8xf32, #tpu.memory_space<vmem>>, %arg4: memref<1x1x18x8xf32, #tpu.memory_space<vmem>>, %arg5: memref<72x8xf32, #tpu.memory_space<vmem>>, %arg6: memref<1x8xf32, #tpu.memory_space<vmem>>, %arg7: memref<1x8xf32, #tpu.memory_space<vmem>>, %arg8: memref<1x8x16x8xf32, #tpu.memory_space<vmem>>) attributes {dimension_semantics = [#tpu.dimension_semantics<parallel>, #tpu.dimension_semantics<parallel>], iteration_bounds = array<i64: 2, 2>, scalar_prefetch = 0 : i64, scratch_operands = 0 : i64, tpu.core_type = #tpu.core_type<tc>, window_params = [{transform_indices = @transform_0, window_bounds = array<i64: 1, 8, 18, 8>}, {transform_indices = @transform_1, window_bounds = array<i64: 1, 1, 18, 8>}, {transform_indices = @transform_2, window_bounds = array<i64: 1, 1, 18, 8>}, {pipeline_mode = #tpu.pipeline_mode<synchronous>, transform_indices = @transform_3, window_bounds = array<i64: 72, 8>}, {pipeline_mode = #tpu.pipeline_mode<synchronous>, transform_indices = @transform_4, window_bounds = array<i64: 1, 8>}, {pipeline_mode = #tpu.pipeline_mode<synchronous>, transform_indices = @transform_5, window_bounds = array<i64: 1, 8>}, {transform_indices = @transform_6, window_bounds = array<i64: 1, 8, 16, 8>}]} {
    %c0 = arith.constant 0 : index
    %c0_0 = arith.constant 0 : index
    %c0_1 = arith.constant 0 : index
    %c0_2 = arith.constant 0 : index
    %0 = vector.load %arg2[%c0, %c0_0, %c0_1, %c0_2] : memref<1x8x18x8xf32, #tpu.memory_space<vmem>>, vector<1x8x18x8xf32>
    %1 = vector.shape_cast %0 : vector<1x8x18x8xf32> to vector<8x18x8xf32>
    %c0_3 = arith.constant 0 : index
    %c0_4 = arith.constant 0 : index
    %c0_5 = arith.constant 0 : index
    %c0_6 = arith.constant 0 : index
    %2 = vector.load %arg3[%c0_3, %c0_4, %c0_5, %c0_6] : memref<1x1x18x8xf32, #tpu.memory_space<vmem>>, vector<1x1x18x8xf32>
    %3 = vector.shape_cast %2 : vector<1x1x18x8xf32> to vector<1x18x8xf32>
    %c0_7 = arith.constant 0 : index
    %c0_8 = arith.constant 0 : index
    %c0_9 = arith.constant 0 : index
    %c0_10 = arith.constant 0 : index
    %4 = vector.load %arg4[%c0_7, %c0_8, %c0_9, %c0_10] : memref<1x1x18x8xf32, #tpu.memory_space<vmem>>, vector<1x1x18x8xf32>
    %5 = vector.shape_cast %4 : vector<1x1x18x8xf32> to vector<1x18x8xf32>
    %6 = tpu.concatenate %1, %3, %5 in 0 : vector<8x18x8xf32>, vector<1x18x8xf32>, vector<1x18x8xf32> -> vector<10x18x8xf32>
    %7 = vector.extract_strided_slice %6 {offsets = [0, 0, 0], sizes = [8, 16, 8], strides = [1, 1, 1]} : vector<10x18x8xf32> to vector<8x16x8xf32>
    %8 = vector.shape_cast %7 : vector<8x16x8xf32> to vector<128x8xf32>
    %9 = vector.extract_strided_slice %6 {offsets = [0, 1, 0], sizes = [8, 16, 8], strides = [1, 1, 1]} : vector<10x18x8xf32> to vector<8x16x8xf32>
    %10 = vector.shape_cast %9 : vector<8x16x8xf32> to vector<128x8xf32>
    %11 = vector.extract_strided_slice %6 {offsets = [0, 2, 0], sizes = [8, 16, 8], strides = [1, 1, 1]} : vector<10x18x8xf32> to vector<8x16x8xf32>
    %12 = vector.shape_cast %11 : vector<8x16x8xf32> to vector<128x8xf32>
    %13 = vector.extract_strided_slice %6 {offsets = [1, 0, 0], sizes = [8, 16, 8], strides = [1, 1, 1]} : vector<10x18x8xf32> to vector<8x16x8xf32>
    %14 = vector.shape_cast %13 : vector<8x16x8xf32> to vector<128x8xf32>
    %15 = vector.extract_strided_slice %6 {offsets = [1, 1, 0], sizes = [8, 16, 8], strides = [1, 1, 1]} : vector<10x18x8xf32> to vector<8x16x8xf32>
    %16 = vector.shape_cast %15 : vector<8x16x8xf32> to vector<128x8xf32>
    %17 = vector.extract_strided_slice %6 {offsets = [1, 2, 0], sizes = [8, 16, 8], strides = [1, 1, 1]} : vector<10x18x8xf32> to vector<8x16x8xf32>
    %18 = vector.shape_cast %17 : vector<8x16x8xf32> to vector<128x8xf32>
    %19 = vector.extract_strided_slice %6 {offsets = [2, 0, 0], sizes = [8, 16, 8], strides = [1, 1, 1]} : vector<10x18x8xf32> to vector<8x16x8xf32>
    %20 = vector.shape_cast %19 : vector<8x16x8xf32> to vector<128x8xf32>
    %21 = vector.extract_strided_slice %6 {offsets = [2, 1, 0], sizes = [8, 16, 8], strides = [1, 1, 1]} : vector<10x18x8xf32> to vector<8x16x8xf32>
    %22 = vector.shape_cast %21 : vector<8x16x8xf32> to vector<128x8xf32>
    %23 = vector.extract_strided_slice %6 {offsets = [2, 2, 0], sizes = [8, 16, 8], strides = [1, 1, 1]} : vector<10x18x8xf32> to vector<8x16x8xf32>
    %24 = vector.shape_cast %23 : vector<8x16x8xf32> to vector<128x8xf32>
    %25 = tpu.concatenate %8, %10, %12, %14, %16, %18, %20, %22, %24 in 1 : vector<128x8xf32>, vector<128x8xf32>, vector<128x8xf32>, vector<128x8xf32>, vector<128x8xf32>, vector<128x8xf32>, vector<128x8xf32>, vector<128x8xf32>, vector<128x8xf32> -> vector<128x72xf32>
    %c0_11 = arith.constant 0 : index
    %c0_12 = arith.constant 0 : index
    %26 = vector.load %arg5[%c0_11, %c0_12] : memref<72x8xf32, #tpu.memory_space<vmem>>, vector<72x8xf32>
    %cst = arith.constant dense<0.000000e+00> : vector<128x8xf32>
    %27 = tpu.matmul %25, %26, %cst {dimension_numbers = #tpu.dot_dimension_numbers<[1], [0], [0], [1], [0, 0, 1, 1], [], []>} : vector<128x72xf32>, vector<72x8xf32>, vector<128x8xf32> -> vector<128x8xf32>
    %c0_13 = arith.constant 0 : index
    %c0_14 = arith.constant 0 : index
    %28 = vector.load %arg6[%c0_13, %c0_14] : memref<1x8xf32, #tpu.memory_space<vmem>>, vector<1x8xf32>
    %29 = vector.broadcast %28 : vector<1x8xf32> to vector<128x8xf32>
    %30 = arith.mulf %27, %29 : vector<128x8xf32>
    %c0_15 = arith.constant 0 : index
    %c0_16 = arith.constant 0 : index
    %31 = vector.load %arg7[%c0_15, %c0_16] : memref<1x8xf32, #tpu.memory_space<vmem>>, vector<1x8xf32>
    %32 = vector.broadcast %31 : vector<1x8xf32> to vector<128x8xf32>
    %33 = arith.addf %30, %32 : vector<128x8xf32>
    %cst_17 = arith.constant 0.000000e+00 : f32
    %34 = vector.broadcast %cst_17 : f32 to vector<128x8xf32>
    %35 = arith.maximumf %33, %34 : vector<128x8xf32>
    %36 = vector.shape_cast %35 : vector<128x8xf32> to vector<8x16x8xf32>
    %c0_18 = arith.constant 0 : index
    %c0_19 = arith.constant 0 : index
    %c0_20 = arith.constant 0 : index
    %c0_21 = arith.constant 0 : index
    %37 = vector.load %arg8[%c0_18, %c0_19, %c0_20, %c0_21] : memref<1x8x16x8xf32, #tpu.memory_space<vmem>>, vector<1x8x16x8xf32>
    %38 = vector.shape_cast %37 : vector<1x8x16x8xf32> to vector<8x16x8xf32>
    %39 = vector.shape_cast %36 : vector<8x16x8xf32> to vector<1x8x16x8xf32>
    tpu.vector_store %arg8[%c0_18, %c0_19, %c0_20, %c0_21], %39 {strides = array<i32>} : memref<1x8x16x8xf32, #tpu.memory_space<vmem>>, vector<1x8x16x8xf32>,
    return
  }
  func.func @transform_0(%arg0: i32, %arg1: i32) -> (i32, i32, i32, i32) {
    %c0_i32 = arith.constant 0 : i32
    %c0_i32_0 = arith.constant 0 : i32
    %c0_i32_1 = arith.constant 0 : i32
    return %arg0, %arg1, %c0_i32, %c0_i32_0 : i32, i32, i32, i32
  }
  func.func @transform_1(%arg0: i32, %arg1: i32) -> (i32, i32, i32, i32) {
    %c8_i32 = arith.constant 8 : i32
    %0 = arith.muli %arg1, %c8_i32 : i32
    %c8_i32_0 = arith.constant 8 : i32
    %1 = arith.addi %0, %c8_i32_0 : i32
    %c0_i32 = arith.constant 0 : i32
    %c0_i32_1 = arith.constant 0 : i32
    %c0_i32_2 = arith.constant 0 : i32
    return %arg0, %1, %c0_i32, %c0_i32_1 : i32, i32, i32, i32
  }
  func.func @transform_2(%arg0: i32, %arg1: i32) -> (i32, i32, i32, i32) {
    %c8_i32 = arith.constant 8 : i32
    %0 = arith.muli %arg1, %c8_i32 : i32
    %c8_i32_0 = arith.constant 8 : i32
    %1 = arith.addi %0, %c8_i32_0 : i32
    %c1_i32 = arith.constant 1 : i32
    %2 = arith.addi %1, %c1_i32 : i32
    %c0_i32 = arith.constant 0 : i32
    %c0_i32_1 = arith.constant 0 : i32
    %c0_i32_2 = arith.constant 0 : i32
    return %arg0, %2, %c0_i32, %c0_i32_1 : i32, i32, i32, i32
  }
  func.func @transform_3(%arg0: i32, %arg1: i32) -> (i32, i32) {
    %c0_i32 = arith.constant 0 : i32
    %c0_i32_0 = arith.constant 0 : i32
    %c0_i32_1 = arith.constant 0 : i32
    return %c0_i32, %c0_i32_0 : i32, i32
  }
  func.func @transform_4(%arg0: i32, %arg1: i32) -> (i32, i32) {
    %c0_i32 = arith.constant 0 : i32
    %c0_i32_0 = arith.constant 0 : i32
    %c0_i32_1 = arith.constant 0 : i32
    return %c0_i32, %c0_i32_0 : i32, i32
  }
  func.func @transform_5(%arg0: i32, %arg1: i32) -> (i32, i32) {
    %c0_i32 = arith.constant 0 : i32
    %c0_i32_0 = arith.constant 0 : i32
    %c0_i32_1 = arith.constant 0 : i32
    return %c0_i32, %c0_i32_0 : i32, i32
  }
  func.func @transform_6(%arg0: i32, %arg1: i32) -> (i32, i32, i32, i32) {
    %c0_i32 = arith.constant 0 : i32
    %c0_i32_0 = arith.constant 0 : i32
    %c0_i32_1 = arith.constant 0 : i32
    return %arg0, %arg1, %c0_i32, %c0_i32_0 : i32, i32, i32, i32
  }
}

</mosaic_0001>

<bundles_post_ra>
// kernel: tile.8
= control target key start
LH: loop header
LB: loop body
LE: loop exit
PB: predicated region body
PF: predicated region fallthrough
CT: control target
= control target key end

     0   :  { %s22_s0 = inlined_call_operand.vmem [shape: f32[8], index: 0, kind: input, shape index: {}]   ;;  %s23_s1 = inlined_call_operand.vmem [shape: f32[2,8], index: 1, kind: output, shape index: {}]  }
   0x1   :  { %v4_v0 = vld [vmem:[%s22_s0] ss:$0 sm:$0xff] }
   0x2   :  { %5 = vst [vmem:[%s23_s1] sm:$0x3] %v4_v0 }

// kernel: squeeze.2
= control target key start
LH: loop header
LB: loop body
LE: loop exit
PB: predicated region body
PF: predicated region fallthrough
CT: control target
= control target key end

     0   :  { %vm21_vm0 = vcmask 64512   ;;  %vm27_vm1 = vcmask 130112   ;;  %s67_s0 = inlined_call_operand.vmem [shape: f32[1,4,2,8], index: 0, kind: input, shape index: {}]   ;;  %s68_s1 = inlined_call_operand.vmem [shape: f32[4,16], index: 1, kind: output, shape index: {}]  }
   0x1   :  { %v37_v0 = vld [vmem:[%s67_s0 + $0x6] sm:$0x3]  ;;  %v38_v1 = vld [vmem:[%s67_s0 + $0x4] sm:$0x3]  ;;  %v39_v2 = vld [vmem:[%s67_s0 + $0x2] sm:$0x3] }
   0x2   :  { %8 = vst [vmem:[#allocation1 + $0x18] sm:$0x3] %v37_v0  ;;  %13 = vst [vmem:[#allocation1 + $0x10] sm:$0x3] %v38_v1  ;;  %v18_v3 = vld [vmem:[%s67_s0] sm:$0x3] }
   0x3   :  { %17 = vst [vmem:[#allocation1 + $0x8] sm:$0x3] %v39_v2  ;;  %19 = vst [vmem:[#allocation1] sm:$0x3] %v18_v3  ;;  %s41_s0 = smov 8  }
   0xa   :  { %v24_v4 = vld [vmem:[#allocation1 + $0x1] ss:$8 sm:$0xf]   ;;  %v20_v5 = vld [vmem:[#allocation1] ss:$8 sm:$0xf]  }
   0xb   :  { %25 = vrot.lane.b32.xlu0 %v24_v4, %s41_s0  ;;  %22 = vst.msk [vmem:[#allocation0] sm:$0xf] %vm21_vm0, %v20_v5  }
  0x7d   :  { %v26_v6 = vpop.permute.xlu0 %25  }
  0x7e   :  { %28 = vst.msk [vmem:[#allocation0] sm:$0xf] %vm27_vm1, %v26_v6  }
  0x85   :  { %v32_v7 = vld [vmem:[#allocation0] sm:$0xf] }
  0x86   :  { %34 = vst [vmem:[%s68_s1] sm:$0xf] %v32_v7 }

// kernel: tile.9
= control target key start
LH: loop header
LB: loop body
LE: loop exit
PB: predicated region body
PF: predicated region fallthrough
CT: control target
= control target key end

     0   :  { %vm7_vm0 = vcmask 64512   ;;  %vm13_vm1 = vcmask 130112   ;;  %s39_s0 = inlined_call_operand.vmem [shape: f32[2,8], index: 0, kind: input, shape index: {}]   ;;  %s40_s1 = inlined_call_operand.vmem [shape: f32[1,16], index: 1, kind: output, shape index: {}]  }
   0x1   :  { %v4_v0 = vld [vmem:[%s39_s0] sm:$0x3]  ;;  %s22_s0 = smov 8  }
   0x2   :  { %5 = vst [vmem:[#allocation1] sm:$0x3] %v4_v0 }
   0x9   :  { %v10_v1 = vld [vmem:[#allocation1 + $0x1] sm:$0x1]   ;;  %v6_v2 = vld [vmem:[#allocation1] sm:$0x1]  }
   0xa   :  { %11 = vrot.lane.b32.xlu0 %v10_v1, %s22_s0  ;;  %8 = vst.msk [vmem:[#allocation0] sm:$0x1] %vm7_vm0, %v6_v2  }
  0x7c   :  { %v12_v3 = vpop.permute.xlu0 %11  }
  0x7d   :  { %14 = vst.msk [vmem:[#allocation0] sm:$0x1] %vm13_vm1, %v12_v3  }
  0x84   :  { %v18_v4 = vld [vmem:[#allocation0] sm:$0x1] }
  0x85   :  { %20 = vst [vmem:[%s40_s1] sm:$0x1] %v18_v4 }

// kernel: up_forward.3
= control target key start
LH: loop header
LB: loop body
LE: loop exit
PB: predicated region body
PF: predicated region fallthrough
CT: control target
= control target key end

     0   :  { %s708_s15 = smov 0   ;;  %s710_s16 = smov 0   ;;  %s776_s0 = inlined_call_operand.vmem [shape: f32[2,8,8,4], index: 0, kind: input, shape index: {}]   ;;  %s777_s1 = inlined_call_operand.vmem [shape: f32[4,16], index: 1, kind: input, shape index: {}]   ;;  %s778_s2 = inlined_call_operand.vmem [shape: f32[4,16], index: 2, kind: input, shape index: {}]   ;;  %s779_s3 = inlined_call_operand.vmem [shape: f32[1,16], index: 3, kind: input, shape index: {}]   ;;  %s780_s4 = inlined_call_operand.vmem [shape: f32[2,8,2,8,16], index: 4, kind: output, shape index: {}]  }
   0x1   :  { %s712_s17 = smov 0   ;;  %s714_s18 = smov 0  }
   0x2   :  { %s716_s19 = smov 0  }
   0x3 LB: > { %s23_s20 = sadd.s32 1, %s673_s17  ;;  %s26_s21 = sadd.s32 1, %s677_s18  ;;  %s681_s19 = sphi %s716_s19, %s14_s19   ;;  %s677_s18 = sphi %s714_s18, %s784_s18   ;;  %s673_s17 = sphi %s712_s17, %s783_s17   ;;  %s669_s16 = sphi %s710_s16, %s782_s16   ;;  %s665_s15 = sphi %s708_s15, %s781_s15  }
   0x4   : > { %p24_p0 = scmp.ge.s32.totalorder %s23_s20, 2  ;;  %p552_p1 = scmp.ge.s32.totalorder %s681_s19, 1 }
   0x5   : > { %p183_p2 = scmp.lt.s32.totalorder %s681_s19, 5 }
   0x6   : > { %s786_s20 = smov (%p24_p0, %s23_s20), 0  ;;  %s788_s21 = smov (!%p24_p0, %s26_s21), %s677_s18 }
   0x7   : > { %p184_p3 = pnand %p552_p1, %p183_p2  ;;  %p28_p4 = scmp.ge.s32.totalorder %s788_s21, 2 }
   0x8   : > { %v243_v0 = vld [vmem:[%s777_s1] sm:$0xf] (!%p184_p3)  ;;  %vm264_vm0 = vcmask (!%p184_p3), 1043456   ;;  %s553_s26 = sshll.u32 (!%p184_p3), %s665_s15, 2  ;;  %p219_p5 = scmp.lt.s32.totalorder (!%p184_p3), %s669_s16, 1  ;;  %vm251_vm1 = vcmask (!%p184_p3), 31744  }
   0x9   : > { %s790_s21 = smov (%p28_p4, %s788_s21), 0  ;;  %187 = sbr.rel (%p184_p3) target bundleno = 243 (0xf3), region = 36 }
   0xa   : > { %v353_v1 = vld [vmem:[%s778_s2] sm:$0xf] (!%p184_p3)  ;;  %587 = vmatprep.subr.msk.mxu0 (!%p184_p3), %vm264_vm0, %v243_v0  ;;  %p221_p6 = scmp.lt.s32.totalorder (!%p184_p3), %s553_s26, 7  ;;  %vm442_vm2 = vcmask (!%p184_p3), 130048  }
   0xb   : > { %595 = vmatprep.subr.msk.mxu1 (!%p184_p3), %vm264_vm0, %v353_v1  ;;  %588 = vmatpush3.msk.msra.mxu0 (!%p184_p3), %vm264_vm0, %v243_v0  ;;  %v560_v6 = vld [vmem:[%s779_s3] ss:$0 sm:$0xff] (!%p184_p3) }
   0xc   : > { %596 = vmatpush3.msk.msra.mxu1 (!%p184_p3), %vm264_vm0, %v353_v1 }
  0x10   : > { %s792_s16 = smov (!%p219_p5, %s669_s16), 1  ;;  %s794_s26 = smov (!%p221_p6, %s553_s26), 7 }
  0x11   : > { %s554_s27 = sshll.u32 %s792_s16, 3  ;;  %s558_s28 = sshll.u32 %s792_s16, 4 }
  0x12   : > { %s224_s29 = sadd.s32 %s554_s27, %s794_s26  ;;  %s557_s30 = sshll.u32 %s794_s26, 1 }
  0x13   : > { %s555_s5 = sshll.u32 %s224_s29, 3  ;;  %s235_s6 = sadd.s32 %s558_s28, %s557_s30 }
  0x14   : > { %s226_s9 = scalar_lea.vmem %s776_s0, %s555_s5  ;;  %s559_s10 = sshll.u32 %s235_s6, 3 }
  0x15   : > { %v239_v2 = vld [vmem:[%s226_s9] sm:$0xff]  ;;  %v240_v3 = vld [vmem:[%s226_s9 + $0x8] sm:$0xff]  ;;  %v241_v4 = vld [vmem:[%s226_s9 + $0x10] sm:$0xff]  ;;  %s237_s15 = scalar_lea.vmem %s780_s4, %s559_s10 }
  0x16   : > { %589 = vmatprep.mubr.msk.f32.mxu0 %vm251_vm1, %v239_v2  ;;  %597 = vmatprep.mubr.msk.f32.mxu1 %vm251_vm1, %v239_v2  ;;  %v242_v5 = vld [vmem:[%s226_s9 + $0x18] sm:$0xff] }
  0x17   : > { %590 = vmatmul.mubr.msk.f32.vlgmr.msra.gmra.mrb[0].mxu0 %vm251_vm1, %v240_v3  ;;  %598 = vmatmul.mubr.msk.f32.vlgmr.msra.gmra.mrb[0].mxu1 %vm251_vm1, %v240_v3 }
  0x18   : > { %592 = vmatprep.mubr.msk.f32.mxu0 %vm251_vm1, %v241_v4  ;;  %600 = vmatprep.mubr.msk.f32.mxu1 %vm251_vm1, %v241_v4 }
  0x1b   : > { %593 = vmatmul.mubr.msk.f32.gmra.mrb[2].mxu0 %vm251_vm1, %v242_v5  ;;  %601 = vmatmul.mubr.msk.f32.gmra.mrb[2].mxu1 %vm251_vm1, %v242_v5 }
  0xea   : > { %v591_v7 = vpop.f32.mrb[0].mxu0  ;;  %v599_v8 = vpop.f32.mrb[0].mxu1 }
  0xeb   : > { %v340_v9 = vadd.f32 %v591_v7, %v560_v6  ;;  %v429_v10 = vadd.f32 %v599_v8, %v560_v6  ;;  %v334_v11 = vpop.f32.mrb[1].mxu0  ;;  %v423_v12 = vpop.f32.mrb[1].mxu1 }
  0xec   : > { %v335_v13 = vadd.f32 %v560_v6, %v334_v11  ;;  %v424_v14 = vadd.f32 %v560_v6, %v423_v12 }
  0xed   : > { %444 = vst.msk [vmem:[%s237_s15 + $0x10] sm:$0xff] %vm442_vm2, %v340_v9  ;;  %572 = vst.msk [vmem:[%s237_s15 + $0x18] sm:$0xff] %vm442_vm2, %v429_v10 }
  0xee   : > { %443 = vst.msk [vmem:[%s237_s15] sm:$0xff] %vm442_vm2, %v335_v13  ;;  %571 = vst.msk [vmem:[%s237_s15 + $0x8] sm:$0xff] %vm442_vm2, %v424_v14  ;;  %v594_v15 = vpop.f32.mrb[2].mxu0  ;;  %v602_v16 = vpop.f32.mrb[2].mxu1 }
  0xef   : > { %v350_v17 = vadd.f32 %v594_v15, %v560_v6  ;;  %v439_v18 = vadd.f32 %v602_v16, %v560_v6  ;;  %v344_v19 = vpop.f32.mrb[3].mxu0  ;;  %v433_v20 = vpop.f32.mrb[3].mxu1 }
  0xf0   : > { %v345_v21 = vadd.f32 %v560_v6, %v344_v19  ;;  %v434_v22 = vadd.f32 %v560_v6, %v433_v20 }
  0xf1   : > { %446 = vst.msk [vmem:[%s237_s15 + $0x30] sm:$0xff] %vm442_vm2, %v350_v17  ;;  %574 = vst.msk [vmem:[%s237_s15 + $0x38] sm:$0xff] %vm442_vm2, %v439_v18 }
  0xf2   : > { %445 = vst.msk [vmem:[%s237_s15 + $0x20] sm:$0xff] %vm442_vm2, %v345_v21  ;;  %573 = vst.msk [vmem:[%s237_s15 + $0x28] sm:$0xff] %vm442_vm2, %v434_v22 }
  0xf3 PF: > { %s14_s19 = sadd.s32 1, %s681_s19   ;;  %s781_s15 = smov %s673_s17 }
  0xf4   : > { %p11_p7 = scmp.ge.s32.totalorder %s14_s19, 6   ;;  %s782_s16 = smov %s677_s18 }
  0xf5   : > { %s783_s17 = smov %s786_s20  ;;  %s784_s18 = smov %s790_s21 }
  0xf6   :  { %13 = sbr.rel (!%p11_p7) target bundleno = 3 (0x3), region = 67 }

// kernel: up_forward.5
= control target key start
LH: loop header
LB: loop body
LE: loop exit
PB: predicated region body
PF: predicated region fallthrough
CT: control target
= control target key end

     0   :  { %s1788_s21 = smov 0   ;;  %s1790_s22 = smov 0   ;;  %s2614_s0 = inlined_call_operand.vmem [shape: f32[2,18,18,8], index: 0, kind: input, shape index: {}, may-alias: {0,1,2}]   ;;  %s2615_s1 = inlined_call_operand.vmem [shape: f32[2,18,18,8], index: 1, kind: input, shape index: {}, may-alias: {0,1,2}]   ;;  %s2616_s2 = inlined_call_operand.vmem [shape: f32[2,18,18,8], index: 2, kind: input, shape index: {}, may-alias: {0,1,2}]   ;;  %s2617_s3 = inlined_call_operand.vmem [shape: f32[72,8], index: 3, kind: input, shape index: {}]   ;;  %s2618_s4 = inlined_call_operand.vmem [shape: f32[1,8], index: 4, kind: input, shape index: {}]   ;;  %s2619_s5 = inlined_call_operand.vmem [shape: f32[1,8], index: 5, kind: input, shape index: {}]   ;;  %s2620_s6 = inlined_call_operand.vmem [shape: f32[2,16,16,8], index: 6, kind: output, shape index: {}]  }
   0x1   :  { %s1792_s23 = smov 0   ;;  %s1794_s24 = smov 0  }
   0x2   :  { %s1796_s25 = smov 0  }
   0x3 LB: > { %s25_s26 = sadd.s32 1, %s1735_s23  ;;  %s28_s27 = sadd.s32 1, %s1739_s24  ;;  %s1743_s25 = sphi %s1796_s25, %s16_s25   ;;  %s1739_s24 = sphi %s1794_s24, %s2652_s24   ;;  %s1735_s23 = sphi %s1792_s23, %s2651_s23   ;;  %s1731_s22 = sphi %s1790_s22, %s2650_s22   ;;  %s1727_s21 = sphi %s1788_s21, %s2649_s21  }
   0x4   : > { %p26_p0 = scmp.ge.s32.totalorder %s25_s26, 2  ;;  %p1529_p1 = scmp.ge.s32.totalorder %s1743_s25, 1 }
   0x5   : > { %p292_p2 = scmp.lt.s32.totalorder %s1743_s25, 5 }
   0x6   : > { %s2654_s26 = smov (%p26_p0, %s25_s26), 0  ;;  %s2656_s27 = smov (!%p26_p0, %s28_s27), %s1739_s24 }
   0x7   : > { %p293_p3 = pnand %p1529_p1, %p292_p2  ;;  %p30_p4 = scmp.ge.s32.totalorder %s2656_s27, 2 }
   0x9   : > { %s2658_s27 = smov (%p30_p4, %s2656_s27), 0  ;;  %296 = sbr.rel (%p293_p3) target bundleno = 619 (0x26b), region = 44 }
  0x10   : > { %s1818_s28 = sshll.u32 %s1727_s21, 3  ;;  %p365_p5 = scmp.lt.s32.totalorder %s1731_s22, 1  ;;  %vm471_vm0 = vcmask 1046528   ;;  %vm512_vm1 = vcmask 1045504   ;;  %v1099_v62 = vld [vmem:[%s2617_s3] sm:$0xff]  ;;  %v1100_v63 = vld [vmem:[%s2617_s3 + $0x8] sm:$0xff] }
  0x11   : > { %p367_p6 = scmp.lt.s32.totalorder %s1818_s28, 17  ;;  %s1745_s13 = smov 8   ;;  %vm963_vm2 = vcmask 64512   ;;  %vm980_vm3 = vcmask 130048   ;;  %vm997_vm4 = vcmask 195584   ;;  %vm1014_vm5 = vcmask 261120  }
  0x12   : > { %s2660_s22 = smov (!%p365_p5, %s1731_s22), 1  ;;  %s1746_s14 = smov 16   ;;  %vm1031_vm6 = vcmask 326656   ;;  %vm1048_vm7 = vcmask 392192   ;;  %vm1065_vm8 = vcmask 457728   ;;  %vm1082_vm9 = vcmask 523264  }
  0x13   : > { %s368_s29 = scalar_select %p367_p6, %s1818_s28, 17  ;;  %vm1108_vm10 = vcmask 588800  }
  0x14   : > { %s1825_s30 = smul.u32 54, %s2660_s22  ;;  %s1747_s15 = smov 24  }
  0x15   : > { %s1653_s7 = smul.u32 3, %s368_s29  ;;  %s1748_s16 = smov 32  }
  0x16   : > { %s1749_s17 = smov 40   ;;  %s1750_s18 = smov 48  }
  0x17   : > { %s371_s8 = sadd.s32 %s1825_s30, %s1653_s7  ;;  %s1751_s7 = smov 56  }
  0x18   : > { %s1531_s9 = sshll.u32 %s371_s8, 3  ;;  %s1752_s19 = smov 64  }
  0x19   : > { %s1831_s12 = scalar_lea.vmem %s2614_s0, %s1531_s9  ;;  %p409_p9 = scmp.lt.s32.totalorder %s1818_s28, 15 }
  0x1a   : > { %v1834_v0 = vld [vmem:[%s1831_s12 + $0x8] sm:$0xff]  ;;  %v419_v1 = vld [vmem:[%s1831_s12 + $0x10] sm:$0x3]  ;;  %v1838_v2 = vld [vmem:[%s1831_s12] sm:$0xff] }
  0x1b   : > { %v473_v3 = vrot.slane %v1834_v0, 1  ;;  %v475_v4 = vrot.slane %v419_v1, 1  ;;  %v472_v5 = vrot.slane %v1838_v2, 1  ;;  %v1843_v6 = vld [vmem:[%s1831_s12 + $0x68] sm:$0xff]  ;;  %v431_v7 = vld [vmem:[%s1831_s12 + $0x70] sm:$0x3] }
  0x1c   : > { %v493_v8 = vrot.slane %v1843_v6, 1  ;;  %v495_v9 = vrot.slane %v431_v7, 1  ;;  %v1848_v10 = vld [vmem:[%s1831_s12 + $0x60] sm:$0xff]  ;;  %v534_v14 = vrot.slane %v1843_v6, 2  ;;  %v513_v15 = vrot.slane %v1838_v2, 2  ;;  %v1884_v26 = vld [vmem:[%s1831_s12 + $0x78] sm:$0xff] }
  0x1d   : > { %v476_v11 = vsel %vm471_vm0, %v473_v3, %v475_v4  ;;  %v474_v12 = vsel %vm471_vm0, %v472_v5, %v473_v3  ;;  %v492_v13 = vrot.slane %v1848_v10, 1  ;;  %v533_v18 = vrot.slane %v1848_v10, 2  ;;  %v1887_v27 = vld [vmem:[%s1831_s12 + $0x18] sm:$0xff]  ;;  %v1890_v28 = vld [vmem:[%s1831_s12 + $0x80] sm:$0xff]  ;;  %v434_v36 = vld [vmem:[%s1831_s12 + $0x88] sm:$0x3] }
  0x1e   : > { %581 = vrot.lane.b32.xlu1 %v476_v11, %s1745_s13  ;;  %579 = vrot.lane.b32.xlu0 %v474_v12, %s1745_s13  ;;  %v1858_v16 = vsel %vm471_vm0, %v493_v8, %v495_v9  ;;  %v514_v19 = vrot.slane %v1834_v0, 2  ;;  %v536_v22 = vrot.slane %v431_v7, 2  ;;  %v516_v23 = vrot.slane %v419_v1, 2  ;;  %v1893_v29 = vld [vmem:[%s1831_s12 + $0x20] sm:$0xff]  ;;  %v422_v37 = vld [vmem:[%s1831_s12 + $0x28] sm:$0x3] }
  0x1f   : > { %v1861_v17 = vsel %vm471_vm0, %v492_v13, %v493_v8  ;;  %v1870_v20 = vsel %vm512_vm1, %v533_v18, %v534_v14  ;;  %v497_v30 = vrot.slane %v1884_v26, 1  ;;  %v498_v31 = vrot.slane %v1890_v28, 1  ;;  %v1951_v52 = vld [vmem:[%s1831_s12 + $0x90] sm:$0xff]  ;;  %v1964_v54 = vld [vmem:[%s1831_s12 + $0x98] sm:$0xff]  ;;  %v437_v3 = vld [vmem:[%s1831_s12 + $0xa0] sm:$0x3] }
  0x20   : > { %v515_v21 = vsel %vm512_vm1, %v513_v15, %v514_v19  ;;  %v1877_v24 = vsel %vm512_vm1, %v534_v14, %v536_v22  ;;  %v517_v25 = vsel %vm512_vm1, %v514_v19, %v516_v23  ;;  %v477_v32 = vrot.slane %v1887_v27, 1  ;;  %v1954_v53 = vld [vmem:[%s1831_s12 + $0x30] sm:$0xff]  ;;  %v1967_v55 = vld [vmem:[%s1831_s12 + $0x38] sm:$0xff]  ;;  %v425_v4 = vld [vmem:[%s1831_s12 + $0x40] sm:$0x3] }
  0x21   : > { %v478_v33 = vrot.slane %v1893_v29, 1  ;;  %v1908_v34 = vsel %vm471_vm0, %v497_v30, %v498_v31  ;;  %v500_v38 = vrot.slane %v434_v36, 1  ;;  %v480_v39 = vrot.slane %v422_v37, 1  ;;  %2634 = vst [vmem:[#allocation6_spill] sm:$0xff] %v1967_v55  ;;  %v1101_v5 = vld [vmem:[%s2617_s3 + $0x10] sm:$0xff]  ;;  %v1102_v7 = vld [vmem:[%s2617_s3 + $0x18] sm:$0xff] }
  0x22   : > { %597 = vrot.lane.b32.xlu1 %v1858_v16, %s1745_s13  ;;  %595 = vrot.lane.b32.xlu0 %v1861_v17, %s1745_s13  ;;  %2630 = vst [vmem:[#allocation2_spill] sm:$0xff] %v1908_v34  ;;  %v538_v40 = vrot.slane %v1884_v26, 2  ;;  %v539_v41 = vrot.slane %v1890_v28, 2  ;;  %v518_v44 = vrot.slane %v1887_v27, 2  ;;  %v519_v45 = vrot.slane %v1893_v29, 2  ;;  %v1103_v15 = vld [vmem:[%s2617_s3 + $0x20] sm:$0xff] }
  0x23   : > { %v479_v35 = vsel %vm471_vm0, %v477_v32, %v478_v33  ;;  %v1922_v42 = vsel %vm471_vm0, %v498_v31, %v500_v38  ;;  %v481_v43 = vsel %vm471_vm0, %v478_v33, %v480_v39  ;;  %v541_v48 = vrot.slane %v434_v36, 2  ;;  %v1104_v18 = vld [vmem:[%s2617_s3 + $0x28] sm:$0xff]  ;;  %v1106_v30 = vld [vmem:[%s2617_s3 + $0x38] sm:$0xff] }
  0x24   : > { %2631 = vst [vmem:[#allocation3_spill] sm:$0xff] %v1922_v42  ;;  %v1931_v46 = vsel %vm512_vm1, %v538_v40, %v539_v41  ;;  %v520_v47 = vsel %vm512_vm1, %v518_v44, %v519_v45  ;;  %v521_v49 = vrot.slane %v422_v37, 2  ;;  %v502_v56 = vrot.slane %v1951_v52, 1  ;;  %v2049_v40 = vld [vmem:[%s1831_s12 + $0xa8] sm:$0xff] }
  0x25   : > { %2632 = vst [vmem:[#allocation4_spill] sm:$0xff] %v1931_v46  ;;  %v1944_v50 = vsel %vm512_vm1, %v539_v41, %v541_v48  ;;  %v503_v57 = vrot.slane %v1964_v54, 1  ;;  %v482_v58 = vrot.slane %v1954_v53, 1  ;;  %v483_v59 = vrot.slane %v1967_v55, 1  ;;  %2635 = vst [vmem:[#allocation7_spill] sm:$0xff] %v2049_v40  ;;  %v2052_v41 = vld [vmem:[%s1831_s12 + $0x48] sm:$0xff] }
  0x26   : > { %643 = vrot.lane.b32.xlu1 %v1870_v20, %s1746_s14  ;;  %627 = vrot.lane.b32.xlu0 %v515_v21, %s1746_s14  ;;  %2633 = vst [vmem:[#allocation5_spill] sm:$0xff] %v1944_v50  ;;  %v522_v51 = vsel %vm512_vm1, %v519_v45, %v521_v49  ;;  %v1627_v1 = vpack.c.bf16 %v1100_v63, %v1099_v62  ;;  %v505_v8 = vrot.slane %v437_v3, 1  ;;  %v485_v9 = vrot.slane %v425_v4, 1 }
  0x27   : > { %v504_v60 = vsel %vm471_vm0, %v502_v56, %v503_v57  ;;  %v484_v61 = vsel %vm471_vm0, %v482_v58, %v483_v59  ;;  %v1631_v11 = vpack.c.bf16 %v1102_v7, %v1101_v5  ;;  %v543_v12 = vrot.slane %v1951_v52, 2  ;;  %2636 = vst [vmem:[#allocation8_spill] sm:$0xff] %v2052_v41  ;;  %v2076_v56 = vld [vmem:[%s1831_s12 + $0x50] sm:$0xff]  ;;  %v440_v5 = vld [vmem:[%s1831_s12 + $0xb8] sm:$0x3] }
  0x28   : > { %1628 = vmatprep.subr.bf16.mxu0 %v1627_v1  ;;  %1643 = vmatprep.subr.bf16.mxu1 %v1627_v1  ;;  %v544_v13 = vrot.slane %v1964_v54, 2  ;;  %v523_v14 = vrot.slane %v1954_v53, 2  ;;  %v506_v19 = vsel %vm471_vm0, %v503_v57, %v505_v8  ;;  %v486_v21 = vsel %vm471_vm0, %v483_v59, %v485_v9  ;;  %2638 = vst [vmem:[#allocation10_spill] sm:$0xff] %v2076_v56  ;;  %v428_v7 = vld [vmem:[%s1831_s12 + $0x58] sm:$0x3] }
  0x29   : > { %1630 = vmatpush3.bf16.msra.mxu0 %v1627_v1  ;;  %1648 = vmatpush3.bf16.msra.mxu1 %v1627_v1  ;;  %v524_v22 = vrot.slane %v1967_v55, 2  ;;  %v1635_v23 = vpack.c.bf16 %v1104_v18, %v1103_v15  ;;  %v546_v36 = vrot.slane %v437_v3, 2  ;;  %v526_v37 = vrot.slane %v425_v4, 2 }
  0x2a   : > { %645 = vrot.lane.b32.xlu1 %v1877_v24, %s1746_s14  ;;  %629 = vrot.lane.b32.xlu0 %v517_v25, %s1746_s14  ;;  %v1105_v25 = vld [vmem:[%s2617_s3 + $0x30] sm:$0xff]  ;;  %v545_v31 = vsel %vm512_vm1, %v543_v12, %v544_v13  ;;  %v507_v57 = vrot.slane %v2049_v40, 1  ;;  %v487_v59 = vrot.slane %v2052_v41, 1  ;;  %v490_v12 = vrot.slane %v428_v7, 1 }
  0x2b   : > { %1632 = vmatprep.subr.bf16.mxu0 %v1631_v11  ;;  %1644 = vmatprep.subr.bf16.mxu1 %v1631_v11  ;;  %v525_v32 = vsel %vm512_vm1, %v523_v14, %v524_v22  ;;  %v1639_v33 = vpack.c.bf16 %v1106_v30, %v1105_v25  ;;  %v547_v38 = vsel %vm512_vm1, %v544_v13, %v546_v36 }
  0x2c   : > { %v527_v39 = vsel %vm512_vm1, %v524_v22, %v526_v37  ;;  %v528_v22 = vrot.slane %v2052_v41, 2 }
  0x2d   : > { %1634 = vmatpush3.bf16.msra.mxu0 %v1631_v11  ;;  %1649 = vmatpush3.bf16.msra.mxu1 %v1631_v11  ;;  %v510_v11 = vrot.slane %v440_v5, 1 }
  0x2e   : > { %691 = vrot.lane.b32.xlu1 %v1884_v26, %s1747_s15  ;;  %675 = vrot.lane.b32.xlu0 %v1887_v27, %s1747_s15 }
  0x2f   : > { %1636 = vmatprep.subr.bf16.mxu0 %v1635_v23  ;;  %1645 = vmatprep.subr.bf16.mxu1 %v1635_v23 }
  0x31   : > { %1638 = vmatpush3.bf16.msra.mxu0 %v1635_v23  ;;  %1650 = vmatpush3.bf16.msra.mxu1 %v1635_v23  ;;  %v529_v23 = vrot.slane %v2076_v56, 2 }
  0x32   : > { %693 = vrot.lane.b32.xlu1 %v1890_v28, %s1747_s15  ;;  %677 = vrot.lane.b32.xlu0 %v1893_v29, %s1747_s15 }
  0x33   : > { %1640 = vmatprep.subr.bf16.mxu0 %v1639_v33  ;;  %1646 = vmatprep.subr.bf16.mxu1 %v1639_v33 }
  0x35   : > { %1642 = vmatpush3.bf16.msra.mxu0 %v1639_v33  ;;  %1651 = vmatpush3.bf16.msra.mxu1 %v1639_v33 }
  0x36   : > { %739 = vrot.lane.b32.xlu1 %v1908_v34, %s1748_s16  ;;  %723 = vrot.lane.b32.xlu0 %v479_v35, %s1748_s16 }
  0x3a   : > { %599 = vrot.lane.b32.xlu1 %v1908_v34, %s1745_s13  ;;  %583 = vrot.lane.b32.xlu0 %v479_v35, %s1745_s13  ;;  %v1107_v35 = vld [vmem:[%s2617_s3 + $0x40] sm:$0xff] }
  0x3b   : > { %1601 = vmatprep.subr.mxu0 %v1107_v35  ;;  %1647 = vmatprep.subr.mxu1 %v1107_v35 }
  0x3c   : > { %1602 = vmatpush3.msra.mxu0 %v1107_v35  ;;  %1652 = vmatpush3.msra.mxu1 %v1107_v35 }
  0x3e   : > { %741 = vrot.lane.b32.xlu1 %v1922_v42, %s1748_s16  ;;  %725 = vrot.lane.b32.xlu0 %v481_v43, %s1748_s16 }
  0x42   : > { %787 = vrot.lane.b32.xlu1 %v1931_v46, %s1749_s17  ;;  %771 = vrot.lane.b32.xlu0 %v520_v47, %s1749_s17 }
  0x46   : > { %601 = vrot.lane.b32.xlu1 %v1922_v42, %s1745_s13  ;;  %585 = vrot.lane.b32.xlu0 %v481_v43, %s1745_s13 }
  0x4a   : > { %647 = vrot.lane.b32.xlu1 %v1931_v46, %s1746_s14  ;;  %631 = vrot.lane.b32.xlu0 %v520_v47, %s1746_s14 }
  0x4e   : > { %789 = vrot.lane.b32.xlu1 %v1944_v50, %s1749_s17  ;;  %773 = vrot.lane.b32.xlu0 %v522_v51, %s1749_s17 }
  0x52   : > { %835 = vrot.lane.b32.xlu1 %v1951_v52, %s1750_s18  ;;  %819 = vrot.lane.b32.xlu0 %v1954_v53, %s1750_s18 }
  0x56   : > { %649 = vrot.lane.b32.xlu1 %v1944_v50, %s1746_s14  ;;  %633 = vrot.lane.b32.xlu0 %v522_v51, %s1746_s14  ;;  %v2073_v51 = vld [vmem:[%s1831_s12 + $0xb0] sm:$0xff]  ;;  %s381_s12 = sadd.s32 8, %s1818_s28 }
  0x57   : > { %2637 = vst [vmem:[#allocation9_spill] sm:$0xff] %v2073_v51  ;;  %v508_v58 = vrot.slane %v2073_v51, 1  ;;  %p384_p7 = scmp.lt.s32.totalorder %s381_s12, 17 }
  0x59   : > { %v509_v63 = vsel %vm471_vm0, %v507_v57, %v508_v58  ;;  %v511_v15 = vsel %vm471_vm0, %v508_v58, %v510_v11  ;;  %v551_v57 = vrot.slane %v440_v5, 2  ;;  %v531_v58 = vrot.slane %v428_v7, 2  ;;  %s2662_s12 = smov (!%p384_p7, %s381_s12), 17 }
  0x5a   : > { %695 = vrot.lane.b32.xlu1 %v1951_v52, %s1747_s15  ;;  %679 = vrot.lane.b32.xlu0 %v1954_v53, %s1747_s15  ;;  %s1655_s29 = smul.u32 3, %s2662_s12 }
  0x5c   : > { %s388_s8 = sadd.s32 %s1655_s29, %s1825_s30 }
  0x5d   : > { %s1533_s9 = sshll.u32 %s388_s8, 3 }
  0x5e   : > { %837 = vrot.lane.b32.xlu1 %v1964_v54, %s1750_s18  ;;  %821 = vrot.lane.b32.xlu0 %v1967_v55, %s1750_s18  ;;  %s2177_s20 = scalar_lea.vmem %s2615_s1, %s1533_s9 }
  0x62   : > { %883 = vrot.lane.b32.xlu1 %v504_v60, %s1751_s7  ;;  %867 = vrot.lane.b32.xlu0 %v484_v61, %s1751_s7 }
  0x66   : > { %697 = vrot.lane.b32.xlu1 %v1964_v54, %s1747_s15  ;;  %681 = vrot.lane.b32.xlu0 %v1967_v55, %s1747_s15 }
  0x6a   : > { %743 = vrot.lane.b32.xlu1 %v504_v60, %s1748_s16  ;;  %727 = vrot.lane.b32.xlu0 %v484_v61, %s1748_s16 }
  0x6e   : > { %885 = vrot.lane.b32.xlu1 %v506_v19, %s1751_s7  ;;  %869 = vrot.lane.b32.xlu0 %v486_v21, %s1751_s7 }
  0x72   : > { %931 = vrot.lane.b32.xlu1 %v545_v31, %s1752_s19  ;;  %915 = vrot.lane.b32.xlu0 %v525_v32, %s1752_s19 }
  0x76   : > { %603 = vrot.lane.b32.xlu1 %v504_v60, %s1745_s13  ;;  %587 = vrot.lane.b32.xlu0 %v484_v61, %s1745_s13  ;;  %v488_v60 = vrot.slane %v2076_v56, 1 }
  0x78   : > { %v489_v1 = vsel %vm471_vm0, %v487_v59, %v488_v60  ;;  %v491_v18 = vsel %vm471_vm0, %v488_v60, %v490_v12 }
  0x7a   : > { %745 = vrot.lane.b32.xlu1 %v506_v19, %s1748_s16  ;;  %729 = vrot.lane.b32.xlu0 %v486_v21, %s1748_s16 }
  0x7e   : > { %791 = vrot.lane.b32.xlu1 %v545_v31, %s1749_s17  ;;  %775 = vrot.lane.b32.xlu0 %v525_v32, %s1749_s17 }
  0x82   : > { %933 = vrot.lane.b32.xlu1 %v547_v38, %s1752_s19  ;;  %917 = vrot.lane.b32.xlu0 %v527_v39, %s1752_s19 }
  0x86   : > { %605 = vrot.lane.b32.xlu1 %v506_v19, %s1745_s13  ;;  %589 = vrot.lane.b32.xlu0 %v486_v21, %s1745_s13  ;;  %v548_v19 = vrot.slane %v2049_v40, 2  ;;  %v549_v21 = vrot.slane %v2073_v51, 2 }
  0x8a   : > { %651 = vrot.lane.b32.xlu1 %v545_v31, %s1746_s14  ;;  %635 = vrot.lane.b32.xlu0 %v525_v32, %s1746_s14  ;;  %v550_v31 = vsel %vm512_vm1, %v548_v19, %v549_v21  ;;  %v530_v32 = vsel %vm512_vm1, %v528_v22, %v529_v23 }
  0x8e   : > { %793 = vrot.lane.b32.xlu1 %v547_v38, %s1749_s17  ;;  %777 = vrot.lane.b32.xlu0 %v527_v39, %s1749_s17 }
  0x90   : > { %v2054_v43 = vpop.permute.xlu1 %581  ;;  %v2056_v44 = vpop.permute.xlu0 %579 }
  0x92   : > { %839 = vrot.lane.b32.xlu1 %v2049_v40, %s1750_s18  ;;  %823 = vrot.lane.b32.xlu0 %v2052_v41, %s1750_s18 }
  0x94   : > { %v2062_v45 = vpop.permute.xlu1 %597  ;;  %v2064_v47 = vpop.permute.xlu0 %595 }
  0x96   : > { %653 = vrot.lane.b32.xlu1 %v547_v38, %s1746_s14  ;;  %637 = vrot.lane.b32.xlu0 %v527_v39, %s1746_s14 }
  0x98   : > { %v2068_v48 = vpop.permute.xlu1 %643  ;;  %v2070_v49 = vpop.permute.xlu0 %627 }
  0x9a   : > { %699 = vrot.lane.b32.xlu1 %v2049_v40, %s1747_s15  ;;  %683 = vrot.lane.b32.xlu0 %v2052_v41, %s1747_s15 }
  0x9c   : > { %v2086_v61 = vpop.permute.xlu1 %645  ;;  %v2088_v62 = vpop.permute.xlu0 %629 }
  0x9e   : > { %841 = vrot.lane.b32.xlu1 %v2073_v51, %s1750_s18  ;;  %825 = vrot.lane.b32.xlu0 %v2076_v56, %s1750_s18 }
  0xa0   : > { %v2096_v3 = vpop.permute.xlu1 %691  ;;  %v2098_v4 = vpop.permute.xlu0 %675 }
  0xa2   : > { %887 = vrot.lane.b32.xlu1 %v509_v63, %s1751_s7  ;;  %871 = vrot.lane.b32.xlu0 %v489_v1, %s1751_s7 }
  0xa4   : > { %v2104_v8 = vpop.permute.xlu1 %693  ;;  %v2106_v9 = vpop.permute.xlu0 %677 }
  0xa6   : > { %701 = vrot.lane.b32.xlu1 %v2073_v51, %s1747_s15  ;;  %685 = vrot.lane.b32.xlu0 %v2076_v56, %s1747_s15  ;;  %v2199_v51 = vld [vmem:[%s2177_s20 + $0x8] sm:$0xff] }
  0xa7   : > { %v557_v46 = vrot.slane %v2199_v51, 1 }
  0xa8   : > { %v2112_v13 = vpop.permute.xlu1 %739  ;;  %v2114_v14 = vpop.permute.xlu0 %723 }
  0xaa   : > { %747 = vrot.lane.b32.xlu1 %v509_v63, %s1748_s16  ;;  %731 = vrot.lane.b32.xlu0 %v489_v1, %s1748_s16 }
  0xac   : > { %v2124_v25 = vpop.permute.xlu1 %599  ;;  %v2126_v30 = vpop.permute.xlu0 %583 }
  0xad   : > { %v974_v41 = vsel %vm963_vm2, %v1884_v26, %v2124_v25  ;;  %v966_v40 = vsel %vm963_vm2, %v1887_v27, %v2126_v30 }
  0xae   : > { %889 = vrot.lane.b32.xlu1 %v511_v15, %s1751_s7  ;;  %873 = vrot.lane.b32.xlu0 %v491_v18, %s1751_s7 }
  0xb0   : > { %v2132_v33 = vpop.permute.xlu1 %741  ;;  %v2134_v35 = vpop.permute.xlu0 %725 }
  0xb2   : > { %935 = vrot.lane.b32.xlu1 %v550_v31, %s1752_s19  ;;  %919 = vrot.lane.b32.xlu0 %v530_v32, %s1752_s19 }
  0xb4   : > { %v2138_v36 = vpop.permute.xlu1 %787  ;;  %v2140_v37 = vpop.permute.xlu0 %771 }
  0xb6   : > { %607 = vrot.lane.b32.xlu1 %v509_v63, %s1745_s13  ;;  %591 = vrot.lane.b32.xlu0 %v489_v1, %s1745_s13  ;;  %v552_v63 = vsel %vm512_vm1, %v549_v21, %v551_v57  ;;  %v532_v1 = vsel %vm512_vm1, %v529_v23, %v531_v58 }
  0xb8   : > { %v2145_v38 = vpop.permute.xlu1 %601  ;;  %v2147_v39 = vpop.permute.xlu0 %585 }
  0xba   : > { %749 = vrot.lane.b32.xlu1 %v511_v15, %s1748_s16  ;;  %733 = vrot.lane.b32.xlu0 %v491_v18, %s1748_s16 }
  0xbc   : > { %v648_v59 = vpop.permute.xlu1 %647  ;;  %v632_v60 = vpop.permute.xlu0 %631 }
  0xbe   : > { %795 = vrot.lane.b32.xlu1 %v550_v31, %s1749_s17  ;;  %779 = vrot.lane.b32.xlu0 %v530_v32, %s1749_s17 }
  0xc0   : > { %v2155_v11 = vpop.permute.xlu1 %789  ;;  %v2157_v12 = vpop.permute.xlu0 %773 }
  0xc2   : > { %937 = vrot.lane.b32.xlu1 %v552_v63, %s1752_s19  ;;  %921 = vrot.lane.b32.xlu0 %v532_v1, %s1752_s19 }
  0xc4   : > { %v2161_v5 = vpop.permute.xlu1 %835  ;;  %v2163_v7 = vpop.permute.xlu0 %819 }
  0xc6   : > { %609 = vrot.lane.b32.xlu1 %v511_v15, %s1745_s13  ;;  %593 = vrot.lane.b32.xlu0 %v491_v18, %s1745_s13  ;;  %v2182_v15 = vld [vmem:[%s2177_s20] sm:$0xff]  ;;  %s394_s13 = sadd.s32 9, %s1818_s28  ;;  %s2666_s28 = smov (!%p409_p9, %s1818_s28), 15 }
  0xc7   : > { %v556_v50 = vrot.slane %v2182_v15, 1  ;;  %p2309_p8 = scmp.lt.s32.totalorder %s394_s13, 17 }
  0xc8   : > { %v2168_v19 = vpop.permute.xlu1 %649  ;;  %v2170_v21 = vpop.permute.xlu0 %633 }
  0xc9   : > { %s2664_s13 = smov (!%p2309_p8, %s394_s13), 17 }
  0xca   : > { %655 = vrot.lane.b32.xlu1 %v550_v31, %s1746_s14  ;;  %639 = vrot.lane.b32.xlu0 %v530_v32, %s1746_s14 }
  0xcc   : > { %v696_v22 = vpop.permute.xlu1 %695  ;;  %v680_v23 = vpop.permute.xlu0 %679 }
  0xce   : > { %797 = vrot.lane.b32.xlu1 %v552_v63, %s1749_s17  ;;  %781 = vrot.lane.b32.xlu0 %v532_v1, %s1749_s17 }
  0xd0   : > { %v2184_v18 = vpop.permute.xlu1 %837  ;;  %v2186_v31 = vpop.permute.xlu0 %821 }
  0xd2   : > { %843 = vrot.lane.b32.xlu1 %v2182_v15, %s1750_s18  ;;  %827 = vrot.lane.b32.xlu0 %v1848_v10, %s1750_s18 }
  0xd4   : > { %v884_v32 = vpop.permute.xlu1 %883  ;;  %v868_v57 = vpop.permute.xlu0 %867 }
  0xd6   : > { %657 = vrot.lane.b32.xlu1 %v552_v63, %s1746_s14  ;;  %641 = vrot.lane.b32.xlu0 %v532_v1, %s1746_s14  ;;  %v991_v63 = vsel %vm980_vm3, %v974_v41, %v648_v59  ;;  %v983_v1 = vsel %vm980_vm3, %v966_v40, %v632_v60  ;;  %v964_v40 = vsel %vm963_vm2, %v1838_v2, %v2056_v44 }
  0xd7   : > { %v1008_v25 = vsel %vm997_vm4, %v991_v63, %v696_v22  ;;  %v1000_v42 = vsel %vm997_vm4, %v983_v1, %v680_v23  ;;  %v972_v41 = vsel %vm963_vm2, %v1848_v10, %v2064_v47  ;;  %v558_v60 = vsel %vm471_vm0, %v556_v50, %v557_v46 }
  0xd8   : > { %v2194_v58 = vpop.permute.xlu1 %697  ;;  %v2196_v56 = vpop.permute.xlu0 %681  ;;  %v989_v59 = vsel %vm980_vm3, %v972_v41, %v2068_v48  ;;  %v562_v41 = vrot.slane %v2199_v51, 2 }
  0xd9   : > { %v1006_v2 = vsel %vm997_vm4, %v989_v59, %v2096_v3 }
  0xda   : > { %703 = vrot.lane.b32.xlu1 %v2182_v15, %s1747_s15  ;;  %687 = vrot.lane.b32.xlu0 %v1848_v10, %s1747_s15  ;;  %v1023_v48 = vsel %vm1014_vm5, %v1006_v2, %v2112_v13 }
  0xdb   : > { %v1040_v50 = vsel %vm1031_vm6, %v1023_v48, %v2138_v36 }
  0xdc   : > { %v744_v27 = vpop.permute.xlu1 %743  ;;  %v728_v30 = vpop.permute.xlu0 %727 }
  0xdd   : > { %v2218_v34 = vsel %vm1014_vm5, %v1008_v25, %v744_v27  ;;  %v2221_v55 = vsel %vm1014_vm5, %v1000_v42, %v728_v30  ;;  %v981_v42 = vsel %vm980_vm3, %v964_v40, %v2070_v49  ;;  %v967_v25 = vsel %vm963_vm2, %v1893_v29, %v2147_v39 }
  0xde   : > { %845 = vrot.lane.b32.xlu1 %v2199_v51, %s1750_s18  ;;  %829 = vrot.lane.b32.xlu0 %v1843_v6, %s1750_s18  ;;  %v998_v10 = vsel %vm997_vm4, %v981_v42, %v2098_v4  ;;  %v1057_v4 = vsel %vm1048_vm7, %v1040_v50, %v2161_v5  ;;  %v561_v27 = vrot.slane %v2182_v15, 2  ;;  %v984_v40 = vsel %vm980_vm3, %v967_v25, %v2170_v21 }
  0xdf   : > { %v1015_v49 = vsel %vm1014_vm5, %v998_v10, %v2114_v14  ;;  %v2262_v14 = vld [vmem:[%s2177_s20 + $0x10] sm:$0x3]  ;;  %v1074_v36 = vsel %vm1065_vm8, %v1057_v4, %v884_v32  ;;  %v1001_v39 = vsel %vm997_vm4, %v984_v40, %v2196_v56 }
  0xe0   : > { %v2242_v44 = vpop.permute.xlu1 %885  ;;  %v2244_v47 = vpop.permute.xlu0 %869  ;;  %v1032_v3 = vsel %vm1031_vm6, %v1015_v49, %v2140_v37  ;;  %v559_v5 = vrot.slane %v2262_v14, 1 }
  0xe1   : > { %v1049_v13 = vsel %vm1048_vm7, %v1032_v3, %v2163_v7 }
  0xe2   : > { %891 = vrot.lane.b32.xlu1 %v558_v60, %s1751_s7  ;;  %875 = vrot.lane.b32.xlu0 %v1861_v17, %s1751_s7  ;;  %v1066_v22 = vsel %vm1065_vm8, %v1049_v13, %v868_v57  ;;  %v975_v57 = vsel %vm963_vm2, %v1890_v28, %v2145_v38  ;;  %v560_v38 = vsel %vm471_vm0, %v557_v46, %v559_v5 }
  0xe3   : > { %v992_v30 = vsel %vm980_vm3, %v975_v57, %v2168_v19  ;;  %v973_v46 = vsel %vm963_vm2, %v1843_v6, %v2062_v45 }
  0xe4   : > { %v932_v37 = vpop.permute.xlu1 %931  ;;  %v916_v23 = vpop.permute.xlu0 %915  ;;  %v1009_v29 = vsel %vm997_vm4, %v992_v30, %v2194_v58 }
  0xe5   : > { %v1091_v63 = vsel %vm1082_vm9, %v1074_v36, %v932_v37  ;;  %v1083_v1 = vsel %vm1082_vm9, %v1066_v22, %v916_v23 }
  0xe6   : > { %705 = vrot.lane.b32.xlu1 %v2199_v51, %s1747_s15  ;;  %1615 = vmatprep.mubr.msk.f32.mxu1 %vm1108_vm10, %v1091_v63  ;;  %v990_v51 = vsel %vm980_vm3, %v973_v46, %v2086_v61  ;;  %v2640_v63 = vld [vmem:[#allocation6_spill] sm:$0xff] }
  0xe7   : > { %689 = vrot.lane.b32.xlu0 %v1843_v6, %s1747_s15  ;;  %1603 = vmatprep.mubr.msk.f32.mxu0 %vm1108_vm10, %v1083_v1  ;;  %v1007_v6 = vsel %vm997_vm4, %v990_v51, %v2104_v8  ;;  %s1656_s15 = smul.u32 3, %s2664_s13 }
  0xe8   : > { %v604_v7 = vpop.permute.xlu1 %603  ;;  %v588_v32 = vpop.permute.xlu0 %587  ;;  %v1024_v61 = vsel %vm1014_vm5, %v1007_v6, %v2132_v33 }
  0xe9   : > { %v1041_v42 = vsel %vm1031_vm6, %v1024_v61, %v2155_v11  ;;  %s401_s21 = sadd.s32 %s1656_s15, %s1825_s30  ;;  %v976_v48 = vsel %vm963_vm2, %v1951_v52, %v604_v7 }
  0xea   : > { %751 = vrot.lane.b32.xlu1 %v558_v60, %s1748_s16  ;;  %v1058_v8 = vsel %vm1048_vm7, %v1041_v42, %v2184_v18  ;;  %v564_v18 = vrot.slane %v2262_v14, 2 }
  0xeb   : > { %735 = vrot.lane.b32.xlu0 %v1861_v17, %s1748_s16  ;;  %v965_v17 = vsel %vm963_vm2, %v1834_v0, %v2054_v43  ;;  %v563_v0 = vsel %vm512_vm1, %v561_v27, %v562_v41  ;;  %v1075_v33 = vsel %vm1065_vm8, %v1058_v8, %v2242_v44 }
  0xec   : > { %v746_v15 = vpop.permute.xlu1 %745  ;;  %v730_v59 = vpop.permute.xlu0 %729  ;;  %v982_v56 = vsel %vm980_vm3, %v965_v17, %v2088_v62 }
  0xed   : > { %v2297_v19 = vsel %vm1014_vm5, %v1009_v29, %v746_v15  ;;  %v2300_v21 = vsel %vm1014_vm5, %v1001_v39, %v730_v59  ;;  %v999_v43 = vsel %vm997_vm4, %v982_v56, %v2106_v9  ;;  %v2641_v29 = vld [vmem:[#allocation2_spill] sm:$0xff]  ;;  %v2642_v59 = vld [vmem:[#allocation3_spill] sm:$0xff] }
  0xee   : > { %893 = vrot.lane.b32.xlu1 %v560_v38, %s1751_s7  ;;  %v1016_v62 = vsel %vm1014_vm5, %v999_v43, %v2134_v35 }
  0xef   : > { %877 = vrot.lane.b32.xlu0 %v1858_v16, %s1751_s7  ;;  %v1033_v60 = vsel %vm1031_vm6, %v1016_v62, %v2157_v12 }
  0xf0   : > { %v2324_v45 = vpop.permute.xlu1 %791  ;;  %v2326_v58 = vpop.permute.xlu0 %775  ;;  %v1050_v9 = vsel %vm1048_vm7, %v1033_v60, %v2186_v31  ;;  %v2644_v60 = vld [vmem:[#allocation5_spill] sm:$0xff] }
  0xf1   : > { %v1067_v35 = vsel %vm1065_vm8, %v1050_v9, %v2244_v47  ;;  %v565_v47 = vsel %vm512_vm1, %v562_v41, %v564_v18 }
  0xf2   : > { %939 = vrot.lane.b32.xlu1 %v563_v0, %s1752_s19 }
  0xf3   : > { %923 = vrot.lane.b32.xlu0 %v1870_v20, %s1752_s19 }
  0xf4   : > { %v934_v11 = vpop.permute.xlu1 %933  ;;  %v918_v12 = vpop.permute.xlu0 %917 }
  0xf5   : > { %v1092_v2 = vsel %vm1082_vm9, %v1075_v33, %v934_v11  ;;  %v1084_v10 = vsel %vm1082_vm9, %v1067_v35, %v918_v12 }
  0xf6   : > { %753 = vrot.lane.b32.xlu1 %v560_v38, %s1748_s16  ;;  %1616 = vmatmul.mubr.msk.f32.vlgmr.msra.gmra.mrb[0].mxu1 %vm1108_vm10, %v1092_v2  ;;  %v1042_v2 = vsel %vm1031_vm6, %v2218_v34, %v2324_v45 }
  0xf7   : > { %737 = vrot.lane.b32.xlu0 %v1858_v16, %s1748_s16  ;;  %1604 = vmatmul.mubr.msk.f32.vlgmr.msra.gmra.mrb[0].mxu0 %vm1108_vm10, %v1084_v10  ;;  %v968_v16 = vsel %vm963_vm2, %v1954_v53, %v588_v32  ;;  %s1535_s16 = sshll.u32 %s401_s21, 3  ;;  %v1034_v10 = vsel %vm1031_vm6, %v2221_v55, %v2326_v58 }
  0xf8   : > { %v606_v31 = vpop.permute.xlu1 %605  ;;  %v590_v44 = vpop.permute.xlu0 %589  ;;  %s403_s29 = scalar_lea.vmem %s2616_s2, %s1535_s16 }
  0xf9   : > { %v444_v52 = vld [vmem:[%s403_s29] sm:$0xff]  ;;  %v445_v36 = vld [vmem:[%s403_s29 + $0x8] sm:$0xff]  ;;  %v977_v23 = vsel %vm963_vm2, %v1964_v54, %v606_v31  ;;  %v969_v1 = vsel %vm963_vm2, %v2640_v63, %v590_v44  ;;  %v446_v5 = vld [vmem:[%s403_s29 + $0x10] sm:$0x3] }
  0xfa   : > { %799 = vrot.lane.b32.xlu1 %v563_v0, %s1749_s17  ;;  %v569_v22 = vrot.slane %v444_v52, 1  ;;  %v570_v37 = vrot.slane %v445_v36, 1  ;;  %v572_v25 = vrot.slane %v446_v5, 1  ;;  %v574_v41 = vrot.slane %v444_v52, 2  ;;  %v2643_v0 = vld [vmem:[#allocation4_spill] sm:$0xff] }
  0xfb   : > { %783 = vrot.lane.b32.xlu0 %v1870_v20, %s1749_s17  ;;  %v575_v38 = vrot.slane %v445_v36, 2  ;;  %v577_v46 = vrot.slane %v446_v5, 2 }
  0xfc   : > { %v652_v49 = vpop.permute.xlu1 %651  ;;  %v636_v50 = vpop.permute.xlu0 %635  ;;  %v573_v39 = vsel %vm471_vm0, %v570_v37, %v572_v25 }
  0xfd   : > { %v993_v3 = vsel %vm980_vm3, %v976_v48, %v652_v49  ;;  %v985_v4 = vsel %vm980_vm3, %v968_v16, %v636_v50  ;;  %v576_v17 = vsel %vm512_vm1, %v574_v41, %v575_v38  ;;  %v578_v6 = vsel %vm512_vm1, %v575_v38, %v577_v46 }
  0xfe   : > { %941 = vrot.lane.b32.xlu1 %v565_v47, %s1752_s19 }
  0xff   : > { %925 = vrot.lane.b32.xlu0 %v1877_v24, %s1752_s19 }
 0x100   : > { %v2371_v20 = vpop.permute.xlu1 %793  ;;  %v2373_v13 = vpop.permute.xlu0 %777 }
 0x102   : > { %801 = vrot.lane.b32.xlu1 %v565_v47, %s1749_s17 }
 0x103   : > { %785 = vrot.lane.b32.xlu0 %v1877_v24, %s1749_s17  ;;  %s1537_s17 = sshll.u32 %s2666_s28, 1 }
 0x104   : > { %v840_v53 = vpop.permute.xlu1 %839  ;;  %v824_v14 = vpop.permute.xlu0 %823 }
 0x105   : > { %v1059_v18 = vsel %vm1048_vm7, %v1042_v2, %v840_v53  ;;  %v1051_v31 = vsel %vm1048_vm7, %v1034_v10, %v824_v14  ;;  %v1043_v14 = vsel %vm1031_vm6, %v2297_v19, %v2371_v20  ;;  %v2645_v20 = vld [vmem:[#allocation7_spill] sm:$0xff] }
 0x106   : > { %847 = vrot.lane.b32.xlu1 %v444_v52, %s1750_s18 }
 0x107   : > { %831 = vrot.lane.b32.xlu0 %v1884_v26, %s1750_s18  ;;  %v571_v26 = vsel %vm471_vm0, %v569_v22, %v570_v37 }
 0x108   : > { %v654_v7 = vpop.permute.xlu1 %653  ;;  %v638_v24 = vpop.permute.xlu0 %637 }
 0x109   : > { %v994_v32 = vsel %vm980_vm3, %v977_v23, %v654_v7  ;;  %v986_v57 = vsel %vm980_vm3, %v969_v1, %v638_v24 }
 0x10a   : > { %849 = vrot.lane.b32.xlu1 %v445_v36, %s1750_s18  ;;  %v1035_v36 = vsel %vm1031_vm6, %v2300_v21, %v2373_v13 }
 0x10b   : > { %833 = vrot.lane.b32.xlu0 %v1890_v28, %s1750_s18  ;;  %s1538_s18 = sshll.u32 %s2660_s22, 5 }
 0x10c   : > { %v700_v27 = vpop.permute.xlu1 %699  ;;  %v684_v54 = vpop.permute.xlu0 %683 }
 0x10d   : > { %v1010_v30 = vsel %vm997_vm4, %v993_v3, %v700_v27  ;;  %v1002_v40 = vsel %vm997_vm4, %v985_v4, %v684_v54 }
 0x10e   : > { %895 = vrot.lane.b32.xlu1 %v571_v26, %s1751_s7 }
 0x10f   : > { %879 = vrot.lane.b32.xlu0 %v2641_v29, %s1751_s7 }
 0x110   : > { %v842_v15 = vpop.permute.xlu1 %841  ;;  %v826_v28 = vpop.permute.xlu0 %825 }
 0x111   : > { %v1060_v22 = vsel %vm1048_vm7, %v1043_v14, %v842_v15  ;;  %v1052_v37 = vsel %vm1048_vm7, %v1035_v36, %v826_v28 }
 0x112   : > { %897 = vrot.lane.b32.xlu1 %v573_v39, %s1751_s7 }
 0x113   : > { %881 = vrot.lane.b32.xlu0 %v2642_v59, %s1751_s7  ;;  %s413_s7 = sadd.s32 %s1538_s18, %s1537_s17 }
 0x114   : > { %v888_v51 = vpop.permute.xlu1 %887  ;;  %v872_v56 = vpop.permute.xlu0 %871  ;;  %s1539_s11 = sshll.u32 %s413_s7, 3 }
 0x115   : > { %v1076_v44 = vsel %vm1065_vm8, %v1059_v18, %v888_v51  ;;  %v1068_v47 = vsel %vm1065_vm8, %v1051_v31, %v872_v56  ;;  %s2538_s20 = scalar_lea.vmem %s2620_s6, %s1539_s11 }
 0x116   : > { %943 = vrot.lane.b32.xlu1 %v576_v17, %s1752_s19 }
 0x117   : > { %927 = vrot.lane.b32.xlu0 %v2643_v0, %s1752_s19 }
 0x118   : > { %v702_v43 = vpop.permute.xlu1 %701  ;;  %v686_v61 = vpop.permute.xlu0 %685 }
 0x119   : > { %v1011_v62 = vsel %vm997_vm4, %v994_v32, %v702_v43  ;;  %v1003_v42 = vsel %vm997_vm4, %v986_v57, %v686_v61  ;;  %v2646_v32 = vld [vmem:[#allocation8_spill] sm:$0xff] }
 0x11a   : > { %945 = vrot.lane.b32.xlu1 %v578_v6, %s1752_s19 }
 0x11b   : > { %929 = vrot.lane.b32.xlu0 %v2644_v60, %s1752_s19 }
 0x11c   : > { %v748_v8 = vpop.permute.xlu1 %747  ;;  %v732_v9 = vpop.permute.xlu0 %731 }
 0x11d   : > { %v2414_v33 = vsel %vm1014_vm5, %v1010_v30, %v748_v8  ;;  %v2417_v35 = vsel %vm1014_vm5, %v1002_v40, %v732_v9 }
 0x120   : > { %v890_v11 = vpop.permute.xlu1 %889  ;;  %v874_v12 = vpop.permute.xlu0 %873 }
 0x121   : > { %v1077_v23 = vsel %vm1065_vm8, %v1060_v22, %v890_v11  ;;  %v1069_v63 = vsel %vm1065_vm8, %v1052_v37, %v874_v12 }
 0x124   : > { %v936_v48 = vpop.permute.xlu1 %935  ;;  %v920_v16 = vpop.permute.xlu0 %919 }
 0x125   : > { %v1093_v49 = vsel %vm1082_vm9, %v1076_v44, %v936_v48  ;;  %v1085_v50 = vsel %vm1082_vm9, %v1068_v47, %v920_v16 }
 0x126   : > { %1606 = vmatprep.mubr.msk.f32.mxu0 %vm1108_vm10, %v1085_v50  ;;  %1618 = vmatprep.mubr.msk.f32.mxu1 %vm1108_vm10, %v1093_v49 }
 0x128   : > { %v608_v34 = vpop.permute.xlu1 %607  ;;  %v592_v55 = vpop.permute.xlu0 %591 }
 0x129   : > { %v978_v13 = vsel %vm963_vm2, %v2645_v20, %v608_v34  ;;  %v970_v57 = vsel %vm963_vm2, %v2646_v32, %v592_v55 }
 0x12c   : > { %v750_v45 = vpop.permute.xlu1 %749  ;;  %v734_v58 = vpop.permute.xlu0 %733 }
 0x12d   : > { %v1028_v3 = vsel %vm1014_vm5, %v1011_v62, %v750_v45  ;;  %v1020_v4 = vsel %vm1014_vm5, %v1003_v42, %v734_v58 }
 0x130   : > { %v796_v52 = vpop.permute.xlu1 %795  ;;  %v780_v53 = vpop.permute.xlu0 %779 }
 0x131   : > { %v1044_v42 = vsel %vm1031_vm6, %v2414_v33, %v796_v52  ;;  %v1036_v60 = vsel %vm1031_vm6, %v2417_v35, %v780_v53 }
 0x134   : > { %v938_v1 = vpop.permute.xlu1 %937  ;;  %v922_v5 = vpop.permute.xlu0 %921 }
 0x135   : > { %v1094_v7 = vsel %vm1082_vm9, %v1077_v23, %v938_v1  ;;  %v1086_v24 = vsel %vm1082_vm9, %v1069_v63, %v922_v5 }
 0x136   : > { %1607 = vmatmul.mubr.msk.f32.gmra.mrb[2].mxu0 %vm1108_vm10, %v1086_v24  ;;  %1619 = vmatmul.mubr.msk.f32.gmra.mrb[2].mxu1 %vm1108_vm10, %v1094_v7 }
 0x138   : > { %v2449_v19 = vpop.permute.xlu1 %609  ;;  %v2451_v21 = vpop.permute.xlu0 %593 }
 0x13c   : > { %v656_v26 = vpop.permute.xlu1 %655  ;;  %v640_v25 = vpop.permute.xlu0 %639 }
 0x13d   : > { %v995_v27 = vsel %vm980_vm3, %v978_v13, %v656_v26  ;;  %v987_v54 = vsel %vm980_vm3, %v970_v57, %v640_v25  ;;  %v2647_v13 = vld [vmem:[#allocation9_spill] sm:$0xff]  ;;  %v2648_v25 = vld [vmem:[#allocation10_spill] sm:$0xff] }
 0x13e   : > { %v979_v32 = vsel %vm963_vm2, %v2647_v13, %v2449_v19 }
 0x140   : > { %v798_v30 = vpop.permute.xlu1 %797  ;;  %v782_v40 = vpop.permute.xlu0 %781 }
 0x141   : > { %v1045_v48 = vsel %vm1031_vm6, %v1028_v3, %v798_v30  ;;  %v1037_v16 = vsel %vm1031_vm6, %v1020_v4, %v782_v40  ;;  %v971_v30 = vsel %vm963_vm2, %v2648_v25, %v2451_v21 }
 0x144   : > { %v844_v41 = vpop.permute.xlu1 %843  ;;  %v828_v38 = vpop.permute.xlu0 %827 }
 0x145   : > { %v1061_v8 = vsel %vm1048_vm7, %v1044_v42, %v844_v41  ;;  %v1053_v9 = vsel %vm1048_vm7, %v1036_v60, %v828_v38 }
 0x148   : > { %v658_v29 = vpop.permute.xlu1 %657  ;;  %v642_v39 = vpop.permute.xlu0 %641 }
 0x149   : > { %v988_v41 = vsel %vm980_vm3, %v971_v30, %v642_v39 }
 0x14c   : > { %v704_v15 = vpop.permute.xlu1 %703  ;;  %v688_v28 = vpop.permute.xlu0 %687 }
 0x14d   : > { %v1012_v1 = vsel %vm997_vm4, %v995_v27, %v704_v15  ;;  %v1004_v7 = vsel %vm997_vm4, %v987_v54, %v688_v28  ;;  %v996_v27 = vsel %vm980_vm3, %v979_v32, %v658_v29 }
 0x150   : > { %v846_v59 = vpop.permute.xlu1 %845  ;;  %v830_v17 = vpop.permute.xlu0 %829 }
 0x151   : > { %v1062_v49 = vsel %vm1048_vm7, %v1045_v48, %v846_v59  ;;  %v1054_v50 = vsel %vm1048_vm7, %v1037_v16, %v830_v17 }
 0x154   : > { %v892_v46 = vpop.permute.xlu1 %891  ;;  %v876_v51 = vpop.permute.xlu0 %875 }
 0x155   : > { %v1078_v11 = vsel %vm1065_vm8, %v1061_v8, %v892_v46  ;;  %v1070_v2 = vsel %vm1065_vm8, %v1053_v9, %v876_v51 }
 0x158   : > { %v706_v56 = vpop.permute.xlu1 %705 }
 0x159   : > { %v690_v0 = vpop.permute.xlu0 %689  ;;  %v1013_v38 = vsel %vm997_vm4, %v996_v27, %v706_v56 }
 0x15a   : > { %v1005_v59 = vsel %vm997_vm4, %v988_v41, %v690_v0 }
 0x15c   : > { %v752_v6 = vpop.permute.xlu1 %751 }
 0x15d   : > { %v736_v43 = vpop.permute.xlu0 %735  ;;  %v1029_v24 = vsel %vm1014_vm5, %v1012_v1, %v752_v6 }
 0x15e   : > { %v1021_v57 = vsel %vm1014_vm5, %v1004_v7, %v736_v43 }
 0x160   : > { %v894_v61 = vpop.permute.xlu1 %893 }
 0x161   : > { %v878_v62 = vpop.permute.xlu0 %877  ;;  %v1079_v34 = vsel %vm1065_vm8, %v1062_v49, %v894_v61 }
 0x162   : > { %v1071_v45 = vsel %vm1065_vm8, %v1054_v50, %v878_v62 }
 0x164   : > { %v940_v12 = vpop.permute.xlu1 %939 }
 0x165   : > { %v1095_v10 = vsel %vm1082_vm9, %v1078_v11, %v940_v12  ;;  %v924_v18 = vpop.permute.xlu0 %923  ;;  %v2523_v11 = vld [vmem:[%s2618_s4] ss:$0 sm:$0xff] }
 0x166   : > { %v1087_v31 = vsel %vm1082_vm9, %v1070_v2, %v924_v18  ;;  %1621 = vmatprep.mubr.msk.f32.mxu1 %vm1108_vm10, %v1095_v10  ;;  %v2528_v12 = vld [vmem:[%s2619_s5] ss:$0 sm:$0xff] }
 0x167   : > { %1609 = vmatprep.mubr.msk.f32.mxu0 %vm1108_vm10, %v1087_v31 }
 0x168   : > { %v754_v33 = vpop.permute.xlu1 %753 }
 0x169   : > { %v738_v35 = vpop.permute.xlu0 %737  ;;  %v1030_v17 = vsel %vm1014_vm5, %v1013_v38, %v754_v33 }
 0x16a   : > { %v1022_v51 = vsel %vm1014_vm5, %v1005_v59, %v738_v35 }
 0x16c   : > { %v800_v44 = vpop.permute.xlu1 %799 }
 0x16d   : > { %v784_v47 = vpop.permute.xlu0 %783  ;;  %v1046_v26 = vsel %vm1031_vm6, %v1029_v24, %v800_v44 }
 0x16e   : > { %v1038_v40 = vsel %vm1031_vm6, %v1021_v57, %v784_v47 }
 0x170   : > { %v942_v55 = vpop.permute.xlu1 %941 }
 0x171   : > { %v1096_v58 = vsel %vm1082_vm9, %v1079_v34, %v942_v55  ;;  %v926_v52 = vpop.permute.xlu0 %925 }
 0x172   : > { %v1088_v53 = vsel %vm1082_vm9, %v1071_v45, %v926_v52  ;;  %1622 = vmatmul.mubr.msk.f32.gmra.mrb[4].mxu1 %vm1108_vm10, %v1096_v58 }
 0x173   : > { %1610 = vmatmul.mubr.msk.f32.gmra.mrb[4].mxu0 %vm1108_vm10, %v1088_v53 }
 0x174   : > { %v802_v3 = vpop.permute.xlu1 %801 }
 0x175   : > { %v786_v4 = vpop.permute.xlu0 %785  ;;  %v1047_v39 = vsel %vm1031_vm6, %v1030_v17, %v802_v3 }
 0x176   : > { %v1039_v0 = vsel %vm1031_vm6, %v1022_v51, %v786_v4 }
 0x178   : > { %v848_v14 = vpop.permute.xlu1 %847 }
 0x179   : > { %v832_v36 = vpop.permute.xlu0 %831  ;;  %v1063_v54 = vsel %vm1048_vm7, %v1046_v26, %v848_v14 }
 0x17a   : > { %v1055_v19 = vsel %vm1048_vm7, %v1038_v40, %v832_v36 }
 0x17c   : > { %v850_v22 = vpop.permute.xlu1 %849 }
 0x17d   : > { %v834_v37 = vpop.permute.xlu0 %833  ;;  %v1064_v6 = vsel %vm1048_vm7, %v1047_v39, %v850_v22 }
 0x17e   : > { %v1056_v43 = vsel %vm1048_vm7, %v1039_v0, %v834_v37 }
 0x180   : > { %v896_v23 = vpop.permute.xlu1 %895 }
 0x181   : > { %v880_v63 = vpop.permute.xlu0 %879  ;;  %v1080_v15 = vsel %vm1065_vm8, %v1063_v54, %v896_v23 }
 0x182   : > { %v1072_v21 = vsel %vm1065_vm8, %v1055_v19, %v880_v63 }
 0x184   : > { %v898_v5 = vpop.permute.xlu1 %897 }
 0x185   : > { %v882_v20 = vpop.permute.xlu0 %881  ;;  %v1081_v61 = vsel %vm1065_vm8, %v1064_v6, %v898_v5 }
 0x186   : > { %v1073_v42 = vsel %vm1065_vm8, %v1056_v43, %v882_v20 }
 0x188   : > { %v944_v28 = vpop.permute.xlu1 %943 }
 0x189   : > { %v1097_v29 = vsel %vm1082_vm9, %v1080_v15, %v944_v28  ;;  %v928_v46 = vpop.permute.xlu0 %927 }
 0x18a   : > { %v1089_v56 = vsel %vm1082_vm9, %v1072_v21, %v928_v46  ;;  %1624 = vmatprep.mubr.msk.f32.mxu1 %vm1108_vm10, %v1097_v29 }
 0x18b   : > { %1612 = vmatprep.mubr.msk.f32.mxu0 %vm1108_vm10, %v1089_v56 }
 0x18c   : > { %v946_v62 = vpop.permute.xlu1 %945 }
 0x18d   : > { %v1098_v60 = vsel %vm1082_vm9, %v1081_v61, %v946_v62  ;;  %v930_v8 = vpop.permute.xlu0 %929 }
 0x18e   : > { %v1090_v9 = vsel %vm1082_vm9, %v1073_v42, %v930_v8  ;;  %1625 = vmatmul.mubr.msk.f32.gmra.mrb[6].mxu1 %vm1108_vm10, %v1098_v60 }
 0x18f   : > { %1613 = vmatmul.mubr.msk.f32.gmra.mrb[6].mxu0 %vm1108_vm10, %v1090_v9 }
 0x1c9   : > { %v1617_v2 = vpop.f32.mrb[0].mxu1 }
 0x1ca   : > { %v1605_v10 = vpop.f32.mrb[0].mxu0  ;;  %v1318_v18 = vmul.f32 %v1617_v2, %v2523_v11  ;;  %v1263_v31 = vpop.f32.mrb[1].mxu1 }
 0x1cb   : > { %v1310_v33 = vmul.f32 %v1605_v10, %v2523_v11  ;;  %v1223_v35 = vpop.f32.mrb[1].mxu0  ;;  %v1317_v44 = vmul.f32 %v2523_v11, %v1263_v31 }
 0x1cc   : > { %v1341_v47 = vadd.f32 %v2528_v12, %v1318_v18  ;;  %v1309_v48 = vmul.f32 %v2523_v11, %v1223_v35 }
 0x1cd   : > { %v1333_v16 = vadd.f32 %v2528_v12, %v1310_v33  ;;  %v1340_v49 = vadd.f32 %v2528_v12, %v1317_v44 }
 0x1ce   : > { %v1357_v50 = vmax.f32 %v1341_v47, 0.0  ;;  %v1332_v34 = vadd.f32 %v2528_v12, %v1309_v48 }
 0x1cf   : > { %v1349_v55 = vmax.f32 %v1333_v16, 0.0  ;;  %v1356_v45 = vmax.f32 %v1340_v49, 0.0 }
 0x1d0   : > { %1373 = vst.msk [vmem:[%s2538_s20 + $0x48] sm:$0xff] %vm963_vm2, %v1357_v50  ;;  %v1348_v58 = vmax.f32 %v1332_v34, 0.0 }
 0x1d1   : > { %1365 = vst.msk [vmem:[%s2538_s20 + $0x8] sm:$0xff] %vm963_vm2, %v1349_v55  ;;  %1372 = vst.msk [vmem:[%s2538_s20 + $0x40] sm:$0xff] %vm963_vm2, %v1356_v45 }
 0x1d2   : > { %1364 = vst.msk [vmem:[%s2538_s20] sm:$0xff] %vm963_vm2, %v1348_v58 }
 0x209   : > { %v1608_v52 = vpop.f32.mrb[2].mxu0  ;;  %v1620_v53 = vpop.f32.mrb[2].mxu1 }
 0x20a   : > { %v1312_v3 = vmul.f32 %v1608_v52, %v2523_v11  ;;  %v1320_v4 = vmul.f32 %v1620_v53, %v2523_v11  ;;  %v1233_v14 = vpop.f32.mrb[3].mxu0  ;;  %v1273_v36 = vpop.f32.mrb[3].mxu1 }
 0x20b   : > { %v1311_v22 = vmul.f32 %v2523_v11, %v1233_v14  ;;  %v1319_v37 = vmul.f32 %v2523_v11, %v1273_v36 }
 0x20c   : > { %v1335_v23 = vadd.f32 %v2528_v12, %v1312_v3  ;;  %v1343_v63 = vadd.f32 %v2528_v12, %v1320_v4 }
 0x20d   : > { %v1334_v1 = vadd.f32 %v2528_v12, %v1311_v22  ;;  %v1342_v5 = vadd.f32 %v2528_v12, %v1319_v37 }
 0x20e   : > { %v1351_v7 = vmax.f32 %v1335_v23, 0.0  ;;  %v1359_v24 = vmax.f32 %v1343_v63, 0.0 }
 0x20f   : > { %v1350_v20 = vmax.f32 %v1334_v1, 0.0  ;;  %v1358_v13 = vmax.f32 %v1342_v5, 0.0 }
 0x210   : > { %1367 = vst.msk [vmem:[%s2538_s20 + $0x18] sm:$0xff] %vm963_vm2, %v1351_v7  ;;  %1375 = vst.msk [vmem:[%s2538_s20 + $0x58] sm:$0xff] %vm963_vm2, %v1359_v24 }
 0x211   : > { %1366 = vst.msk [vmem:[%s2538_s20 + $0x10] sm:$0xff] %vm963_vm2, %v1350_v20  ;;  %1374 = vst.msk [vmem:[%s2538_s20 + $0x50] sm:$0xff] %vm963_vm2, %v1358_v13 }
 0x245   : > { %v1623_v32 = vpop.f32.mrb[4].mxu1 }
 0x246   : > { %v1611_v57 = vpop.f32.mrb[4].mxu0  ;;  %v1322_v26 = vmul.f32 %v1623_v32, %v2523_v11  ;;  %v1283_v25 = vpop.f32.mrb[5].mxu1 }
 0x247   : > { %v1314_v30 = vmul.f32 %v1611_v57, %v2523_v11  ;;  %v1243_v27 = vpop.f32.mrb[5].mxu0  ;;  %v1321_v40 = vmul.f32 %v2523_v11, %v1283_v25 }
 0x248   : > { %v1345_v54 = vadd.f32 %v2528_v12, %v1322_v26  ;;  %v1313_v41 = vmul.f32 %v2523_v11, %v1243_v27 }
 0x249   : > { %v1337_v38 = vadd.f32 %v2528_v12, %v1314_v30  ;;  %v1344_v19 = vadd.f32 %v2528_v12, %v1321_v40 }
 0x24a   : > { %v1361_v15 = vmax.f32 %v1345_v54, 0.0  ;;  %v1336_v28 = vadd.f32 %v2528_v12, %v1313_v41 }
 0x24b   : > { %v1353_v59 = vmax.f32 %v1337_v38, 0.0  ;;  %v1360_v17 = vmax.f32 %v1344_v19, 0.0 }
 0x24c   : > { %1377 = vst.msk [vmem:[%s2538_s20 + $0x68] sm:$0xff] %vm963_vm2, %v1361_v15  ;;  %v1352_v21 = vmax.f32 %v1336_v28, 0.0 }
 0x24d   : > { %1369 = vst.msk [vmem:[%s2538_s20 + $0x28] sm:$0xff] %vm963_vm2, %v1353_v59  ;;  %1376 = vst.msk [vmem:[%s2538_s20 + $0x60] sm:$0xff] %vm963_vm2, %v1360_v17 }
 0x24e   : > { %1368 = vst.msk [vmem:[%s2538_s20 + $0x20] sm:$0xff] %vm963_vm2, %v1352_v21 }
 0x261   : > { %v1626_v29 = vpop.f32.mrb[6].mxu1 }
 0x262   : > { %v1614_v46 = vpop.f32.mrb[6].mxu0  ;;  %v1324_v51 = vmul.f32 %v1626_v29, %v2523_v11  ;;  %v1293_v39 = vpop.f32.mrb[7].mxu1 }
 0x263   : > { %v1316_v56 = vmul.f32 %v1614_v46, %v2523_v11  ;;  %v1253_v0 = vpop.f32.mrb[7].mxu0  ;;  %v1323_v6 = vmul.f32 %v2523_v11, %v1293_v39 }
 0x264   : > { %v1347_v43 = vadd.f32 %v2528_v12, %v1324_v51  ;;  %v1315_v61 = vmul.f32 %v2523_v11, %v1253_v0 }
 0x265   : > { %v1339_v62 = vadd.f32 %v2528_v12, %v1316_v56  ;;  %v1346_v42 = vadd.f32 %v2528_v12, %v1323_v6 }
 0x266   : > { %v1363_v60 = vmax.f32 %v1347_v43, 0.0  ;;  %v1338_v8 = vadd.f32 %v2528_v12, %v1315_v61 }
 0x267   : > { %v1355_v9 = vmax.f32 %v1339_v62, 0.0  ;;  %v1362_v2 = vmax.f32 %v1346_v42, 0.0 }
 0x268   : > { %1379 = vst.msk [vmem:[%s2538_s20 + $0x78] sm:$0xff] %vm963_vm2, %v1363_v60  ;;  %v1354_v10 = vmax.f32 %v1338_v8, 0.0 }
 0x269   : > { %1371 = vst.msk [vmem:[%s2538_s20 + $0x38] sm:$0xff] %vm963_vm2, %v1355_v9  ;;  %1378 = vst.msk [vmem:[%s2538_s20 + $0x70] sm:$0xff] %vm963_vm2, %v1362_v2 }
 0x26a   : > { %1370 = vst.msk [vmem:[%s2538_s20 + $0x30] sm:$0xff] %vm963_vm2, %v1354_v10 }
 0x26b PF: > { %s16_s25 = sadd.s32 1, %s1743_s25   ;;  %s2649_s21 = smov %s1735_s23 }
 0x26c   : > { %p13_p10 = scmp.ge.s32.totalorder %s16_s25, 6   ;;  %s2650_s22 = smov %s1739_s24 }
 0x26d   : > { %s2651_s23 = smov %s2654_s26  ;;  %s2652_s24 = smov %s2658_s27 }
 0x26e   :  { %15 = sbr.rel (!%p13_p10) target bundleno = 3 (0x3), region = 80 }

// kernel: up_forward.4
= control target key start
LH: loop header
LB: loop body
LE: loop exit
PB: predicated region body
PF: predicated region fallthrough
CT: control target
= control target key end

     0   :  { %s2474_s30 = smov 0   ;;  %s2476_s10 = smov 0   ;;  %s3442_s0 = inlined_call_operand.vmem [shape: f32[2,18,18,8], index: 0, kind: input, shape index: {}, may-alias: {0,1,2}]   ;;  %s3443_s1 = inlined_call_operand.vmem [shape: f32[2,18,18,8], index: 1, kind: input, shape index: {}, may-alias: {0,1,2}]   ;;  %s3444_s2 = inlined_call_operand.vmem [shape: f32[2,18,18,8], index: 2, kind: input, shape index: {}, may-alias: {0,1,2}]   ;;  %s3445_s3 = inlined_call_operand.vmem [shape: f32[2,18,18,8], index: 3, kind: input, shape index: {}, may-alias: {3,4,5}]   ;;  %s3446_s4 = inlined_call_operand.vmem [shape: f32[2,18,18,8], index: 4, kind: input, shape index: {}, may-alias: {3,4,5}]   ;;  %s3447_s5 = inlined_call_operand.vmem [shape: f32[2,18,18,8], index: 5, kind: input, shape index: {}, may-alias: {3,4,5}]   ;;  %s3448_s6 = inlined_call_operand.vmem [shape: f32[144,8], index: 6, kind: input, shape index: {}]   ;;  %s3449_s7 = inlined_call_operand.vmem [shape: f32[1,8], index: 7, kind: input, shape index: {}]   ;;  %s3450_s8 = inlined_call_operand.vmem [shape: f32[1,8], index: 8, kind: input, shape index: {}]   ;;  %s3451_s9 = inlined_call_operand.vmem [shape: f32[2,16,16,8], index: 9, kind: output, shape index: {}]  }
   0x1   :  { %s2478_s11 = smov 0   ;;  %s2480_s12 = smov 0  }
   0x2   :  { %s2482_s13 = smov 0  }
   0x3 LB: > { %s28_s14 = sadd.s32 1, %s2405_s11  ;;  %s31_s15 = sadd.s32 1, %s2409_s12  ;;  %s2413_s13 = sphi %s2482_s13, %s19_s13   ;;  %s2409_s12 = sphi %s2480_s12, %s3480_s12   ;;  %s2405_s11 = sphi %s2478_s11, %s3479_s11   ;;  %s2401_s10 = sphi %s2476_s10, %s3478_s10   ;;  %s2397_s30 = sphi %s2474_s30, %s3477_s30  }
   0x4   : > { %p29_p0 = scmp.ge.s32.totalorder %s28_s14, 2  ;;  %p1945_p1 = scmp.ge.s32.totalorder %s2413_s13, 1 }
   0x5   : > { %p443_p2 = scmp.lt.s32.totalorder %s2413_s13, 5 }
   0x6   : > { %s3482_s14 = smov (%p29_p0, %s28_s14), 0  ;;  %s3484_s15 = smov (!%p29_p0, %s31_s15), %s2409_s12 }
   0x7   : > { %p444_p3 = pnand %p1945_p1, %p443_p2  ;;  %p33_p4 = scmp.ge.s32.totalorder %s3484_s15, 2 }
   0x9   : > { %s3486_s15 = smov (%p33_p4, %s3484_s15), 0  ;;  %447 = sbr.rel (%p444_p3) target bundleno = 614 (0x266), region = 56 }
  0x10   : > { %s2504_s16 = sshll.u32 %s2397_s30, 3  ;;  %p559_p5 = scmp.lt.s32.totalorder %s2401_s10, 1  ;;  %vm838_vm0 = vcmask 64512   ;;  %v2417_v52 = vmov 0.0|0.0   ;;  %v1456_v57 = vld [vmem:[%s3448_s6] sm:$0xff]  ;;  %v1457_v58 = vld [vmem:[%s3448_s6 + $0x8] sm:$0xff] }
  0x11   : > { %p561_p6 = scmp.lt.s32.totalorder %s2504_s16, 17  ;;  %s2415_s25 = smov 8   ;;  %1982 = vmatprep.subr.bf16.mxu0 %v2417_v52  ;;  %2009 = vmatprep.subr.bf16.mxu1 %v2417_v52  ;;  %v1983_v63 = vpack.c.bf16 %v1457_v58, %v1456_v57  ;;  %vm1337_vm1 = vcmask 130048   ;;  %vm934_vm2 = vcmask 1045504   ;;  %vm893_vm3 = vcmask 1046528   ;;  %v1464_v58 = vld [vmem:[%s3448_s6 + $0x40] sm:$0xff] }
  0x12   : > { %s3488_s10 = smov (!%p559_p5, %s2401_s10), 1  ;;  %s575_s26 = sadd.s32 8, %s2504_s16  ;;  %vm1354_vm4 = vcmask 261120   ;;  %vm1371_vm5 = vcmask 392192   ;;  %vm1388_vm6 = vcmask 523264   ;;  %vm1405_vm7 = vcmask 654336  }
  0x13   : > { %s562_s17 = scalar_select %p561_p6, %s2504_s16, 17  ;;  %1984 = vmatpush1.bf16.msra.mxu0 %v1983_v63  ;;  %2018 = vmatpush1.bf16.msra.mxu1 %v1983_v63  ;;  %vm1422_vm8 = vcmask 785408   ;;  %vm1439_vm9 = vcmask 916480  }
  0x14   : > { %s2511_s18 = smul.u32 54, %s3488_s10  ;;  %p578_p7 = scmp.lt.s32.totalorder %s575_s26, 17  ;;  %1985 = vmatprep.subr.bf16.mxu0 %v2417_v52  ;;  %2010 = vmatprep.subr.bf16.mxu1 %v2417_v52 }
  0x15   : > { %s2027_s19 = smul.u32 3, %s562_s17  ;;  %s588_s27 = sadd.s32 9, %s2504_s16 }
  0x16   : > { %s3490_s26 = smov (!%p578_p7, %s575_s26), 17  ;;  %p591_p8 = scmp.lt.s32.totalorder %s588_s27, 17 }
  0x17   : > { %s2514_s20 = sadd.s32 %s2511_s18, %s2027_s19  ;;  %s2029_s28 = smul.u32 3, %s3490_s26 }
  0x18   : > { %s1947_s21 = sshll.u32 %s2514_s20, 3  ;;  %s3492_s27 = smov (!%p591_p8, %s588_s27), 17 }
  0x19   : > { %s2522_s24 = scalar_lea.vmem %s3445_s3, %s1947_s21  ;;  %s2561_s29 = sadd.s32 %s2029_s28, %s2511_s18 }
  0x1a   : > { %v701_v0 = vld [vmem:[%s2522_s24 + $0x68] sm:$0xff]  ;;  %v688_v1 = vld [vmem:[%s2522_s24] sm:$0xff]  ;;  %v691_v4 = vld [vmem:[%s2522_s24 + $0x18] sm:$0xff]  ;;  %s1949_s30 = sshll.u32 %s2561_s29, 3  ;;  %s2030_s17 = smul.u32 3, %s3492_s27 }
  0x1b   : > { %v689_v2 = vld [vmem:[%s2522_s24 + $0x8] sm:$0xff]  ;;  %774 = vrot.lane.b32.xlu1 %v701_v0, %s2415_s25  ;;  %v692_v5 = vld [vmem:[%s2522_s24 + $0x20] sm:$0xff]  ;;  %v703_v9 = vld [vmem:[%s2522_s24 + $0x78] sm:$0xff]  ;;  %s631_s23 = scalar_lea.vmem %s3446_s4, %s1949_s30  ;;  %s2416_s20 = smov 48  }
  0x1c   : > { %v2080_v3 = vpack.i.bf16 %v689_v2, %v688_v1  ;;  %v2085_v6 = vpack.i.bf16 %v692_v5, %v691_v4  ;;  %v700_v7 = vld [vmem:[%s2522_s24 + $0x60] sm:$0xff]  ;;  %v690_v10 = vld [vmem:[%s2522_s24 + $0x10] sm:$0x3]  ;;  %v693_v11 = vld [vmem:[%s2522_s24 + $0x28] sm:$0x3]  ;;  %s2578_s26 = sadd.s32 %s2030_s17, %s2511_s18  ;;  %s2606_s17 = scalar_lea.vmem %s3442_s0, %s1947_s21 }
  0x1d   : > { %v704_v8 = vld [vmem:[%s2522_s24 + $0x80] sm:$0xff]  ;;  %v702_v12 = vld [vmem:[%s2522_s24 + $0x70] sm:$0x3]  ;;  %v2090_v13 = vpack.i.bf16 %v693_v11, %v690_v10  ;;  %v695_v14 = vld [vmem:[%s2522_s24 + $0x38] sm:$0xff]  ;;  %s1951_s27 = sshll.u32 %s2578_s26, 3  ;;  %s2418_s21 = smov 96  }
  0x1e   : > { %2081 = vrot.lane.b32.xlu0 %v2080_v3, %s2415_s25  ;;  %v694_v15 = vld [vmem:[%s2522_s24 + $0x30] sm:$0xff]  ;;  %v707_v16 = vld [vmem:[%s2522_s24 + $0x98] sm:$0xff]  ;;  %v696_v18 = vld [vmem:[%s2522_s24 + $0x40] sm:$0x3]  ;;  %s644_s22 = scalar_lea.vmem %s3447_s5, %s1951_s27  ;;  %s2869_s18 = scalar_lea.vmem %s3444_s2, %s1951_s27 }
  0x1f   : > { %2086 = vrot.lane.b32.xlu1 %v2085_v6, %s2415_s25  ;;  %v706_v17 = vld [vmem:[%s2522_s24 + $0x90] sm:$0xff]  ;;  %v705_v19 = vld [vmem:[%s2522_s24 + $0x88] sm:$0x3]  ;;  %v708_v21 = vld [vmem:[%s2522_s24 + $0xa0] sm:$0x3]  ;;  %s2419_s29 = smov 32  }
  0x20   : > { %v697_v20 = vld [vmem:[%s2522_s24 + $0x48] sm:$0xff]  ;;  %v698_v23 = vld [vmem:[%s2522_s24 + $0x50] sm:$0xff]  ;;  %v699_v24 = vld [vmem:[%s2522_s24 + $0x58] sm:$0x3]  ;;  %s2421_s26 = smov 64   ;;  %p650_p9 = scmp.lt.s32.totalorder %s2504_s16, 15 }
  0x21   : > { %v709_v22 = vld [vmem:[%s2522_s24 + $0xa8] sm:$0xff]  ;;  %v710_v25 = vld [vmem:[%s2522_s24 + $0xb0] sm:$0xff]  ;;  %v712_v26 = vld [vmem:[%s631_s23] sm:$0xff] }
  0x22   : > { %772 = vrot.lane.b32.xlu0 %v700_v7, %s2415_s25  ;;  %v711_v27 = vld [vmem:[%s2522_s24 + $0xb8] sm:$0x3]  ;;  %v714_v28 = vld [vmem:[%s631_s23 + $0x10] sm:$0x3]  ;;  %v713_v29 = vld [vmem:[%s631_s23 + $0x8] sm:$0xff]  ;;  %s2422_s23 = smov 80  }
  0x23   : > { %780 = vrot.lane.b32.xlu1 %v704_v8, %s2415_s25  ;;  %v716_v30 = vld [vmem:[%s644_s22 + $0x8] sm:$0xff]  ;;  %v715_v31 = vld [vmem:[%s644_s22] sm:$0xff]  ;;  %v717_v32 = vld [vmem:[%s644_s22 + $0x10] sm:$0x3]  ;;  %s3494_s16 = smov (!%p650_p9, %s2504_s16), 15 }
  0x24   : > { %v661_v38 = vld [vmem:[%s2606_s17 + $0x18] sm:$0xff]  ;;  %v674_v41 = vld [vmem:[%s2606_s17 + $0x80] sm:$0xff]  ;;  %v664_v55 = vld [vmem:[%s2606_s17 + $0x30] sm:$0xff] }
  0x25   : > { %v673_v40 = vld [vmem:[%s2606_s17 + $0x78] sm:$0xff]  ;;  %v662_v46 = vld [vmem:[%s2606_s17 + $0x20] sm:$0xff]  ;;  %v676_v1 = vld [vmem:[%s2606_s17 + $0x90] sm:$0xff] }
  0x26   : > { %778 = vrot.lane.b32.xlu0 %v703_v9, %s2415_s25  ;;  %v665_v51 = vld [vmem:[%s2606_s17 + $0x38] sm:$0xff]  ;;  %v1458_v9 = vld [vmem:[%s3448_s6 + $0x10] sm:$0xff] }
  0x27   : > { %776 = vrot.lane.b32.xlu1 %v702_v12, %s2415_s25  ;;  %v677_v61 = vld [vmem:[%s2606_s17 + $0x98] sm:$0xff]  ;;  %v658_v12 = vld [vmem:[%s2606_s17] sm:$0xff]  ;;  %v668_v57 = vld [vmem:[%s2606_s17 + $0x50] sm:$0xff] }
  0x28   : > { %v1459_v10 = vld [vmem:[%s3448_s6 + $0x18] sm:$0xff] }
  0x2a   : > { %2091 = vrot.lane.b32.xlu0 %v2090_v13, %s2415_s25 }
  0x2b   : > { %762 = vrot.lane.b32.xlu1 %v695_v14, %s2415_s25  ;;  %v659_v14 = vld [vmem:[%s2606_s17 + $0x8] sm:$0xff] }
  0x2e   : > { %760 = vrot.lane.b32.xlu0 %v694_v15, %s2415_s25  ;;  %v670_v15 = vld [vmem:[%s2606_s17 + $0x60] sm:$0xff] }
  0x2f   : > { %786 = vrot.lane.b32.xlu1 %v707_v16, %s2415_s25 }
  0x32   : > { %784 = vrot.lane.b32.xlu0 %v706_v17, %s2415_s25 }
  0x33   : > { %764 = vrot.lane.b32.xlu1 %v696_v18, %s2415_s25 }
  0x36   : > { %782 = vrot.lane.b32.xlu0 %v705_v19, %s2415_s25 }
  0x37   : > { %766 = vrot.lane.b32.xlu1 %v697_v20, %s2415_s25  ;;  %v1986_v20 = vpack.c.bf16 %v1459_v10, %v1458_v9  ;;  %v672_v9 = vld [vmem:[%s2606_s17 + $0x70] sm:$0x3] }
  0x39   : > { %1987 = vmatpush1.bf16.msra.mxu0 %v1986_v20  ;;  %2019 = vmatpush1.bf16.msra.mxu1 %v1986_v20  ;;  %v680_v20 = vld [vmem:[%s2606_s17 + $0xb0] sm:$0xff] }
  0x3a   : > { %788 = vrot.lane.b32.xlu0 %v708_v21, %s2415_s25  ;;  %v1460_v21 = vld [vmem:[%s3448_s6 + $0x20] sm:$0xff]  ;;  %1988 = vmatprep.subr.bf16.mxu0 %v2417_v52 }
  0x3b   : > { %790 = vrot.lane.b32.xlu1 %v709_v22, %s2415_s25  ;;  %v1461_v22 = vld [vmem:[%s3448_s6 + $0x28] sm:$0xff]  ;;  %2011 = vmatprep.subr.bf16.mxu1 %v2417_v52 }
  0x3e   : > { %768 = vrot.lane.b32.xlu0 %v698_v23, %s2415_s25  ;;  %v671_v23 = vld [vmem:[%s2606_s17 + $0x68] sm:$0xff] }
  0x3f   : > { %770 = vrot.lane.b32.xlu1 %v699_v24, %s2415_s25 }
  0x42   : > { %792 = vrot.lane.b32.xlu0 %v710_v25, %s2415_s25 }
  0x43   : > { %796 = vrot.lane.b32.xlu1 %v712_v26, %s2415_s25 }
  0x46   : > { %794 = vrot.lane.b32.xlu0 %v711_v27, %s2415_s25 }
  0x47   : > { %800 = vrot.lane.b32.xlu1 %v714_v28, %s2415_s25 }
  0x4a   : > { %798 = vrot.lane.b32.xlu0 %v713_v29, %s2415_s25 }
  0x4b   : > { %804 = vrot.lane.b32.xlu1 %v716_v30, %s2415_s25  ;;  %v1989_v30 = vpack.c.bf16 %v1461_v22, %v1460_v21 }
  0x4d   : > { %1990 = vmatpush1.bf16.msra.mxu0 %v1989_v30  ;;  %2020 = vmatpush1.bf16.msra.mxu1 %v1989_v30 }
  0x4e   : > { %802 = vrot.lane.b32.xlu0 %v715_v31, %s2415_s25  ;;  %1991 = vmatprep.subr.bf16.mxu0 %v2417_v52 }
  0x4f   : > { %2012 = vmatprep.subr.bf16.mxu1 %v2417_v52 }
  0x52   : > { %806 = vrot.lane.b32.xlu0 %v717_v32, %s2415_s25  ;;  %s2782_s25 = scalar_lea.vmem %s3443_s1, %s1949_s30  ;;  %s2420_s30 = smov 16  }
  0x8d   : > { %v2595_v33 = vpop.permute.xlu1 %774 }
  0x8e   : > { %v2719_v31 = vsel %vm838_vm0, %v671_v23, %v2595_v33 }
  0x90   : > { %v2597_v34 = vpop.permute.xlu0 %2081 }
  0x91   : > { %v2087_v35 = vpop.permute.xlu1 %2086  ;;  %v2083_v5 = vunpack.i.l.bf16 %v2597_v34  ;;  %v2084_v11 = vunpack.i.h.bf16 %v2597_v34  ;;  %v1462_v34 = vld [vmem:[%s3448_s6 + $0x30] sm:$0xff] }
  0x92   : > { %v2088_v37 = vunpack.i.l.bf16 %v2087_v35  ;;  %v2089_v43 = vunpack.i.h.bf16 %v2087_v35  ;;  %v1463_v35 = vld [vmem:[%s3448_s6 + $0x38] sm:$0xff] }
  0x93   : > { %v2697_v24 = vsel %vm838_vm0, %v658_v12, %v2083_v5  ;;  %v2708_v27 = vsel %vm838_vm0, %v659_v14, %v2084_v11 }
  0x94   : > { %v2599_v36 = vpop.permute.xlu0 %772  ;;  %v2612_v44 = vsel %vm838_vm0, %v661_v38, %v2088_v37  ;;  %v2631_v53 = vsel %vm838_vm0, %v662_v46, %v2089_v43  ;;  %v894_v32 = vrot.slane %v2697_v24, 1  ;;  %v935_v37 = vrot.slane %v2697_v24, 2 }
  0x95   : > { %v781_v39 = vpop.permute.xlu1 %780  ;;  %v2712_v28 = vsel %vm838_vm0, %v670_v15, %v2599_v36  ;;  %v895_v36 = vrot.slane %v2708_v27, 1  ;;  %v936_v33 = vrot.slane %v2708_v27, 2  ;;  %v956_v43 = vrot.slane %v2719_v31, 2 }
  0x96   : > { %v2623_v49 = vsel %vm838_vm0, %v674_v41, %v781_v39  ;;  %v955_v38 = vrot.slane %v2712_v28, 2  ;;  %v667_v39 = vld [vmem:[%s2606_s17 + $0x48] sm:$0xff]  ;;  %v899_v10 = vrot.slane %v2612_v44, 1  ;;  %v3458_v11 = vrot.slane %v2631_v53, 1 }
  0x97   : > { %v2105_v56 = vpack.i.bf16 %v2623_v49, %v2631_v53  ;;  %v679_v41 = vld [vmem:[%s2606_s17 + $0xa8] sm:$0xff]  ;;  %v940_v12 = vrot.slane %v2612_v44, 2  ;;  %v3457_v14 = vrot.slane %v2623_v49, 2 }
  0x98   : > { %v779_v42 = vpop.permute.xlu0 %778  ;;  %v2769_v5 = vsel %vm934_vm2, %v955_v38, %v956_v43 }
  0x99   : > { %v2615_v45 = vsel %vm838_vm0, %v673_v40, %v779_v42  ;;  %v2618_v47 = vpop.permute.xlu1 %776  ;;  %v915_v42 = vrot.slane %v2719_v31, 1 }
  0x9a   : > { %v2095_v48 = vpack.i.bf16 %v2615_v45, %v2612_v44  ;;  %v919_v15 = vrot.slane %v2615_v45, 1 }
  0x9c   : > { %v2625_v50 = vpop.permute.xlu0 %2091  ;;  %2096 = vrot.lane.b32.xlu1 %v2095_v48, %s2416_s20  ;;  %v1992_v48 = vpack.c.bf16 %v1463_v35, %v1462_v34  ;;  %v1467_v34 = vld [vmem:[%s3448_s6 + $0x58] sm:$0xff]  ;;  %v960_v35 = vrot.slane %v2615_v45, 2 }
  0x9d   : > { %v763_v54 = vpop.permute.xlu1 %762 }
  0x9e   : > { %v2644_v59 = vsel %vm838_vm0, %v665_v51, %v763_v54  ;;  %v914_v51 = vrot.slane %v2712_v28, 1  ;;  %v2093_v54 = vunpack.i.l.bf16 %v2625_v50  ;;  %1993 = vmatpush1.bf16.msra.mxu0 %v1992_v48  ;;  %2021 = vmatpush1.bf16.msra.mxu1 %v1992_v48 }
  0x9f   : > { %v3453_v3 = vrot.slane %v2644_v59, 2  ;;  %1994 = vmatprep.subr.bf16.mxu0 %v2417_v52  ;;  %2013 = vmatprep.subr.bf16.mxu1 %v2417_v52 }
  0xa0   : > { %v761_v60 = vpop.permute.xlu0 %760  ;;  %2106 = vrot.lane.b32.xlu1 %v2105_v56, %s2416_s20  ;;  %v2807_v30 = vsel %vm893_vm3, %v914_v51, %v915_v42  ;;  %v901_v51 = vsel %vm893_vm3, %v899_v10, %v3458_v11 }
  0xa1   : > { %v2649_v62 = vsel %vm838_vm0, %v664_v55, %v761_v60  ;;  %v787_v0 = vpop.permute.xlu1 %786  ;;  %v1465_v60 = vld [vmem:[%s3448_s6 + $0x48] sm:$0xff] }
  0xa2   : > { %3463 = vst [vmem:[#allocation2_spill] sm:$0xff] %v2649_v62  ;;  %v945_v2 = vrot.slane %v2649_v62, 2  ;;  %v2655_v4 = vsel %vm838_vm0, %v677_v61, %v787_v0  ;;  %v660_v61 = vld [vmem:[%s2606_s17 + $0x10] sm:$0x3]  ;;  %v669_v0 = vld [vmem:[%s2606_s17 + $0x58] sm:$0x3]  ;;  %v1995_v21 = vpack.c.bf16 %v1465_v60, %v1464_v58 }
  0xa3   : > { %v2110_v8 = vpack.i.bf16 %v2655_v4, %v2644_v59  ;;  %v3454_v19 = vrot.slane %v2655_v4, 2  ;;  %v2797_v22 = vsel %vm838_vm0, %v660_v61, %v2093_v54  ;;  %v3456_v54 = vrot.slane %v2631_v53, 2  ;;  %v681_v58 = vld [vmem:[%s2606_s17 + $0xb8] sm:$0x3] }
  0xa4   : > { %v785_v6 = vpop.permute.xlu0 %784  ;;  %v2661_v7 = vsel %vm934_vm2, %v945_v2, %v3453_v3  ;;  %v2764_v2 = vsel %vm934_vm2, %v935_v37, %v936_v33  ;;  %v853_v37 = vsel %vm838_vm0, %v672_v9, %v2618_v47  ;;  %v897_v47 = vrot.slane %v2797_v22, 1  ;;  %1996 = vmatpush1.bf16.msra.mxu0 %v1995_v21  ;;  %2022 = vmatpush1.bf16.msra.mxu1 %v1995_v21 }
  0xa5   : > { %v2675_v13 = vsel %vm838_vm0, %v676_v1, %v785_v6  ;;  %1962 = vmatprep.mubr.msk.f32.mxu0 %vm1337_vm1, %v2661_v7  ;;  %v2681_v16 = vpop.permute.xlu1 %764  ;;  %2111 = vrot.lane.b32.xlu1 %v2110_v8, %s2418_s21  ;;  %v2774_v6 = vsel %vm893_vm3, %v894_v32, %v895_v36  ;;  %v1466_v32 = vld [vmem:[%s3448_s6 + $0x50] sm:$0xff]  ;;  %v938_v21 = vrot.slane %v2797_v22, 2  ;;  %v683_v22 = vld [vmem:[%s2782_s25 + $0x8] sm:$0xff] }
  0xa6   : > { %3464 = vst [vmem:[#allocation3_spill] sm:$0xff] %v2675_v13  ;;  %v2100_v17 = vpack.i.bf16 %v2675_v13, %v2649_v62  ;;  %v965_v18 = vrot.slane %v2675_v13, 2  ;;  %1997 = vmatprep.subr.bf16.mxu0 %v2417_v52  ;;  %2014 = vmatprep.subr.bf16.mxu1 %v2417_v52 }
  0xa8   : > { %v2699_v25 = vpop.permute.xlu0 %782  ;;  %2101 = vrot.lane.b32.xlu0 %v2100_v17, %s2418_s21  ;;  %v2705_v26 = vsel %vm934_vm2, %v965_v18, %v3454_v19 }
  0xa9   : > { %1970 = vmatprep.mubr.msk.f32.mxu1 %vm1337_vm1, %v2705_v26  ;;  %v767_v29 = vpop.permute.xlu1 %766  ;;  %2126 = vrot.lane.b32.xlu1 %v2110_v8, %s2416_s20  ;;  %v3459_v8 = vrot.slane %v2623_v49, 1 }
  0xaa   : > { %v2744_v55 = vsel %vm838_vm0, %v667_v39, %v767_v29  ;;  %v2155_v29 = vpack.i.bf16 %v2769_v5, %v2764_v2 }
  0xab   : > { %v2838_v61 = vsel %vm893_vm3, %v919_v15, %v3459_v8  ;;  %v958_v15 = vrot.slane %v853_v37, 2 }
  0xac   : > { %v2734_v40 = vpop.permute.xlu0 %788  ;;  %2116 = vrot.lane.b32.xlu0 %v2100_v17, %s2416_s20 }
  0xad   : > { %v791_v46 = vpop.permute.xlu1 %790 }
  0xae   : > { %v2747_v56 = vsel %vm838_vm0, %v679_v41, %v791_v46  ;;  %v682_v41 = vld [vmem:[%s2782_s25] sm:$0xff] }
  0xaf   : > { %v2120_v1 = vpack.i.bf16 %v2747_v56, %v2744_v55 }
  0xb0   : > { %v769_v63 = vpop.permute.xlu0 %768 }
  0xb1   : > { %v2792_v17 = vsel %vm838_vm0, %v668_v57, %v769_v63  ;;  %v771_v18 = vpop.permute.xlu1 %770  ;;  %2121 = vrot.lane.b32.xlu0 %v2120_v1, %s2418_s21  ;;  %v1998_v63 = vpack.c.bf16 %v1467_v34, %v1466_v32  ;;  %v684_v32 = vld [vmem:[%s2782_s25 + $0x10] sm:$0x3] }
  0xb2   : > { %v2800_v23 = vsel %vm838_vm0, %v669_v0, %v771_v18  ;;  %v3452_v46 = vrot.slane %v2792_v17, 2  ;;  %v917_v0 = vrot.slane %v853_v37, 1  ;;  %v2094_v18 = vunpack.i.h.bf16 %v2625_v50  ;;  %v663_v50 = vld [vmem:[%s2606_s17 + $0x28] sm:$0x3] }
  0xb3   : > { %v953_v38 = vrot.slane %v2800_v23, 2  ;;  %1999 = vmatpush1.bf16.msra.mxu0 %v1998_v63  ;;  %2023 = vmatpush1.bf16.msra.mxu1 %v1998_v63  ;;  %v1468_v63 = vld [vmem:[%s3448_s6 + $0x60] sm:$0xff] }
  0xb4   : > { %v793_v39 = vpop.permute.xlu0 %792  ;;  %2000 = vmatprep.subr.bf16.mxu0 %v2417_v52  ;;  %v2902_v3 = vsel %vm838_vm0, %v663_v50, %v2094_v18  ;;  %2015 = vmatprep.subr.bf16.mxu1 %v2417_v52  ;;  %v2931_v18 = vsel %vm934_vm2, %v936_v33, %v938_v21  ;;  %v924_v50 = vrot.slane %v2675_v13, 1 }
  0xb5   : > { %v2824_v48 = vsel %vm838_vm0, %v680_v20, %v793_v39  ;;  %v797_v57 = vpop.permute.xlu1 %796  ;;  %2136 = vrot.lane.b32.xlu0 %v2120_v1, %s2416_s20  ;;  %v2150_v1 = vpack.i.bf16 %v2807_v30, %v2774_v6  ;;  %v2848_v10 = vsel %vm934_vm2, %v3452_v46, %v953_v38  ;;  %v2861_v6 = vsel %vm934_vm2, %v960_v35, %v3457_v14 }
  0xb6   : > { %v2130_v60 = vpack.i.bf16 %v2824_v48, %v2792_v17  ;;  %v2841_v9 = vsel %vm838_vm0, %v682_v41, %v797_v57  ;;  %3465 = vst [vmem:[#allocation4_spill] sm:$0xff] %v2861_v6  ;;  %v2877_v38 = vpack.i.bf16 %v2838_v61, %v901_v51  ;;  %v942_v35 = vsel %vm934_vm2, %v940_v12, %v3456_v54  ;;  %v675_v51 = vld [vmem:[%s2606_s17 + $0x88] sm:$0x3] }
  0xb7   : > { %v2856_v34 = vpack.i.bf16 %v2841_v9, %v2712_v28  ;;  %v3455_v39 = vrot.slane %v2824_v48, 2  ;;  %v918_v12 = vsel %vm893_vm3, %v915_v42, %v917_v0  ;;  %v2898_v46 = vpack.i.bf16 %v2861_v6, %v942_v35 }
  0xb8   : > { %v795_v20 = vpop.permute.xlu0 %794  ;;  %2131 = vrot.lane.b32.xlu1 %v2130_v60, %s2418_s21  ;;  %v904_v0 = vrot.slane %v2649_v62, 1  ;;  %v978_v35 = vrot.slane %v2841_v9, 1  ;;  %v2944_v33 = vsel %vm838_vm0, %v675_v51, %v2699_v25  ;;  %v983_v54 = vrot.slane %v2841_v9, 2 }
  0xb9   : > { %v2874_v37 = vsel %vm838_vm0, %v681_v58, %v795_v20  ;;  %v801_v57 = vpop.permute.xlu1 %800  ;;  %2146 = vrot.lane.b32.xlu0 %v2856_v34, %s2418_s21  ;;  %v2890_v58 = vsel %vm893_vm3, %v895_v36, %v897_v47  ;;  %v686_v47 = vld [vmem:[%s2869_s18 + $0x8] sm:$0xff]  ;;  %v925_v25 = vrot.slane %v2655_v4, 1 }
  0xba   : > { %v973_v41 = vrot.slane %v2874_v37, 2  ;;  %v865_v20 = vsel %vm838_vm0, %v684_v32, %v801_v57  ;;  %v2909_v32 = vsel %vm934_vm2, %v956_v43, %v958_v15  ;;  %v2165_v15 = vpack.i.bf16 %v918_v12, %v2890_v58 }
  0xbb   : > { %v981_v19 = vrot.slane %v865_v20, 1  ;;  %v986_v21 = vrot.slane %v865_v20, 2  ;;  %v1470_v20 = vld [vmem:[%s3448_s6 + $0x70] sm:$0xff]  ;;  %v2175_v6 = vpack.i.bf16 %v2909_v32, %v2931_v18 }
  0xbc   : > { %v799_v36 = vpop.permute.xlu0 %798  ;;  %2141 = vrot.lane.b32.xlu1 %v2130_v60, %s2416_s20  ;;  %v2914_v42 = vsel %vm934_vm2, %v3455_v39, %v973_v41  ;;  %v1469_v60 = vld [vmem:[%s3448_s6 + $0x68] sm:$0xff] }
  0xbd   : > { %v2925_v43 = vsel %vm838_vm0, %v683_v22, %v799_v36  ;;  %v805_v39 = vpop.permute.xlu1 %804  ;;  %2156 = vrot.lane.b32.xlu0 %v2155_v29, %s2419_s29  ;;  %v685_v22 = vld [vmem:[%s2869_s18] sm:$0xff]  ;;  %v2001_v36 = vpack.c.bf16 %v1469_v60, %v1468_v63  ;;  %v905_v63 = vrot.slane %v2644_v59, 1  ;;  %v922_v60 = vrot.slane %v2944_v33, 1 }
  0xbe   : > { %v979_v41 = vrot.slane %v2925_v43, 1  ;;  %v984_v57 = vrot.slane %v2925_v43, 2  ;;  %v2947_v58 = vsel %vm838_vm0, %v686_v47, %v805_v39 }
  0xbf   : > { %v992_v14 = vrot.slane %v2947_v58, 1  ;;  %2002 = vmatpush1.bf16.msra.mxu0 %v2001_v36  ;;  %2024 = vmatpush1.bf16.msra.mxu1 %v2001_v36  ;;  %v906_v62 = vsel %vm893_vm3, %v904_v0, %v905_v63  ;;  %v3466_v0 = vrot.slane %v2623_v49, 1 }
  0xc0   : > { %v803_v11 = vpop.permute.xlu0 %802  ;;  %2151 = vrot.lane.b32.xlu1 %v2150_v1, %s2420_s30  ;;  %v980_v2 = vsel %vm893_vm3, %v978_v35, %v979_v41  ;;  %v982_v29 = vsel %vm893_vm3, %v979_v41, %v981_v19  ;;  %v1471_v1 = vld [vmem:[%s3448_s6 + $0x78] sm:$0xff]  ;;  %v997_v19 = vrot.slane %v2947_v58, 2  ;;  %v2981_v35 = vsel %vm934_vm2, %v984_v57, %v986_v21  ;;  %2003 = vmatprep.subr.bf16.mxu0 %v2417_v52  ;;  %v1472_v41 = vld [vmem:[%s3448_s6 + $0x80] sm:$0xff] }
  0xc1   : > { %v2956_v51 = vsel %vm838_vm0, %v685_v22, %v803_v11  ;;  %v2958_v39 = vpack.i.bf16 %v982_v29, %v918_v12  ;;  %v2961_v9 = vpack.i.bf16 %v980_v2, %v2807_v30  ;;  %2161 = vrot.lane.b32.xlu0 %v2877_v38, %s2421_s26  ;;  %v687_v30 = vld [vmem:[%s2869_s18 + $0x10] sm:$0x3]  ;;  %v2976_v12 = vsel %vm934_vm2, %v983_v54, %v984_v57  ;;  %v1473_v22 = vld [vmem:[%s3448_s6 + $0x88] sm:$0xff]  ;;  %v678_v29 = vld [vmem:[%s2606_s17 + $0xa0] sm:$0x3] }
  0xc2   : > { %v991_v47 = vrot.slane %v2956_v51, 1  ;;  %v996_v11 = vrot.slane %v2956_v51, 2  ;;  %v902_v54 = vrot.slane %v2902_v3, 1  ;;  %v926_v57 = vsel %vm893_vm3, %v924_v50, %v925_v25  ;;  %2016 = vmatprep.subr.bf16.mxu1 %v2417_v52 }
  0xc3   : > { %v2004_v2 = vpack.c.bf16 %v1471_v1, %v1470_v20  ;;  %v666_v1 = vld [vmem:[%s2606_s17 + $0x40] sm:$0x3]  ;;  %v2180_v18 = vpack.i.bf16 %v926_v57, %v906_v62  ;;  %s2423_s17 = smov 112  }
  0xc4   : > { %v807_v36 = vpop.permute.xlu0 %806  ;;  %2166 = vrot.lane.b32.xlu1 %v2165_v15, %s2420_s30  ;;  %v2996_v21 = vsel %vm893_vm3, %v991_v47, %v992_v14  ;;  %v2007_v47 = vpack.c.bf16 %v1473_v22, %v1472_v41  ;;  %v3009_v20 = vsel %vm934_vm2, %v996_v11, %v997_v19 }
  0xc5   : > { %v868_v8 = vsel %vm838_vm0, %v687_v30, %v807_v36  ;;  %v2350_v15 = vpack.i.bf16 %v2996_v21, %v2838_v61  ;;  %2171 = vrot.lane.b32.xlu0 %v2898_v46, %s2422_s23  ;;  %2005 = vmatpush1.bf16.msra.mxu0 %v2004_v2  ;;  %v963_v30 = vrot.slane %v2944_v33, 2  ;;  %v3016_v36 = vsel %vm893_vm3, %v3466_v0, %v922_v60 }
  0xc6   : > { %v994_v13 = vrot.slane %v868_v8, 1  ;;  %v999_v50 = vrot.slane %v868_v8, 2  ;;  %2025 = vmatpush1.bf16.msra.mxu1 %v2004_v2  ;;  %2006 = vmatprep.subr.bf16.mxu0 %v2417_v52  ;;  %v859_v8 = vsel %vm838_vm0, %v678_v29, %v2734_v40  ;;  %v943_v33 = vrot.slane %v2902_v3, 2 }
  0xc7   : > { %2017 = vmatprep.subr.bf16.mxu1 %v2417_v52  ;;  %v3467_v60 = vrot.slane %v2631_v53, 1  ;;  %v847_v40 = vsel %vm838_vm0, %v666_v1, %v2681_v16  ;;  %v968_v1 = vrot.slane %v859_v8, 2 }
  0xc8   : > { %2176 = vrot.lane.b32.xlu1 %v2175_v6, %s2419_s29  ;;  %v3023_v11 = vsel %vm893_vm3, %v992_v14, %v994_v13  ;;  %v3027_v62 = vsel %vm934_vm2, %v997_v19, %v999_v50  ;;  %v927_v13 = vrot.slane %v859_v8, 1  ;;  %v3468_v14 = vrot.slane %v2623_v49, 2 }
  0xc9   : > { %v903_v41 = vsel %vm893_vm3, %v3467_v60, %v902_v54  ;;  %v2370_v22 = vpack.i.bf16 %v3023_v11, %v3016_v36  ;;  %2181 = vrot.lane.b32.xlu0 %v2180_v18, %s2423_s17  ;;  %2008 = vmatpush1.bf16.msra.mxu0 %v2007_v47  ;;  %v907_v6 = vrot.slane %v847_v40, 1  ;;  %v3469_v19 = vrot.slane %v2631_v53, 2 }
  0xca   : > { %v2185_v52 = vpack.i.bf16 %v3016_v36, %v903_v41  ;;  %v3042_v3 = vsel %vm934_vm2, %v3468_v14, %v963_v30  ;;  %2026 = vmatpush1.bf16.msra.mxu1 %v2007_v47  ;;  %v928_v57 = vsel %vm893_vm3, %v925_v25, %v927_v13  ;;  %v930_v50 = vrot.slane %v2824_v48, 1 }
  0xcb   : > { %v944_v16 = vsel %vm934_vm2, %v3469_v19, %v943_v33  ;;  %v908_v2 = vsel %vm893_vm3, %v905_v63, %v907_v6  ;;  %v910_v47 = vrot.slane %v2792_v17, 1  ;;  %v2220_v25 = vpack.i.bf16 %v2705_v26, %v2661_v7 }
  0xcc   : > { %2186 = vrot.lane.b32.xlu1 %v2185_v52, %s2421_s26  ;;  %v2195_v54 = vpack.i.bf16 %v3042_v3, %v944_v16  ;;  %v2205_v29 = vpack.i.bf16 %v928_v57, %v908_v2  ;;  %v909_v63 = vrot.slane %v2744_v55, 1  ;;  %v948_v33 = vrot.slane %v847_v40, 2 }
  0xcd   : > { %2191 = vrot.lane.b32.xlu0 %v2877_v38, %s2420_s30  ;;  %v929_v38 = vrot.slane %v2747_v56, 1  ;;  %v932_v60 = vrot.slane %v2874_v37, 1  ;;  %v3470_v41 = vrot.slane %v2655_v4, 2  ;;  %v912_v26 = vrot.slane %v2800_v23, 1 }
  0xce   : > { %v911_v30 = vsel %vm893_vm3, %v909_v63, %v910_v47  ;;  %v3471_v8 = vrot.slane %v2644_v59, 2  ;;  %v970_v23 = vrot.slane %v2747_v56, 2  ;;  %v950_v6 = vrot.slane %v2744_v55, 2 }
  0xcf   : > { %v3076_v7 = vsel %vm934_vm2, %v3470_v41, %v968_v1  ;;  %v933_v37 = vsel %vm893_vm3, %v930_v50, %v932_v60  ;;  %v913_v13 = vsel %vm893_vm3, %v910_v47, %v912_v26  ;;  %v3473_v16 = vrot.slane %v2792_v17, 2 }
  0xd0   : > { %2196 = vrot.lane.b32.xlu1 %v2195_v54, %s2422_s23  ;;  %v2255_v14 = vpack.i.bf16 %v933_v37, %v913_v13  ;;  %v2295_v2 = vpack.i.bf16 %v2914_v42, %v2848_v10 }
  0xd1   : > { %2201 = vrot.lane.b32.xlu0 %v2898_v46, %s2419_s29  ;;  %v931_v46 = vsel %vm893_vm3, %v929_v38, %v930_v50  ;;  %v2330_v50 = vpack.i.bf16 %v2976_v12, %v2769_v5 }
  0xd2   : > { %v2230_v0 = vpack.i.bf16 %v931_v46, %v911_v30 }
  0xd4   : > { %2206 = vrot.lane.b32.xlu1 %v2205_v29, %s2423_s17 }
  0xd5   : > { %2211 = vrot.lane.b32.xlu0 %v2180_v18, %s2421_s26 }
  0xd8   : > { %2216 = vrot.lane.b32.xlu1 %v2185_v52, %s2420_s30  ;;  %v3083_v52 = vsel %vm934_vm2, %v3471_v8, %v948_v33 }
  0xd9   : > { %2221 = vrot.lane.b32.xlu0 %v2220_v25, %s2422_s23  ;;  %v2245_v40 = vpack.i.bf16 %v3076_v7, %v3083_v52 }
  0xdc   : > { %2226 = vrot.lane.b32.xlu1 %v2195_v54, %s2419_s29  ;;  %v3104_v54 = vsel %vm934_vm2, %v950_v6, %v3473_v16 }
  0xdd   : > { %2231 = vrot.lane.b32.xlu0 %v2230_v0, %s2423_s17 }
  0xe0   : > { %2236 = vrot.lane.b32.xlu1 %v2205_v29, %s2421_s26 }
  0xe1   : > { %2241 = vrot.lane.b32.xlu0 %v2180_v18, %s2420_s30  ;;  %v3472_v18 = vrot.slane %v2824_v48, 2 }
  0xe3   : > { %v3098_v19 = vsel %vm934_vm2, %v970_v23, %v3472_v18 }
  0xe4   : > { %2246 = vrot.lane.b32.xlu1 %v2245_v40, %s2422_s23  ;;  %v2270_v57 = vpack.i.bf16 %v3098_v19, %v3104_v54 }
  0xe5   : > { %2251 = vrot.lane.b32.xlu0 %v2220_v25, %s2419_s29 }
  0xe8   : > { %2256 = vrot.lane.b32.xlu1 %v2255_v14, %s2423_s17 }
  0xe9   : > { %2261 = vrot.lane.b32.xlu0 %v2230_v0, %s2421_s26 }
  0xec   : > { %2266 = vrot.lane.b32.xlu1 %v2205_v29, %s2420_s30  ;;  %v2305_v29 = vpack.i.bf16 %v2925_v43, %v2719_v31  ;;  %v2340_v43 = vpack.i.bf16 %v2956_v51, %v2615_v45  ;;  %v2365_v51 = vpack.i.bf16 %v2947_v58, %v2623_v49 }
  0xed   : > { %2271 = vrot.lane.b32.xlu0 %v2270_v57, %s2422_s23 }
  0xf0   : > { %2276 = vrot.lane.b32.xlu1 %v2245_v40, %s2419_s29 }
  0xf1   : > { %2286 = vrot.lane.b32.xlu0 %v2961_v9, %s2423_s17 }
  0xf4   : > { %2281 = vrot.lane.b32.xlu1 %v2255_v14, %s2421_s26 }
  0xf5   : > { %2291 = vrot.lane.b32.xlu0 %v2230_v0, %s2420_s30 }
  0xf8   : > { %2296 = vrot.lane.b32.xlu1 %v2295_v2, %s2422_s23 }
  0xf9   : > { %2301 = vrot.lane.b32.xlu0 %v2270_v57, %s2419_s29 }
  0xfc   : > { %2306 = vrot.lane.b32.xlu1 %v2305_v29, %s2418_s21 }
  0xfd   : > { %2311 = vrot.lane.b32.xlu0 %v2856_v34, %s2416_s20  ;;  %v2360_v34 = vpack.i.bf16 %v2981_v35, %v2909_v32 }
 0x100   : > { %2316 = vrot.lane.b32.xlu1 %v2958_v39, %s2423_s17 }
 0x101   : > { %2321 = vrot.lane.b32.xlu0 %v2961_v9, %s2421_s26 }
 0x104   : > { %2326 = vrot.lane.b32.xlu1 %v2255_v14, %s2420_s30 }
 0x105   : > { %2331 = vrot.lane.b32.xlu0 %v2330_v50, %s2422_s23 }
 0x108   : > { %2336 = vrot.lane.b32.xlu1 %v2295_v2, %s2419_s29 }
 0x109   : > { %2341 = vrot.lane.b32.xlu0 %v2340_v43, %s2418_s21 }
 0x10c   : > { %2346 = vrot.lane.b32.xlu1 %v2305_v29, %s2416_s20  ;;  %s1959_s20 = sshll.u32 %s3494_s16, 1 }
 0x10d   : > { %2351 = vrot.lane.b32.xlu0 %v2350_v15, %s2423_s17 }
 0x10e   : > { %v2097_v9 = vpop.permute.xlu1 %2096 }
 0x10f   : > { %v2099_v60 = vunpack.i.h.bf16 %v2097_v9  ;;  %v2098_v41 = vunpack.i.l.bf16 %v2097_v9 }
 0x110   : > { %2356 = vrot.lane.b32.xlu1 %v2958_v39, %s2421_s26 }
 0x111   : > { %2361 = vrot.lane.b32.xlu0 %v2360_v34, %s2422_s23 }
 0x112   : > { %v3153_v21 = vpop.permute.xlu1 %2106 }
 0x114   : > { %2366 = vrot.lane.b32.xlu1 %v2365_v51, %s2418_s21  ;;  %s1960_s21 = sshll.u32 %s3488_s10, 5 }
 0x115   : > { %2371 = vrot.lane.b32.xlu0 %v2370_v22, %s2423_s17  ;;  %s654_s29 = sadd.s32 %s1960_s21, %s1959_s20 }
 0x116   : > { %s1961_s26 = sshll.u32 %s654_s29, 3 }
 0x117   : > { %v3155_v39 = vpop.permute.xlu1 %2111  ;;  %s3365_s27 = scalar_lea.vmem %s3451_s9, %s1961_s26 }
 0x11a   : > { %v2102_v61 = vpop.permute.xlu0 %2101 }
 0x11b   : > { %v3161_v47 = vpop.permute.xlu1 %2126  ;;  %v2104_v9 = vunpack.i.h.bf16 %v2102_v61 }
 0x11e   : > { %v3157_v15 = vpop.permute.xlu0 %2116 }
 0x123   : > { %v3159_v38 = vpop.permute.xlu0 %2121 }
 0x127   : > { %v3163_v58 = vpop.permute.xlu0 %2136 }
 0x12a   : > { %v3165_v25 = vpop.permute.xlu1 %2131 }
 0x12b   : > { %v3167_v63 = vpop.permute.xlu0 %2146 }
 0x12e   : > { %v3169_v46 = vpop.permute.xlu1 %2141 }
 0x12f   : > { %v2157_v36 = vpop.permute.xlu0 %2156 }
 0x130   : > { %v2159_v30 = vunpack.i.h.bf16 %v2157_v36  ;;  %v2158_v0 = vunpack.i.l.bf16 %v2157_v36  ;;  %v2103_v36 = vunpack.i.l.bf16 %v2102_v61 }
 0x132   : > { %v2152_v11 = vpop.permute.xlu1 %2151 }
 0x133   : > { %v2154_v22 = vunpack.i.h.bf16 %v2152_v11  ;;  %v2153_v1 = vunpack.i.l.bf16 %v2152_v11  ;;  %v2162_v33 = vpop.permute.xlu0 %2161 }
 0x134   : > { %v2164_v13 = vunpack.i.h.bf16 %v2162_v33  ;;  %v2163_v14 = vunpack.i.l.bf16 %v2162_v33 }
 0x135   : > { %v1346_v26 = vsel %vm1337_vm1, %v2712_v28, %v2154_v22  ;;  %v1338_v8 = vsel %vm1337_vm1, %v2697_v24, %v2153_v1 }
 0x136   : > { %v1363_v40 = vsel %vm1354_vm4, %v1346_v26, %v2159_v30  ;;  %v1355_v37 = vsel %vm1354_vm4, %v1338_v8, %v2158_v0  ;;  %v2167_v23 = vpop.permute.xlu1 %2166 }
 0x137   : > { %v1372_v6 = vsel %vm1371_vm5, %v1355_v37, %v2098_v41  ;;  %v1380_v18 = vsel %vm1371_vm5, %v1363_v40, %v2099_v60  ;;  %v2172_v16 = vpop.permute.xlu0 %2171  ;;  %v2169_v50 = vunpack.i.h.bf16 %v2167_v23  ;;  %v2168_v43 = vunpack.i.l.bf16 %v2167_v23 }
 0x138   : > { %v2174_v57 = vunpack.i.h.bf16 %v2172_v16  ;;  %v2173_v2 = vunpack.i.l.bf16 %v2172_v16  ;;  %v1389_v28 = vsel %vm1388_vm6, %v1372_v6, %v2163_v14  ;;  %v1397_v24 = vsel %vm1388_vm6, %v1380_v18, %v2164_v13 }
 0x139   : > { %v1347_v26 = vsel %vm1337_vm1, %v2719_v31, %v2169_v50  ;;  %v1339_v8 = vsel %vm1337_vm1, %v2708_v27, %v2168_v43  ;;  %v2109_v18 = vunpack.i.h.bf16 %v3153_v21  ;;  %v2108_v31 = vunpack.i.l.bf16 %v3153_v21 }
 0x13a   : > { %v2177_v29 = vpop.permute.xlu1 %2176  ;;  %v1406_v34 = vsel %vm1405_vm7, %v1389_v28, %v2173_v2  ;;  %v1414_v51 = vsel %vm1405_vm7, %v1397_v24, %v2174_v57 }
 0x13b   : > { %v2179_v11 = vunpack.i.h.bf16 %v2177_v29  ;;  %v2178_v22 = vunpack.i.l.bf16 %v2177_v29  ;;  %v2182_v1 = vpop.permute.xlu0 %2181  ;;  %v1423_v60 = vsel %vm1422_vm8, %v1406_v34, %v2103_v36  ;;  %v1431_v41 = vsel %vm1422_vm8, %v1414_v51, %v2104_v9 }
 0x13c   : > { %v2184_v30 = vunpack.i.h.bf16 %v2182_v1  ;;  %v2183_v0 = vunpack.i.l.bf16 %v2182_v1  ;;  %v2113_v51 = vunpack.i.l.bf16 %v3155_v39 }
 0x13d   : > { %v1356_v37 = vsel %vm1354_vm4, %v1339_v8, %v2178_v22  ;;  %v1364_v13 = vsel %vm1354_vm4, %v1347_v26, %v2179_v11 }
 0x13e   : > { %v2187_v33 = vpop.permute.xlu1 %2186  ;;  %v1440_v40 = vsel %vm1439_vm9, %v1423_v60, %v2183_v0  ;;  %v1448_v61 = vsel %vm1439_vm9, %v1431_v41, %v2184_v30  ;;  %v1373_v16 = vsel %vm1371_vm5, %v1356_v37, %v2108_v31  ;;  %v1381_v57 = vsel %vm1371_vm5, %v1364_v13, %v2109_v18 }
 0x13f   : > { %v2189_v14 = vunpack.i.h.bf16 %v2187_v33  ;;  %v2188_v23 = vunpack.i.l.bf16 %v2187_v33  ;;  %v2192_v6 = vpop.permute.xlu0 %2191  ;;  %1571 = vmatmul.mubr.f32.vlgmr.msra.gmra.mrb[0].mxu0 %v1440_v40  ;;  %1611 = vmatmul.mubr.f32.vlgmr.msra.gmra.mrb[0].mxu1 %v1448_v61 }
 0x140   : > { %1963 = vmatprep.mubr.msk.f32.mxu0 %vm1337_vm1, %v3083_v52  ;;  %1971 = vmatprep.mubr.msk.f32.mxu1 %vm1337_vm1, %v3076_v7  ;;  %v2194_v43 = vunpack.i.h.bf16 %v2192_v6  ;;  %v2193_v21 = vunpack.i.l.bf16 %v2192_v6  ;;  %v2114_v7 = vunpack.i.h.bf16 %v3155_v39 }
 0x141   : > { %v1390_v24 = vsel %vm1388_vm6, %v1373_v16, %v2188_v23  ;;  %v1398_v29 = vsel %vm1388_vm6, %v1381_v57, %v2189_v14  ;;  %v2119_v14 = vunpack.i.h.bf16 %v3157_v15 }
 0x142   : > { %v2197_v27 = vpop.permute.xlu1 %2196  ;;  %v1348_v60 = vsel %vm1337_vm1, %v2615_v45, %v2194_v43  ;;  %v1340_v41 = vsel %vm1337_vm1, %v2612_v44, %v2193_v21  ;;  %v2118_v45 = vunpack.i.l.bf16 %v3157_v15 }
 0x143   : > { %v2199_v2 = vunpack.i.h.bf16 %v2197_v27  ;;  %v2198_v28 = vunpack.i.l.bf16 %v2197_v27  ;;  %v2202_v50 = vpop.permute.xlu0 %2201 }
 0x144   : > { %v2204_v9 = vunpack.i.h.bf16 %v2202_v50  ;;  %v2203_v36 = vunpack.i.l.bf16 %v2202_v50 }
 0x145   : > { %v1407_v34 = vsel %vm1405_vm7, %v1390_v24, %v2198_v28  ;;  %v1415_v52 = vsel %vm1405_vm7, %v1398_v29, %v2199_v2  ;;  %v2123_v24 = vunpack.i.l.bf16 %v3159_v38 }
 0x146   : > { %v2207_v11 = vpop.permute.xlu1 %2206  ;;  %v1424_v0 = vsel %vm1422_vm8, %v1407_v34, %v2113_v51  ;;  %v1432_v33 = vsel %vm1422_vm8, %v1415_v52, %v2114_v7  ;;  %v1357_v8 = vsel %vm1354_vm4, %v1340_v41, %v2203_v36  ;;  %v1365_v40 = vsel %vm1354_vm4, %v1348_v60, %v2204_v9 }
 0x147   : > { %v2209_v22 = vunpack.i.h.bf16 %v2207_v11  ;;  %v2208_v1 = vunpack.i.l.bf16 %v2207_v11  ;;  %v2212_v30 = vpop.permute.xlu0 %2211  ;;  %v1374_v23 = vsel %vm1371_vm5, %v1357_v8, %v2118_v45  ;;  %v1382_v6 = vsel %vm1371_vm5, %v1365_v40, %v2119_v14 }
 0x148   : > { %v2214_v61 = vunpack.i.h.bf16 %v2212_v30  ;;  %v2213_v37 = vunpack.i.l.bf16 %v2212_v30  ;;  %v2129_v60 = vunpack.i.h.bf16 %v3161_v47  ;;  %v2133_v45 = vunpack.i.l.bf16 %v3165_v25 }
 0x149   : > { %v1441_v26 = vsel %vm1439_vm9, %v1424_v0, %v2208_v1  ;;  %v1449_v39 = vsel %vm1439_vm9, %v1432_v33, %v2209_v22 }
 0x14a   : > { %v2217_v13 = vpop.permute.xlu1 %2216  ;;  %1576 = vmatmul.mubr.f32.gmra.mrb[2].mxu0 %v1441_v26  ;;  %1616 = vmatmul.mubr.f32.gmra.mrb[2].mxu1 %v1449_v39  ;;  %v1391_v27 = vsel %vm1388_vm6, %v1374_v23, %v2213_v37  ;;  %v1399_v16 = vsel %vm1388_vm6, %v1382_v6, %v2214_v61 }
 0x14b   : > { %1964 = vmatprep.mubr.msk.f32.mxu0 %vm1337_vm1, %v3104_v54  ;;  %1972 = vmatprep.mubr.msk.f32.mxu1 %vm1337_vm1, %v3098_v19  ;;  %v2222_v44 = vpop.permute.xlu0 %2221  ;;  %v2219_v2 = vunpack.i.h.bf16 %v2217_v13  ;;  %v2218_v15 = vunpack.i.l.bf16 %v2217_v13  ;;  %v2124_v19 = vunpack.i.h.bf16 %v3159_v38 }
 0x14c   : > { %v2224_v18 = vunpack.i.h.bf16 %v2222_v44  ;;  %v2223_v31 = vunpack.i.l.bf16 %v2222_v44 }
 0x14d   : > { %v1349_v9 = vsel %vm1337_vm1, %v2623_v49, %v2219_v2  ;;  %v1341_v36 = vsel %vm1337_vm1, %v2631_v53, %v2218_v15  ;;  %v2128_v49 = vunpack.i.l.bf16 %v3161_v47  ;;  %v3474_v2 = vld [vmem:[#allocation3_spill] sm:$0xff] }
 0x14e   : > { %v2227_v57 = vpop.permute.xlu1 %2226  ;;  %v1408_v28 = vsel %vm1405_vm7, %v1391_v27, %v2223_v31  ;;  %v1416_v54 = vsel %vm1405_vm7, %v1399_v16, %v2224_v18 }
 0x14f   : > { %v2229_v29 = vunpack.i.h.bf16 %v2227_v57  ;;  %v2228_v50 = vunpack.i.l.bf16 %v2227_v57  ;;  %v2232_v43 = vpop.permute.xlu0 %2231  ;;  %v1425_v7 = vsel %vm1422_vm8, %v1408_v28, %v2123_v24  ;;  %v1433_v51 = vsel %vm1422_vm8, %v1416_v54, %v2124_v19  ;;  %v3475_v28 = vld [vmem:[#allocation2_spill] sm:$0xff] }
 0x150   : > { %v2234_v21 = vunpack.i.h.bf16 %v2232_v43  ;;  %v2233_v34 = vunpack.i.l.bf16 %v2232_v43 }
 0x151   : > { %v1358_v22 = vsel %vm1354_vm4, %v1341_v36, %v2228_v50  ;;  %v1366_v1 = vsel %vm1354_vm4, %v1349_v9, %v2229_v29 }
 0x152   : > { %v2237_v52 = vpop.permute.xlu1 %2236  ;;  %v1442_v11 = vsel %vm1439_vm9, %v1425_v7, %v2233_v34  ;;  %v1450_v38 = vsel %vm1439_vm9, %v1433_v51, %v2234_v21  ;;  %v1375_v41 = vsel %vm1371_vm5, %v1358_v22, %v2128_v49  ;;  %v1383_v26 = vsel %vm1371_vm5, %v1366_v1, %v2129_v60 }
 0x153   : > { %v2239_v30 = vunpack.i.h.bf16 %v2237_v52  ;;  %v2238_v0 = vunpack.i.l.bf16 %v2237_v52  ;;  %v2242_v33 = vpop.permute.xlu0 %2241  ;;  %1581 = vmatmul.mubr.f32.gmra.mrb[4].mxu0 %v1442_v11  ;;  %1621 = vmatmul.mubr.f32.gmra.mrb[4].mxu1 %v1450_v38  ;;  %v2139_v34 = vunpack.i.h.bf16 %v3163_v58  ;;  %v2138_v52 = vunpack.i.l.bf16 %v3163_v58 }
 0x154   : > { %1965 = vmatprep.mubr.msk.f32.mxu0 %vm1337_vm1, %v2848_v10  ;;  %1973 = vmatprep.mubr.msk.f32.mxu1 %vm1337_vm1, %v2914_v42  ;;  %v2244_v13 = vunpack.i.h.bf16 %v2242_v33  ;;  %v2243_v47 = vunpack.i.l.bf16 %v2242_v33  ;;  %v2134_v42 = vunpack.i.h.bf16 %v3165_v25 }
 0x155   : > { %v1392_v40 = vsel %vm1388_vm6, %v1375_v41, %v2238_v0  ;;  %v1400_v61 = vsel %vm1388_vm6, %v1383_v26, %v2239_v30 }
 0x156   : > { %v2247_v53 = vpop.permute.xlu1 %2246  ;;  %v1350_v15 = vsel %vm1337_vm1, %v3474_v2, %v2244_v13  ;;  %v1342_v54 = vsel %vm1337_vm1, %v3475_v28, %v2243_v47 }
 0x157   : > { %v2249_v39 = vunpack.i.h.bf16 %v2247_v53  ;;  %v2248_v8 = vunpack.i.l.bf16 %v2247_v53  ;;  %v2252_v37 = vpop.permute.xlu0 %2251 }
 0x158   : > { %v2254_v44 = vunpack.i.h.bf16 %v2252_v37  ;;  %v2253_v23 = vunpack.i.l.bf16 %v2252_v37 }
 0x159   : > { %v1409_v14 = vsel %vm1405_vm7, %v1392_v40, %v2248_v8  ;;  %v1417_v10 = vsel %vm1405_vm7, %v1400_v61, %v2249_v39 }
 0x15a   : > { %v2257_v6 = vpop.permute.xlu1 %2256  ;;  %v1426_v16 = vsel %vm1422_vm8, %v1409_v14, %v2133_v45  ;;  %v1434_v57 = vsel %vm1422_vm8, %v1417_v10, %v2134_v42  ;;  %v1359_v24 = vsel %vm1354_vm4, %v1342_v54, %v2253_v23  ;;  %v1367_v29 = vsel %vm1354_vm4, %v1350_v15, %v2254_v44 }
 0x15b   : > { %v2259_v18 = vunpack.i.h.bf16 %v2257_v6  ;;  %v2258_v31 = vunpack.i.l.bf16 %v2257_v6  ;;  %v2262_v27 = vpop.permute.xlu0 %2261  ;;  %v1376_v51 = vsel %vm1371_vm5, %v1359_v24, %v2138_v52  ;;  %v1384_v9 = vsel %vm1371_vm5, %v1367_v29, %v2139_v34 }
 0x15c   : > { %v2264_v50 = vunpack.i.h.bf16 %v2262_v27  ;;  %v2263_v43 = vunpack.i.l.bf16 %v2262_v27  ;;  %v2144_v6 = vunpack.i.h.bf16 %v3169_v46 }
 0x15d   : > { %v1443_v19 = vsel %vm1439_vm9, %v1426_v16, %v2258_v31  ;;  %v1451_v25 = vsel %vm1439_vm9, %v1434_v57, %v2259_v18 }
 0x15e   : > { %v2267_v21 = vpop.permute.xlu1 %2266  ;;  %1586 = vmatmul.mubr.f32.gmra.mrb[6].mxu0 %v1443_v19  ;;  %1626 = vmatmul.mubr.f32.gmra.mrb[6].mxu1 %v1451_v25  ;;  %v1393_v38 = vsel %vm1388_vm6, %v1376_v51, %v2263_v43  ;;  %v1401_v22 = vsel %vm1388_vm6, %v1384_v9, %v2264_v50  ;;  %v3476_v51 = vld [vmem:[#allocation4_spill] sm:$0xff] }
 0x15f   : > { %1966 = vmatprep.mubr.msk.f32.mxu0 %vm1337_vm1, %v2769_v5  ;;  %1974 = vmatprep.mubr.msk.f32.mxu1 %vm1337_vm1, %v2976_v12  ;;  %v2272_v7 = vpop.permute.xlu0 %2271  ;;  %v2149_v5 = vunpack.i.h.bf16 %v3167_v63  ;;  %v2148_v12 = vunpack.i.l.bf16 %v3167_v63  ;;  %v2269_v40 = vunpack.i.h.bf16 %v2267_v21  ;;  %v2268_v61 = vunpack.i.l.bf16 %v2267_v21 }
 0x160   : > { %v2274_v36 = vunpack.i.h.bf16 %v2272_v7  ;;  %v2273_v11 = vunpack.i.l.bf16 %v2272_v7 }
 0x161   : > { %v1351_v14 = vsel %vm1337_vm1, %v2655_v4, %v2269_v40  ;;  %v1343_v10 = vsel %vm1337_vm1, %v2644_v59, %v2268_v61 }
 0x162   : > { %v2277_v1 = vpop.permute.xlu1 %2276  ;;  %v1410_v58 = vsel %vm1405_vm7, %v1393_v38, %v2273_v11  ;;  %v1418_v30 = vsel %vm1405_vm7, %v1401_v22, %v2274_v36 }
 0x163   : > { %v2287_v0 = vpop.permute.xlu0 %2286  ;;  %v1427_v53 = vsel %vm1422_vm8, %v1410_v58, %v2148_v12  ;;  %v1435_v41 = vsel %vm1422_vm8, %v1418_v30, %v2149_v5  ;;  %v2279_v63 = vunpack.i.h.bf16 %v2277_v1  ;;  %v2278_v37 = vunpack.i.l.bf16 %v2277_v1 }
 0x164   : > { %v2289_v33 = vunpack.i.h.bf16 %v2287_v0  ;;  %v2288_v60 = vunpack.i.l.bf16 %v2287_v0 }
 0x165   : > { %v1360_v42 = vsel %vm1354_vm4, %v1343_v10, %v2278_v37  ;;  %v1368_v45 = vsel %vm1354_vm4, %v1351_v14, %v2279_v63 }
 0x166   : > { %v2282_v49 = vpop.permute.xlu1 %2281  ;;  %v1444_v26 = vsel %vm1439_vm9, %v1427_v53, %v2288_v60  ;;  %v1452_v39 = vsel %vm1439_vm9, %v1435_v41, %v2289_v33  ;;  %v1385_v59 = vsel %vm1371_vm5, %v1368_v45, %v2144_v6 }
 0x167   : > { %v2292_v8 = vpop.permute.xlu0 %2291  ;;  %1591 = vmatmul.mubr.f32.gmra.mrb[8].mxu0 %v1444_v26  ;;  %1631 = vmatmul.mubr.f32.gmra.mrb[8].mxu1 %v1452_v39  ;;  %v2284_v44 = vunpack.i.h.bf16 %v2282_v49  ;;  %v2283_v23 = vunpack.i.l.bf16 %v2282_v49 }
 0x168   : > { %1967 = vmatprep.mubr.msk.f32.mxu0 %vm1337_vm1, %v2909_v32  ;;  %1975 = vmatprep.mubr.msk.f32.mxu1 %vm1337_vm1, %v2981_v35  ;;  %v2143_v35 = vunpack.i.l.bf16 %v3169_v46  ;;  %v2294_v52 = vunpack.i.h.bf16 %v2292_v8  ;;  %v2293_v7 = vunpack.i.l.bf16 %v2292_v8 }
 0x169   : > { %v1402_v15 = vsel %vm1388_vm6, %v1385_v59, %v2284_v44 }
 0x16a   : > { %v2297_v13 = vpop.permute.xlu1 %2296  ;;  %v1377_v4 = vsel %vm1371_vm5, %v1360_v42, %v2143_v35  ;;  %v1352_v58 = vsel %vm1337_vm1, %v2747_v56, %v2294_v52  ;;  %v1344_v30 = vsel %vm1337_vm1, %v2744_v55, %v2293_v7 }
 0x16b   : > { %v2302_v47 = vpop.permute.xlu0 %2301  ;;  %v2299_v18 = vunpack.i.h.bf16 %v2297_v13  ;;  %v2298_v31 = vunpack.i.l.bf16 %v2297_v13  ;;  %v1394_v2 = vsel %vm1388_vm6, %v1377_v4, %v2283_v23 }
 0x16c   : > { %v2304_v9 = vunpack.i.h.bf16 %v2302_v47  ;;  %v2303_v36 = vunpack.i.l.bf16 %v2302_v47 }
 0x16d   : > { %v1411_v25 = vsel %vm1405_vm7, %v1394_v2, %v2298_v31  ;;  %v1419_v46 = vsel %vm1405_vm7, %v1402_v15, %v2299_v18 }
 0x16e   : > { %v2307_v32 = vpop.permute.xlu1 %2306  ;;  %v1361_v0 = vsel %vm1354_vm4, %v1344_v30, %v2303_v36  ;;  %v1369_v33 = vsel %vm1354_vm4, %v1352_v58, %v2304_v9  ;;  %v3356_v36 = vld [vmem:[%s3450_s8] ss:$0 sm:$0xff] }
 0x16f   : > { %v2309_v27 = vunpack.i.h.bf16 %v2307_v32  ;;  %v2308_v16 = vunpack.i.l.bf16 %v2307_v32  ;;  %v2312_v57 = vpop.permute.xlu0 %2311 }
 0x170   : > { %v2314_v38 = vunpack.i.h.bf16 %v2312_v57  ;;  %v2313_v22 = vunpack.i.l.bf16 %v2312_v57 }
 0x171   : > { %v1428_v29 = vsel %vm1422_vm8, %v1411_v25, %v2308_v16  ;;  %v1436_v50 = vsel %vm1422_vm8, %v1419_v46, %v2309_v27 }
 0x172   : > { %v2317_v28 = vpop.permute.xlu1 %2316  ;;  %v1378_v53 = vsel %vm1371_vm5, %v1361_v0, %v2313_v22  ;;  %v1386_v41 = vsel %vm1371_vm5, %v1369_v33, %v2314_v38 }
 0x173   : > { %v2319_v54 = vunpack.i.h.bf16 %v2317_v28  ;;  %v2318_v19 = vunpack.i.l.bf16 %v2317_v28  ;;  %v2322_v24 = vpop.permute.xlu0 %2321 }
 0x174   : > { %v2324_v5 = vunpack.i.h.bf16 %v2322_v24  ;;  %v2323_v12 = vunpack.i.l.bf16 %v2322_v24 }
 0x175   : > { %v1445_v43 = vsel %vm1439_vm9, %v1428_v29, %v2318_v19  ;;  %v1453_v21 = vsel %vm1439_vm9, %v1436_v50, %v2319_v54 }
 0x176   : > { %v2327_v34 = vpop.permute.xlu1 %2326  ;;  %1596 = vmatmul.mubr.f32.gmra.mrb[10].mxu0 %v1445_v43  ;;  %1636 = vmatmul.mubr.f32.gmra.mrb[10].mxu1 %v1453_v21  ;;  %v1395_v63 = vsel %vm1388_vm6, %v1378_v53, %v2323_v12  ;;  %v1403_v37 = vsel %vm1388_vm6, %v1386_v41, %v2324_v5 }
 0x177   : > { %1968 = vmatprep.mubr.msk.f32.mxu0 %vm1337_vm1, %v3476_v51  ;;  %1976 = vmatprep.mubr.msk.f32.mxu1 %vm1337_vm1, %v3009_v20  ;;  %v2332_v11 = vpop.permute.xlu0 %2331  ;;  %v2329_v60 = vunpack.i.h.bf16 %v2327_v34  ;;  %v2328_v20 = vunpack.i.l.bf16 %v2327_v34  ;;  %v3351_v51 = vld [vmem:[%s3449_s7] ss:$0 sm:$0xff] }
 0x178   : > { %v2334_v26 = vunpack.i.h.bf16 %v2332_v11  ;;  %v2333_v39 = vunpack.i.l.bf16 %v2332_v11 }
 0x179   : > { %v1353_v13 = vsel %vm1337_vm1, %v2824_v48, %v2329_v60  ;;  %v1345_v47 = vsel %vm1337_vm1, %v2792_v17, %v2328_v20 }
 0x17a   : > { %v2337_v1 = vpop.permute.xlu1 %2336  ;;  %v1412_v23 = vsel %vm1405_vm7, %v1395_v63, %v2333_v39  ;;  %v1420_v32 = vsel %vm1405_vm7, %v1403_v37, %v2334_v26 }
 0x17b   : > { %v2342_v49 = vpop.permute.xlu0 %2341  ;;  %v2339_v8 = vunpack.i.h.bf16 %v2337_v1  ;;  %v2338_v56 = vunpack.i.l.bf16 %v2337_v1 }
 0x17c   : > { %v2344_v40 = vunpack.i.h.bf16 %v2342_v49  ;;  %v2343_v61 = vunpack.i.l.bf16 %v2342_v49 }
 0x17d   : > { %v1362_v6 = vsel %vm1354_vm4, %v1345_v47, %v2338_v56  ;;  %v1370_v35 = vsel %vm1354_vm4, %v1353_v13, %v2339_v8 }
 0x17e   : > { %v2347_v55 = vpop.permute.xlu1 %2346  ;;  %v1429_v31 = vsel %vm1422_vm8, %v1412_v23, %v2343_v61  ;;  %v1437_v48 = vsel %vm1422_vm8, %v1420_v32, %v2344_v40 }
 0x17f   : > { %v2349_v14 = vunpack.i.h.bf16 %v2347_v55  ;;  %v2348_v10 = vunpack.i.l.bf16 %v2347_v55  ;;  %v2352_v42 = vpop.permute.xlu0 %2351 }
 0x180   : > { %v2354_v45 = vunpack.i.h.bf16 %v2352_v42  ;;  %v2353_v44 = vunpack.i.l.bf16 %v2352_v42 }
 0x181   : > { %v1379_v4 = vsel %vm1371_vm5, %v1362_v6, %v2348_v10  ;;  %v1387_v59 = vsel %vm1371_vm5, %v1370_v35, %v2349_v14 }
 0x182   : > { %v2357_v18 = vpop.permute.xlu1 %2356  ;;  %v1446_v16 = vsel %vm1439_vm9, %v1429_v31, %v2353_v44  ;;  %v1454_v57 = vsel %vm1439_vm9, %v1437_v48, %v2354_v45 }
 0x183   : > { %v2359_v27 = vunpack.i.h.bf16 %v2357_v18  ;;  %v2358_v17 = vunpack.i.l.bf16 %v2357_v18  ;;  %v2362_v2 = vpop.permute.xlu0 %2361  ;;  %1601 = vmatmul.mubr.f32.gmra.mrb[12].mxu0 %v1446_v16  ;;  %1641 = vmatmul.mubr.f32.gmra.mrb[12].mxu1 %v1454_v57 }
 0x184   : > { %v2364_v54 = vunpack.i.h.bf16 %v2362_v2  ;;  %v2363_v19 = vunpack.i.l.bf16 %v2362_v2  ;;  %1969 = vmatprep.mubr.msk.f32.mxu0 %vm1337_vm1, %v3042_v3  ;;  %1977 = vmatprep.mubr.msk.f32.mxu1 %vm1337_vm1, %v3027_v62 }
 0x185   : > { %v1396_v15 = vsel %vm1388_vm6, %v1379_v4, %v2358_v17  ;;  %v1404_v28 = vsel %vm1388_vm6, %v1387_v59, %v2359_v27 }
 0x186   : > { %v2367_v25 = vpop.permute.xlu1 %2366  ;;  %v1413_v29 = vsel %vm1405_vm7, %v1396_v15, %v2363_v19  ;;  %v1421_v50 = vsel %vm1405_vm7, %v1404_v28, %v2364_v54 }
 0x187   : > { %v2369_v46 = vunpack.i.h.bf16 %v2367_v25  ;;  %v2368_v24 = vunpack.i.l.bf16 %v2367_v25  ;;  %v2372_v43 = vpop.permute.xlu0 %2371 }
 0x188   : > { %v2374_v21 = vunpack.i.h.bf16 %v2372_v43  ;;  %v2373_v34 = vunpack.i.l.bf16 %v2372_v43 }
 0x189   : > { %v1430_v52 = vsel %vm1422_vm8, %v1413_v29, %v2368_v24  ;;  %v1438_v3 = vsel %vm1422_vm8, %v1421_v50, %v2369_v46 }
 0x18a   : > { %v1447_v7 = vsel %vm1439_vm9, %v1430_v52, %v2373_v34  ;;  %v1455_v62 = vsel %vm1439_vm9, %v1438_v3, %v2374_v21 }
 0x18b   : > { %1606 = vmatmul.mubr.f32.gmra.mrb[14].mxu0 %v1447_v7  ;;  %1646 = vmatmul.mubr.f32.gmra.mrb[14].mxu1 %v1455_v62 }
 0x212   : > { %v1572_v9 = vpop.f32.mrb[0].mxu0  ;;  %v1612_v11 = vpop.f32.mrb[0].mxu1 }
 0x213   : > { %v1658_v38 = vmul.f32 %v3351_v51, %v1572_v9  ;;  %v1666_v22 = vmul.f32 %v3351_v51, %v1612_v11  ;;  %v1574_v1 = vpop.f32.mrb[1].mxu0  ;;  %v1614_v58 = vpop.f32.mrb[1].mxu1 }
 0x215   : > { %v1681_v30 = vadd.f32 %v3356_v36, %v1658_v38  ;;  %v1689_v5 = vadd.f32 %v3356_v36, %v1666_v22 }
 0x217   : > { %v1697_v12 = vmax.f32 %v1681_v30, 0.0  ;;  %v1705_v0 = vmax.f32 %v1689_v5, 0.0 }
 0x219   : > { %1713 = vst.msk [vmem:[%s3365_s27] sm:$0xff] %vm838_vm0, %v1697_v12  ;;  %1721 = vst.msk [vmem:[%s3365_s27 + $0x40] sm:$0xff] %vm838_vm0, %v1705_v0 }
 0x21d   : > { %v1577_v33 = vpop.f32.mrb[2].mxu0  ;;  %v1617_v60 = vpop.f32.mrb[2].mxu1 }
 0x21e   : > { %v1659_v20 = vmul.f32 %v3351_v51, %v1577_v33  ;;  %v1667_v49 = vmul.f32 %v3351_v51, %v1617_v60  ;;  %v1579_v53 = vpop.f32.mrb[3].mxu0  ;;  %v1619_v41 = vpop.f32.mrb[3].mxu1 }
 0x220   : > { %v1682_v26 = vadd.f32 %v3356_v36, %v1659_v20  ;;  %v1690_v39 = vadd.f32 %v3356_v36, %v1667_v49 }
 0x222   : > { %v1698_v8 = vmax.f32 %v1682_v26, 0.0  ;;  %v1706_v56 = vmax.f32 %v1690_v39, 0.0 }
 0x224   : > { %1714 = vst.msk [vmem:[%s3365_s27 + $0x8] sm:$0xff] %vm838_vm0, %v1698_v8  ;;  %1722 = vst.msk [vmem:[%s3365_s27 + $0x48] sm:$0xff] %vm838_vm0, %v1706_v56 }
 0x226   : > { %v1582_v40 = vpop.f32.mrb[4].mxu0  ;;  %v1622_v61 = vpop.f32.mrb[4].mxu1 }
 0x227   : > { %v1660_v55 = vmul.f32 %v3351_v51, %v1582_v40  ;;  %v1668_v63 = vmul.f32 %v3351_v51, %v1622_v61  ;;  %v1584_v37 = vpop.f32.mrb[5].mxu0  ;;  %v1624_v13 = vpop.f32.mrb[5].mxu1 }
 0x229   : > { %v1683_v47 = vadd.f32 %v3356_v36, %v1660_v55  ;;  %v1691_v14 = vadd.f32 %v3356_v36, %v1668_v63 }
 0x22b   : > { %v1699_v10 = vmax.f32 %v1683_v47, 0.0  ;;  %v1707_v42 = vmax.f32 %v1691_v14, 0.0 }
 0x22d   : > { %1715 = vst.msk [vmem:[%s3365_s27 + $0x10] sm:$0xff] %vm838_vm0, %v1699_v10  ;;  %1723 = vst.msk [vmem:[%s3365_s27 + $0x50] sm:$0xff] %vm838_vm0, %v1707_v42 }
 0x231   : > { %v1587_v45 = vpop.f32.mrb[6].mxu0  ;;  %v1627_v44 = vpop.f32.mrb[6].mxu1 }
 0x232   : > { %v1661_v23 = vmul.f32 %v3351_v51, %v1587_v45  ;;  %v1669_v32 = vmul.f32 %v3351_v51, %v1627_v44  ;;  %v1589_v6 = vpop.f32.mrb[7].mxu0  ;;  %v1629_v35 = vpop.f32.mrb[7].mxu1 }
 0x234   : > { %v1684_v18 = vadd.f32 %v3356_v36, %v1661_v23  ;;  %v1692_v31 = vadd.f32 %v3356_v36, %v1669_v32 }
 0x236   : > { %v1700_v48 = vmax.f32 %v1684_v18, 0.0  ;;  %v1708_v27 = vmax.f32 %v1692_v31, 0.0 }
 0x238   : > { %1716 = vst.msk [vmem:[%s3365_s27 + $0x18] sm:$0xff] %vm838_vm0, %v1700_v48  ;;  %1724 = vst.msk [vmem:[%s3365_s27 + $0x58] sm:$0xff] %vm838_vm0, %v1708_v27 }
 0x23a   : > { %v1592_v17 = vpop.f32.mrb[8].mxu0  ;;  %v1632_v16 = vpop.f32.mrb[8].mxu1 }
 0x23b   : > { %v1662_v57 = vmul.f32 %v3351_v51, %v1592_v17  ;;  %v1670_v4 = vmul.f32 %v3351_v51, %v1632_v16  ;;  %v1594_v59 = vpop.f32.mrb[9].mxu0  ;;  %v1634_v2 = vpop.f32.mrb[9].mxu1 }
 0x23d   : > { %v1685_v15 = vadd.f32 %v3356_v36, %v1662_v57  ;;  %v1693_v28 = vadd.f32 %v3356_v36, %v1670_v4 }
 0x23f   : > { %v1701_v54 = vmax.f32 %v1685_v15, 0.0  ;;  %v1709_v19 = vmax.f32 %v1693_v28, 0.0 }
 0x241   : > { %1717 = vst.msk [vmem:[%s3365_s27 + $0x20] sm:$0xff] %vm838_vm0, %v1701_v54  ;;  %1725 = vst.msk [vmem:[%s3365_s27 + $0x60] sm:$0xff] %vm838_vm0, %v1709_v19 }
 0x249   : > { %v1597_v25 = vpop.f32.mrb[10].mxu0  ;;  %v1637_v46 = vpop.f32.mrb[10].mxu1 }
 0x24a   : > { %v1663_v24 = vmul.f32 %v3351_v51, %v1597_v25  ;;  %v1671_v29 = vmul.f32 %v3351_v51, %v1637_v46  ;;  %v1599_v50 = vpop.f32.mrb[11].mxu0  ;;  %v1639_v43 = vpop.f32.mrb[11].mxu1 }
 0x24c   : > { %v1686_v21 = vadd.f32 %v3356_v36, %v1663_v24  ;;  %v1694_v34 = vadd.f32 %v3356_v36, %v1671_v29 }
 0x24e   : > { %v1702_v52 = vmax.f32 %v1686_v21, 0.0  ;;  %v1710_v3 = vmax.f32 %v1694_v34, 0.0 }
 0x250   : > { %1718 = vst.msk [vmem:[%s3365_s27 + $0x28] sm:$0xff] %vm838_vm0, %v1702_v52  ;;  %1726 = vst.msk [vmem:[%s3365_s27 + $0x68] sm:$0xff] %vm838_vm0, %v1710_v3 }
 0x256   : > { %v1602_v7 = vpop.f32.mrb[12].mxu0  ;;  %v1642_v62 = vpop.f32.mrb[12].mxu1 }
 0x257   : > { %v1664_v9 = vmul.f32 %v3351_v51, %v1602_v7  ;;  %v1672_v11 = vmul.f32 %v3351_v51, %v1642_v62  ;;  %v1604_v38 = vpop.f32.mrb[13].mxu0  ;;  %v1644_v22 = vpop.f32.mrb[13].mxu1 }
 0x259   : > { %v1687_v1 = vadd.f32 %v3356_v36, %v1664_v9  ;;  %v1695_v58 = vadd.f32 %v3356_v36, %v1672_v11 }
 0x25b   : > { %v1703_v30 = vmax.f32 %v1687_v1, 0.0  ;;  %v1711_v5 = vmax.f32 %v1695_v58, 0.0 }
 0x25d   : > { %1719 = vst.msk [vmem:[%s3365_s27 + $0x30] sm:$0xff] %vm838_vm0, %v1703_v30  ;;  %1727 = vst.msk [vmem:[%s3365_s27 + $0x70] sm:$0xff] %vm838_vm0, %v1711_v5 }
 0x25e   : > { %v1607_v12 = vpop.f32.mrb[14].mxu0  ;;  %v1647_v0 = vpop.f32.mrb[14].mxu1 }
 0x25f   : > { %v1665_v33 = vmul.f32 %v3351_v51, %v1607_v12  ;;  %v1673_v60 = vmul.f32 %v3351_v51, %v1647_v0  ;;  %v1609_v20 = vpop.f32.mrb[15].mxu0  ;;  %v1649_v49 = vpop.f32.mrb[15].mxu1 }
 0x261   : > { %v1688_v53 = vadd.f32 %v3356_v36, %v1665_v33  ;;  %v1696_v41 = vadd.f32 %v3356_v36, %v1673_v60 }
 0x263   : > { %v1704_v26 = vmax.f32 %v1688_v53, 0.0  ;;  %v1712_v39 = vmax.f32 %v1696_v41, 0.0 }
 0x265   : > { %1720 = vst.msk [vmem:[%s3365_s27 + $0x38] sm:$0xff] %vm838_vm0, %v1704_v26  ;;  %1728 = vst.msk [vmem:[%s3365_s27 + $0x78] sm:$0xff] %vm838_vm0, %v1712_v39 }
 0x266 PF: > { %s19_s13 = sadd.s32 1, %s2413_s13   ;;  %s3477_s30 = smov %s2405_s11 }
 0x267   : > { %p16_p10 = scmp.ge.s32.totalorder %s19_s13, 6   ;;  %s3478_s10 = smov %s2409_s12 }
 0x268   : > { %s3479_s11 = smov %s3482_s14  ;;  %s3480_s12 = smov %s3486_s15 }
 0x269   :  { %18 = sbr.rel (!%p16_p10) target bundleno = 3 (0x3), region = 101 }

</bundles_post_ra>
